<compile_context>
chip_gen: v6e
topology: v6e:2x2x1
jax: 0.10.0
libtpu: 0.0.40
codegen_flags: <defaults>
</compile_context>

<pallas_src>
import functools

import jax
import jax.numpy as jnp
import numpy as np
from jax.experimental import pallas as pl
from jax.experimental.pallas import tpu as pltpu

NEG_SLOPE = 0.1                       # torch.nn.LeakyReLU(negative_slope=0.1)
COMPUTE_DTYPE = jnp.bfloat16          # activations / weights in HBM & MXU operands
VMEM_LIMIT_BYTES = 32 * 1024 * 1024   # safe on v5e/v6e/v7x; tile budget below is ~10 MiB
_TILE_VMEM_BUDGET = 10 << 20


def _pad_channels(c):
    # Lane-dense stores matter once C approaches the 128-lane width; padding tiny C
    # (e.g. 8) to 128 would multiply HBM traffic instead, so only pad when C >= 64.
    return c if c < 64 else ((c + 127) // 128) * 128


def _pick_tile_rows(H, W, cin, cout_p, budget_bytes=_TILE_VMEM_BUDGET, max_rows=256):
    """Largest row-tile (multiple of 8, capped) whose double-buffered footprint fits."""
    if H <= 8:
        return H

    def est(th):
        it = 2  # bf16
        in_b = (th + 2) * (W + 2) * cin * it
        out_b = th * W * cout_p * it
        pat_b = th * W * 9 * cin * it          # im2col patch matrix
        acc_b = th * W * cout_p * 4            # f32 accumulator
        return 2 * in_b + 2 * out_b + pat_b + acc_b

    best = 8
    th = 8
    hi = min(max_rows, ((H + 7) // 8) * 8)
    while th <= hi:
        if est(th) <= budget_bytes:
            best = th
        th += 8
    return min(best, H)


def _conv3x3_lrelu_kernel(x_ref, w_ref, o_ref):
    """One (batch, row-tile) slab per grid step.

    x_ref : (1, TH+2, W+2, Cin)   haloed bf16 input window
    w_ref : (9*Cin, Cout_p)       bf16 weights, taps folded into K
    o_ref : (1, TH, W, Cout_p)    bf16 output slab
    """
    _, _, _, cin = x_ref.shape
    _, th, w_out, cout_p = o_ref.shape

    # im2col: slice the 9 shifted taps directly off the ref, fold into K = 9*Cin.
    parts = [x_ref[0, dy:dy + th, dx:dx + w_out, :]
             for dy in range(3) for dx in range(3)]
    patches = jnp.concatenate(parts, axis=-1).reshape(th * w_out, 9 * cin)

    acc = jnp.dot(patches, w_ref[...], preferred_element_type=jnp.float32)
    y = jnp.where(acc > 0, acc, NEG_SLOPE * acc)          # LeakyReLU(0.1) in f32
    o_ref[0] = y.reshape(th, w_out, cout_p).astype(o_ref.dtype)


def conv3x3_lrelu(x_nhwc, w_hwio, stride=1):
    """3x3 'same' conv (no bias) + LeakyReLU(0.1), NHWC, Pallas.

    Accepts activations whose channel dim may already be zero-padded (>= weight Cin);
    returns output with Cout padded to a lane-friendly width (stripped by the caller).
    """
    x = x_nhwc.astype(COMPUTE_DTYPE)
    N, H, W, Cin = x.shape
    kh, kw, wcin, Cout = w_hwio.shape
    assert (kh, kw) == (3, 3) and wcin <= Cin

    Cout_p = _pad_channels(Cout)
    # Zero-pad weight Cin (to match channel-padded activations) and Cout (lane-dense).
    w = jnp.pad(w_hwio.astype(jnp.float32),
                ((0, 0), (0, 0), (0, Cin - wcin), (0, Cout_p - Cout)))
    w_mat = w.reshape(9 * Cin, Cout_p).astype(COMPUTE_DTYPE)

    # Row tiling with a 1-row halo: build overlapping windows with one gather
    # (this also absorbs the zero-padding pass).
    TH = _pick_tile_rows(H, W, Cin, Cout_p)
    T = -(-H // TH)
    xp = jnp.pad(x, ((0, 0), (1, 1), (1, 1), (0, 0)))                 # (N, H+2, W+2, Cin)
    row_idx = jnp.minimum(
        jnp.arange(T)[:, None] * TH + jnp.arange(TH + 2)[None, :], H + 1)
    xw = xp[:, row_idx].reshape(N * T, TH + 2, W + 2, Cin)            # (N*T, TH+2, W+2, Cin)

    flops = 2 * (N * T) * TH * W * (9 * Cin) * Cout_p
    bytes_accessed = xw.size * 2 + w_mat.size * 2 + (N * T) * TH * W * Cout_p * 2

    out = pl.pallas_call(
        _conv3x3_lrelu_kernel,
        out_shape=jax.ShapeDtypeStruct((N * T, TH, W, Cout_p), COMPUTE_DTYPE),
        grid=(N * T,),
        in_specs=[
            pl.BlockSpec((1, TH + 2, W + 2, Cin), lambda i: (i, 0, 0, 0)),
            pl.BlockSpec((9 * Cin, Cout_p), lambda i: (0, 0)),
        ],
        out_specs=pl.BlockSpec((1, TH, W, Cout_p), lambda i: (i, 0, 0, 0)),
        compiler_params=pltpu.CompilerParams(
            dimension_semantics=("parallel",),
            vmem_limit_bytes=VMEM_LIMIT_BYTES),
        cost_estimate=pl.CostEstimate(
            flops=flops, transcendentals=0, bytes_accessed=bytes_accessed),
    )(xw, w_mat)

    y = out.reshape(N, T * TH, W, Cout_p)[:, :H]
    if stride > 1:
        y = y[:, ::stride, ::stride, :]
    return y


def init_vgg_block_params(key, in_channels, out_channels, n_convolution):
    """HWIO weights matching torch Conv2d(kernel=3, bias=False) layers of VGGNetBlock."""
    weights = []
    cin = in_channels
    for _ in range(n_convolution):
        key, sub = jax.random.split(key)
        w = jax.random.normal(sub, (3, 3, cin, out_channels), jnp.float32)
        weights.append(w * (2.0 / (9 * cin)) ** 0.5)
        cin = out_channels
    return weights


def vgg_block_forward(weights, x_nchw, stride=1):
    """VGGNetBlock.forward: n convs (3x3, pad 1, no bias) + LeakyReLU(0.1); last has stride."""
    x = jnp.transpose(x_nchw, (0, 2, 3, 1)).astype(COMPUTE_DTYPE)      # NHWC, bf16
    n = len(weights)
    for idx, w in enumerate(weights):
        s = stride if idx == n - 1 else 1
        x = conv3x3_lrelu(x, w, stride=s)          # keeps lane-padded channels through chain
    out_channels = weights[-1].shape[-1]
    x = x[..., :out_channels]                      # strip channel padding once, at the end
    return jnp.transpose(x, (0, 3, 1, 2)).astype(jnp.float32)          # back to NCHW


# ---------------- pure-JAX reference (same bf16-operand / f32-accum policy) ----------------
def _ref_vgg_block(weights, x_nchw, stride=1):
    x = jnp.transpose(x_nchw, (0, 2, 3, 1)).astype(COMPUTE_DTYPE)
    n = len(weights)
    for idx, w in enumerate(weights):
        s = stride if idx == n - 1 else 1
        y = jax.lax.conv_general_dilated(
            x, w.astype(COMPUTE_DTYPE),
            window_strides=(s, s), padding=((1, 1), (1, 1)),
            dimension_numbers=("NHWC", "HWIO", "NHWC"),
            preferred_element_type=jnp.float32)
        y = jnp.where(y > 0, y, NEG_SLOPE * y)
        x = y.astype(COMPUTE_DTYPE)
    return jnp.transpose(x, (0, 3, 1, 2)).astype(jnp.float32)


if __name__ == "__main__":
    N, in_channels, out_channels = 2, 4, 8
    H = W = 16
    n_convolution, stride = 2, 2

    key = jax.random.PRNGKey(0)
    kx, kp = jax.random.split(key)
    x = jax.random.normal(kx, (N, in_channels, H, W), jnp.float32)
    weights = init_vgg_block_params(kp, in_channels, out_channels, n_convolution)

    fwd = jax.jit(functools.partial(vgg_block_forward, stride=stride))
    out = jax.block_until_ready(fwd(weights, x))

    H_out = (H - 1) // stride + 1
    assert out.shape == (N, out_channels, H_out, H_out), out.shape

    ref = _ref_vgg_block(weights, x, stride=stride)
    np.testing.assert_allclose(np.asarray(out), np.asarray(ref), rtol=2e-2, atol=2e-2)

    print("KERNEL_OK")
</pallas_src>

<mosaic_0001>
module attributes {stable_mosaic.version = 11 : i64} {
  func.func @_conv3x3_lrelu_kernel(%arg0: i32, %arg1: memref<1x18x18x4xbf16, #tpu.memory_space<vmem>>, %arg2: memref<36x8xbf16, #tpu.memory_space<vmem>>, %arg3: memref<1x16x16x8xbf16, #tpu.memory_space<vmem>>) attributes {dimension_semantics = [#tpu.dimension_semantics<parallel>], iteration_bounds = array<i64: 2>, scalar_prefetch = 0 : i64, scratch_operands = 0 : i64, tpu.core_type = #tpu.core_type<tc>, window_params = [{transform_indices = @transform_0, window_bounds = array<i64: 1, 18, 18, 4>}, {pipeline_mode = #tpu.pipeline_mode<synchronous>, transform_indices = @transform_1, window_bounds = array<i64: 36, 8>}, {transform_indices = @transform_2, window_bounds = array<i64: 1, 16, 16, 8>}]} {
    %c0 = arith.constant 0 : index
    %c0_0 = arith.constant 0 : index
    %c0_1 = arith.constant 0 : index
    %c0_2 = arith.constant 0 : index
    %0 = vector.load %arg1[%c0, %c0_0, %c0_1, %c0_2] : memref<1x18x18x4xbf16, #tpu.memory_space<vmem>>, vector<1x16x16x4xbf16>
    %1 = vector.shape_cast %0 : vector<1x16x16x4xbf16> to vector<16x16x4xbf16>
    %c0_3 = arith.constant 0 : index
    %c0_4 = arith.constant 0 : index
    %c1 = arith.constant 1 : index
    %c0_5 = arith.constant 0 : index
    %2 = vector.load %arg1[%c0_3, %c0_4, %c1, %c0_5] : memref<1x18x18x4xbf16, #tpu.memory_space<vmem>>, vector<1x16x16x4xbf16>
    %3 = vector.shape_cast %2 : vector<1x16x16x4xbf16> to vector<16x16x4xbf16>
    %c0_6 = arith.constant 0 : index
    %c0_7 = arith.constant 0 : index
    %c2 = arith.constant 2 : index
    %c0_8 = arith.constant 0 : index
    %4 = vector.load %arg1[%c0_6, %c0_7, %c2, %c0_8] : memref<1x18x18x4xbf16, #tpu.memory_space<vmem>>, vector<1x16x16x4xbf16>
    %5 = vector.shape_cast %4 : vector<1x16x16x4xbf16> to vector<16x16x4xbf16>
    %c0_9 = arith.constant 0 : index
    %c1_10 = arith.constant 1 : index
    %c0_11 = arith.constant 0 : index
    %c0_12 = arith.constant 0 : index
    %6 = vector.load %arg1[%c0_9, %c1_10, %c0_11, %c0_12] : memref<1x18x18x4xbf16, #tpu.memory_space<vmem>>, vector<1x16x16x4xbf16>
    %7 = vector.shape_cast %6 : vector<1x16x16x4xbf16> to vector<16x16x4xbf16>
    %c0_13 = arith.constant 0 : index
    %c1_14 = arith.constant 1 : index
    %c1_15 = arith.constant 1 : index
    %c0_16 = arith.constant 0 : index
    %8 = vector.load %arg1[%c0_13, %c1_14, %c1_15, %c0_16] : memref<1x18x18x4xbf16, #tpu.memory_space<vmem>>, vector<1x16x16x4xbf16>
    %9 = vector.shape_cast %8 : vector<1x16x16x4xbf16> to vector<16x16x4xbf16>
    %c0_17 = arith.constant 0 : index
    %c1_18 = arith.constant 1 : index
    %c2_19 = arith.constant 2 : index
    %c0_20 = arith.constant 0 : index
    %10 = vector.load %arg1[%c0_17, %c1_18, %c2_19, %c0_20] : memref<1x18x18x4xbf16, #tpu.memory_space<vmem>>, vector<1x16x16x4xbf16>
    %11 = vector.shape_cast %10 : vector<1x16x16x4xbf16> to vector<16x16x4xbf16>
    %c0_21 = arith.constant 0 : index
    %c2_22 = arith.constant 2 : index
    %c0_23 = arith.constant 0 : index
    %c0_24 = arith.constant 0 : index
    %12 = vector.load %arg1[%c0_21, %c2_22, %c0_23, %c0_24] : memref<1x18x18x4xbf16, #tpu.memory_space<vmem>>, vector<1x16x16x4xbf16>
    %13 = vector.shape_cast %12 : vector<1x16x16x4xbf16> to vector<16x16x4xbf16>
    %c0_25 = arith.constant 0 : index
    %c2_26 = arith.constant 2 : index
    %c1_27 = arith.constant 1 : index
    %c0_28 = arith.constant 0 : index
    %14 = vector.load %arg1[%c0_25, %c2_26, %c1_27, %c0_28] : memref<1x18x18x4xbf16, #tpu.memory_space<vmem>>, vector<1x16x16x4xbf16>
    %15 = vector.shape_cast %14 : vector<1x16x16x4xbf16> to vector<16x16x4xbf16>
    %c0_29 = arith.constant 0 : index
    %c2_30 = arith.constant 2 : index
    %c2_31 = arith.constant 2 : index
    %c0_32 = arith.constant 0 : index
    %16 = vector.load %arg1[%c0_29, %c2_30, %c2_31, %c0_32] : memref<1x18x18x4xbf16, #tpu.memory_space<vmem>>, vector<1x16x16x4xbf16>
    %17 = vector.shape_cast %16 : vector<1x16x16x4xbf16> to vector<16x16x4xbf16>
    %18 = tpu.concatenate %1, %3, %5, %7, %9, %11, %13, %15, %17 in 2 : vector<16x16x4xbf16>, vector<16x16x4xbf16>, vector<16x16x4xbf16>, vector<16x16x4xbf16>, vector<16x16x4xbf16>, vector<16x16x4xbf16>, vector<16x16x4xbf16>, vector<16x16x4xbf16>, vector<16x16x4xbf16> -> vector<16x16x36xbf16>
    %19 = vector.shape_cast %18 : vector<16x16x36xbf16> to vector<256x36xbf16>
    %c0_33 = arith.constant 0 : index
    %c0_34 = arith.constant 0 : index
    %20 = vector.load %arg2[%c0_33, %c0_34] : memref<36x8xbf16, #tpu.memory_space<vmem>>, vector<36x8xbf16>
    %cst = arith.constant dense<0.000000e+00> : vector<256x8xf32>
    %21 = tpu.matmul %19, %20, %cst {dimension_numbers = #tpu.dot_dimension_numbers<[1], [0], [0], [1], [0, 0, 1, 1], [], []>} : vector<256x36xbf16>, vector<36x8xbf16>, vector<256x8xf32> -> vector<256x8xf32>
    %cst_35 = arith.constant 0.000000e+00 : f32
    %22 = vector.broadcast %cst_35 : f32 to vector<256x8xf32>
    %23 = arith.cmpf ogt, %21, %22 : vector<256x8xf32>
    %cst_36 = arith.constant 1.000000e-01 : f32
    %24 = vector.broadcast %cst_36 : f32 to vector<256x8xf32>
    %25 = arith.mulf %24, %21 : vector<256x8xf32>
    %26 = arith.select %23, %21, %25 : vector<256x8xi1>, vector<256x8xf32>
    %27 = vector.shape_cast %26 : vector<256x8xf32> to vector<16x16x8xf32>
    %28 = arith.truncf %27 : vector<16x16x8xf32> to vector<16x16x8xbf16>
    %c0_37 = arith.constant 0 : index
    %c0_38 = arith.constant 0 : index
    %c0_39 = arith.constant 0 : index
    %c0_40 = arith.constant 0 : index
    %29 = vector.load %arg3[%c0_37, %c0_38, %c0_39, %c0_40] : memref<1x16x16x8xbf16, #tpu.memory_space<vmem>>, vector<1x16x16x8xbf16>
    %30 = vector.shape_cast %29 : vector<1x16x16x8xbf16> to vector<16x16x8xbf16>
    %31 = vector.shape_cast %28 : vector<16x16x8xbf16> to vector<1x16x16x8xbf16>
    tpu.vector_store %arg3[%c0_37, %c0_38, %c0_39, %c0_40], %31 {strides = array<i32>} : memref<1x16x16x8xbf16, #tpu.memory_space<vmem>>, vector<1x16x16x8xbf16>,
    return
  }
  func.func @transform_0(%arg0: i32) -> (i32, i32, i32, i32) {
    %c0_i32 = arith.constant 0 : i32
    %c0_i32_0 = arith.constant 0 : i32
    %c0_i32_1 = arith.constant 0 : i32
    %c0_i32_2 = arith.constant 0 : i32
    return %arg0, %c0_i32, %c0_i32_0, %c0_i32_1 : i32, i32, i32, i32
  }
  func.func @transform_1(%arg0: i32) -> (i32, i32) {
    %c0_i32 = arith.constant 0 : i32
    %c0_i32_0 = arith.constant 0 : i32
    %c0_i32_1 = arith.constant 0 : i32
    return %c0_i32, %c0_i32_0 : i32, i32
  }
  func.func @transform_2(%arg0: i32) -> (i32, i32, i32, i32) {
    %c0_i32 = arith.constant 0 : i32
    %c0_i32_0 = arith.constant 0 : i32
    %c0_i32_1 = arith.constant 0 : i32
    %c0_i32_2 = arith.constant 0 : i32
    return %arg0, %c0_i32, %c0_i32_0, %c0_i32_1 : i32, i32, i32, i32
  }
}

module attributes {stable_mosaic.version = 11 : i64} {
  func.func @_conv3x3_lrelu_kernel(%arg0: i32, %arg1: memref<1x18x18x8xbf16, #tpu.memory_space<vmem>>, %arg2: memref<72x8xbf16, #tpu.memory_space<vmem>>, %arg3: memref<1x16x16x8xbf16, #tpu.memory_space<vmem>>) attributes {dimension_semantics = [#tpu.dimension_semantics<parallel>], iteration_bounds = array<i64: 2>, scalar_prefetch = 0 : i64, scratch_operands = 0 : i64, tpu.core_type = #tpu.core_type<tc>, window_params = [{transform_indices = @transform_0, window_bounds = array<i64: 1, 18, 18, 8>}, {pipeline_mode = #tpu.pipeline_mode<synchronous>, transform_indices = @transform_1, window_bounds = array<i64: 72, 8>}, {transform_indices = @transform_2, window_bounds = array<i64: 1, 16, 16, 8>}]} {
    %c0 = arith.constant 0 : index
    %c0_0 = arith.constant 0 : index
    %c0_1 = arith.constant 0 : index
    %c0_2 = arith.constant 0 : index
    %0 = vector.load %arg1[%c0, %c0_0, %c0_1, %c0_2] : memref<1x18x18x8xbf16, #tpu.memory_space<vmem>>, vector<1x16x16x8xbf16>
    %1 = vector.shape_cast %0 : vector<1x16x16x8xbf16> to vector<16x16x8xbf16>
    %c0_3 = arith.constant 0 : index
    %c0_4 = arith.constant 0 : index
    %c1 = arith.constant 1 : index
    %c0_5 = arith.constant 0 : index
    %2 = vector.load %arg1[%c0_3, %c0_4, %c1, %c0_5] : memref<1x18x18x8xbf16, #tpu.memory_space<vmem>>, vector<1x16x16x8xbf16>
    %3 = vector.shape_cast %2 : vector<1x16x16x8xbf16> to vector<16x16x8xbf16>
    %c0_6 = arith.constant 0 : index
    %c0_7 = arith.constant 0 : index
    %c2 = arith.constant 2 : index
    %c0_8 = arith.constant 0 : index
    %4 = vector.load %arg1[%c0_6, %c0_7, %c2, %c0_8] : memref<1x18x18x8xbf16, #tpu.memory_space<vmem>>, vector<1x16x16x8xbf16>
    %5 = vector.shape_cast %4 : vector<1x16x16x8xbf16> to vector<16x16x8xbf16>
    %c0_9 = arith.constant 0 : index
    %c1_10 = arith.constant 1 : index
    %c0_11 = arith.constant 0 : index
    %c0_12 = arith.constant 0 : index
    %6 = vector.load %arg1[%c0_9, %c1_10, %c0_11, %c0_12] : memref<1x18x18x8xbf16, #tpu.memory_space<vmem>>, vector<1x16x16x8xbf16>
    %7 = vector.shape_cast %6 : vector<1x16x16x8xbf16> to vector<16x16x8xbf16>
    %c0_13 = arith.constant 0 : index
    %c1_14 = arith.constant 1 : index
    %c1_15 = arith.constant 1 : index
    %c0_16 = arith.constant 0 : index
    %8 = vector.load %arg1[%c0_13, %c1_14, %c1_15, %c0_16] : memref<1x18x18x8xbf16, #tpu.memory_space<vmem>>, vector<1x16x16x8xbf16>
    %9 = vector.shape_cast %8 : vector<1x16x16x8xbf16> to vector<16x16x8xbf16>
    %c0_17 = arith.constant 0 : index
    %c1_18 = arith.constant 1 : index
    %c2_19 = arith.constant 2 : index
    %c0_20 = arith.constant 0 : index
    %10 = vector.load %arg1[%c0_17, %c1_18, %c2_19, %c0_20] : memref<1x18x18x8xbf16, #tpu.memory_space<vmem>>, vector<1x16x16x8xbf16>
    %11 = vector.shape_cast %10 : vector<1x16x16x8xbf16> to vector<16x16x8xbf16>
    %c0_21 = arith.constant 0 : index
    %c2_22 = arith.constant 2 : index
    %c0_23 = arith.constant 0 : index
    %c0_24 = arith.constant 0 : index
    %12 = vector.load %arg1[%c0_21, %c2_22, %c0_23, %c0_24] : memref<1x18x18x8xbf16, #tpu.memory_space<vmem>>, vector<1x16x16x8xbf16>
    %13 = vector.shape_cast %12 : vector<1x16x16x8xbf16> to vector<16x16x8xbf16>
    %c0_25 = arith.constant 0 : index
    %c2_26 = arith.constant 2 : index
    %c1_27 = arith.constant 1 : index
    %c0_28 = arith.constant 0 : index
    %14 = vector.load %arg1[%c0_25, %c2_26, %c1_27, %c0_28] : memref<1x18x18x8xbf16, #tpu.memory_space<vmem>>, vector<1x16x16x8xbf16>
    %15 = vector.shape_cast %14 : vector<1x16x16x8xbf16> to vector<16x16x8xbf16>
    %c0_29 = arith.constant 0 : index
    %c2_30 = arith.constant 2 : index
    %c2_31 = arith.constant 2 : index
    %c0_32 = arith.constant 0 : index
    %16 = vector.load %arg1[%c0_29, %c2_30, %c2_31, %c0_32] : memref<1x18x18x8xbf16, #tpu.memory_space<vmem>>, vector<1x16x16x8xbf16>
    %17 = vector.shape_cast %16 : vector<1x16x16x8xbf16> to vector<16x16x8xbf16>
    %18 = tpu.concatenate %1, %3, %5, %7, %9, %11, %13, %15, %17 in 2 : vector<16x16x8xbf16>, vector<16x16x8xbf16>, vector<16x16x8xbf16>, vector<16x16x8xbf16>, vector<16x16x8xbf16>, vector<16x16x8xbf16>, vector<16x16x8xbf16>, vector<16x16x8xbf16>, vector<16x16x8xbf16> -> vector<16x16x72xbf16>
    %19 = vector.shape_cast %18 : vector<16x16x72xbf16> to vector<256x72xbf16>
    %c0_33 = arith.constant 0 : index
    %c0_34 = arith.constant 0 : index
    %20 = vector.load %arg2[%c0_33, %c0_34] : memref<72x8xbf16, #tpu.memory_space<vmem>>, vector<72x8xbf16>
    %cst = arith.constant dense<0.000000e+00> : vector<256x8xf32>
    %21 = tpu.matmul %19, %20, %cst {dimension_numbers = #tpu.dot_dimension_numbers<[1], [0], [0], [1], [0, 0, 1, 1], [], []>} : vector<256x72xbf16>, vector<72x8xbf16>, vector<256x8xf32> -> vector<256x8xf32>
    %cst_35 = arith.constant 0.000000e+00 : f32
    %22 = vector.broadcast %cst_35 : f32 to vector<256x8xf32>
    %23 = arith.cmpf ogt, %21, %22 : vector<256x8xf32>
    %cst_36 = arith.constant 1.000000e-01 : f32
    %24 = vector.broadcast %cst_36 : f32 to vector<256x8xf32>
    %25 = arith.mulf %24, %21 : vector<256x8xf32>
    %26 = arith.select %23, %21, %25 : vector<256x8xi1>, vector<256x8xf32>
    %27 = vector.shape_cast %26 : vector<256x8xf32> to vector<16x16x8xf32>
    %28 = arith.truncf %27 : vector<16x16x8xf32> to vector<16x16x8xbf16>
    %c0_37 = arith.constant 0 : index
    %c0_38 = arith.constant 0 : index
    %c0_39 = arith.constant 0 : index
    %c0_40 = arith.constant 0 : index
    %29 = vector.load %arg3[%c0_37, %c0_38, %c0_39, %c0_40] : memref<1x16x16x8xbf16, #tpu.memory_space<vmem>>, vector<1x16x16x8xbf16>
    %30 = vector.shape_cast %29 : vector<1x16x16x8xbf16> to vector<16x16x8xbf16>
    %31 = vector.shape_cast %28 : vector<16x16x8xbf16> to vector<1x16x16x8xbf16>
    tpu.vector_store %arg3[%c0_37, %c0_38, %c0_39, %c0_40], %31 {strides = array<i32>} : memref<1x16x16x8xbf16, #tpu.memory_space<vmem>>, vector<1x16x16x8xbf16>,
    return
  }
  func.func @transform_0(%arg0: i32) -> (i32, i32, i32, i32) {
    %c0_i32 = arith.constant 0 : i32
    %c0_i32_0 = arith.constant 0 : i32
    %c0_i32_1 = arith.constant 0 : i32
    %c0_i32_2 = arith.constant 0 : i32
    return %arg0, %c0_i32, %c0_i32_0, %c0_i32_1 : i32, i32, i32, i32
  }
  func.func @transform_1(%arg0: i32) -> (i32, i32) {
    %c0_i32 = arith.constant 0 : i32
    %c0_i32_0 = arith.constant 0 : i32
    %c0_i32_1 = arith.constant 0 : i32
    return %c0_i32, %c0_i32_0 : i32, i32
  }
  func.func @transform_2(%arg0: i32) -> (i32, i32, i32, i32) {
    %c0_i32 = arith.constant 0 : i32
    %c0_i32_0 = arith.constant 0 : i32
    %c0_i32_1 = arith.constant 0 : i32
    %c0_i32_2 = arith.constant 0 : i32
    return %arg0, %c0_i32, %c0_i32_0, %c0_i32_1 : i32, i32, i32, i32
  }
}

</mosaic_0001>

<bundles_post_ra>
// kernel: vgg_block_forward.2
= control target key start
LH: loop header
LB: loop body
LE: loop exit
PB: predicated region body
PF: predicated region fallthrough
CT: control target
= control target key end

     0   :  { %s3265_s9 = smov 0   ;;  %s4568_s0 = inlined_call_operand.vmem [shape: bf16[2,18,18,4], index: 0, kind: input, shape index: {}]   ;;  %s4569_s1 = inlined_call_operand.vmem [shape: bf16[36,8], index: 1, kind: input, shape index: {}]   ;;  %s4570_s2 = inlined_call_operand.vmem [shape: bf16[2,16,16,8], index: 2, kind: output, shape index: {}]  }
   0x1 LB: > { %s2639_s10 = sadd.s32 4294967295, %s3240_s9   ;;  %p2643_p0 = scmp.ge.s32.totalorder %s3240_s9, 1  ;;  %s3240_s9 = sphi %s3265_s9, %s12_s9  }
   0x2   : > { %p112_p1 = scmp.lt.s32.totalorder %s3240_s9, 3 }
   0x4   : > { %p113_p2 = pnand %p2643_p0, %p112_p1 }
   0x6   : > { %116 = sbr.rel (%p113_p2) target bundleno = 596 (0x254), region = 28 }
   0xb   : > { %p134_p3 = scmp.lt.s32.totalorder %s2639_s10, 1  ;;  %s3242_s15 = smov 12   ;;  %vm740_vm0 = vcmask 1046528   ;;  %vm467_vm1 = vsmask.f32 7424  ;;  %vm2162_vm2 = vcmask 1041408  }
   0xc   : > { %s3243_s16 = smov 8   ;;  %s3244_s17 = smov 4   ;;  %vm1845_vm3 = vcmask 31744   ;;  %vm1878_vm4 = vcmask 64512   ;;  %vm1911_vm5 = vcmask 97280   ;;  %vm1944_vm6 = vcmask 130048  }
   0xd   : > { %s4587_s10 = smov (!%p134_p3, %s2639_s10), 1  ;;  %s3245_s18 = smov 16   ;;  %vm1977_vm7 = vcmask 162816   ;;  %vm2010_vm8 = vcmask 195584   ;;  %vm2043_vm9 = vcmask 228352   ;;  %vm2076_vm10 = vcmask 261120  }
   0xe   : > { %s3070_s11 = smul.u32 216, %s4587_s10  ;;  %s3246_s19 = smov 20   ;;  %vm2129_vm11 = vcmask 293888   ;;  %vm2551_vm14 = vcmask 60416  }
   0xf   : > { %s3247_s20 = smov 24   ;;  %s3248_s21 = smov 28  }
  0x10   : > { %s3279_s14 = scalar_lea.vmem %s4568_s0, %s3070_s11  ;;  %s3249_s22 = smov 32  }
  0x11   : > { %v2663_v0 = vld [vmem:[%s3279_s14 + $0x6c] sm:$0xf]  ;;  %v3283_v1 = vld [vmem:[%s3279_s14 + $0x70] sm:$0xf]  ;;  %v162_v6 = vld [vmem:[%s3279_s14 + $0x64] sm:$0xf] }
  0x12   : > { %v3286_v2 = vcombine.low %v2663_v0, %v3283_v1  ;;  %v2647_v3 = vld [vmem:[%s3279_s14 + $0xc] sm:$0xf]  ;;  %v3290_v4 = vld [vmem:[%s3279_s14 + $0x10] sm:$0xf]  ;;  %v201_v7 = vld [vmem:[%s3279_s14 + $0x60] sm:$0xe] }
  0x13   : > { %v3293_v5 = vcombine.low %v2647_v3, %v3290_v4  ;;  %v3300_v8 = vld [vmem:[%s3279_s14 + $0x68] ss:$0 sps:$4 sm:$0x11]   ;;  %v2815_v9 = vcombine.low %v201_v7, %v162_v6  ;;  %v161_v10 = vld [vmem:[%s3279_s14 + $0x60] sm:$0xf]  ;;  %s2972_s29 = sshll.u32 %s4587_s10, 7 }
  0x14   : > { %917 = vrot.lane.b32.xlu1 %v3286_v2, %s3242_s15  ;;  %v1080_v11 = vshll.u32 %v3286_v2, 16  ;;  %v146_v12 = vld [vmem:[%s3279_s14 + $0x4] sm:$0xf]  ;;  %v766_v14 = vrot.slane %v3300_v8, 1  ;;  %v193_v15 = vld [vmem:[%s3279_s14] sm:$0xe]  ;;  %v3311_v18 = vcombine.low %v161_v10, %v162_v6  ;;  %s4499_s4 = scalar_lea.vmem %s4570_s2, %s2972_s29 }
  0x15   : > { %901 = vrot.lane.b32.xlu0 %v3293_v5, %s3242_s15  ;;  %v765_v13 = vrot.slane %v2815_v9, 1  ;;  %v145_v16 = vld [vmem:[%s3279_s14] sm:$0xf]  ;;  %v984_v17 = vshll.u32 %v3293_v5, 16  ;;  %v2807_v20 = vcombine.low %v193_v15, %v146_v12  ;;  %v163_v21 = vld [vmem:[%s3279_s14 + $0x6c] sm:$0xf] }
  0x16   : > { %v3094_v19 = vld [vmem:[%s3279_s14 + $0x8] ss:$0 sps:$4 sm:$0x11]   ;;  %v3316_v23 = vcombine.low %v145_v16, %v146_v12  ;;  %v164_v24 = vld [vmem:[%s3279_s14 + $0x70] sm:$0xf]  ;;  %v565_v30 = vshrl.u32 %v3311_v18, 16 }
  0x17   : > { %v767_v22 = vsel %vm740_vm0, %v765_v13, %v766_v14  ;;  %v202_v25 = vld [vmem:[%s3279_s14 + $0x6c] sm:$0xe]  ;;  %v741_v26 = vrot.slane %v2807_v20, 1  ;;  %v742_v27 = vrot.slane %v3094_v19, 1  ;;  %v3323_v31 = vcombine.low %v163_v21, %v164_v24  ;;  %v148_v33 = vld [vmem:[%s3279_s14 + $0x10] sm:$0xf] }
  0x18   : > { %805 = vrot.lane.b32.xlu1 %v767_v22, %s3243_s16  ;;  %v3098_v28 = vld [vmem:[%s3279_s14 + $0x74] ss:$0 sps:$4 sm:$0x11]   ;;  %v2816_v29 = vcombine.low %v202_v25, %v164_v24  ;;  %v147_v32 = vld [vmem:[%s3279_s14 + $0xc] sm:$0xf]  ;;  %v469_v41 = vshrl.u32 %v3316_v23, 16 }
  0x19   : > { %v743_v34 = vsel %vm740_vm0, %v741_v26, %v742_v27  ;;  %v769_v36 = vrot.slane %v3098_v28, 1  ;;  %v194_v37 = vld [vmem:[%s3279_s14 + $0xc] sm:$0xe]  ;;  %v3329_v38 = vcombine.low %v147_v32, %v148_v33  ;;  %v3101_v39 = vld [vmem:[%s3279_s14 + $0x14] ss:$0 sps:$4 sm:$0x11]  }
  0x1a   : > { %v768_v35 = vrot.slane %v2816_v29, 1  ;;  %789 = vrot.lane.b32.xlu0 %v743_v34, %s3243_s16  ;;  %v2808_v40 = vcombine.low %v194_v37, %v148_v33  ;;  %v471_v42 = vshll.u32 %v3316_v23, 16  ;;  %v476_v43 = vshll.u32 %v3094_v19, 16  ;;  %v2665_v52 = vld [vmem:[%s3279_s14 + $0x78] sm:$0xf] }
  0x1b   : > { %v481_v45 = vshrl.u32 %v3329_v38, 16  ;;  %v483_v46 = vshll.u32 %v3329_v38, 16  ;;  %v577_v47 = vshrl.u32 %v3323_v31, 16  ;;  %v745_v49 = vrot.slane %v3101_v39, 1  ;;  %v3343_v57 = vld [vmem:[%s3279_s14 + $0x7c] sm:$0xf] }
  0x1c   : > { %v770_v44 = vsel %vm740_vm0, %v768_v35, %v769_v36  ;;  %v744_v48 = vrot.slane %v2808_v40, 1  ;;  %v488_v50 = vshll.u32 %v3101_v39, 16  ;;  %v473_v51 = vrot.slane %v471_v42, 1  ;;  %v2649_v62 = vld [vmem:[%s3279_s14 + $0x18] sm:$0xf] }
  0x1d   : > { %807 = vrot.lane.b32.xlu1 %v770_v44, %s3243_s16  ;;  %v485_v53 = vrot.slane %v483_v46, 1  ;;  %v478_v54 = vrot.slane %v476_v43, 1  ;;  %v579_v55 = vshll.u32 %v3323_v31, 16  ;;  %v584_v56 = vshll.u32 %v3098_v28, 16  ;;  %v3349_v63 = vld [vmem:[%s3279_s14 + $0x1c] sm:$0xf] }
  0x1e   : > { %v746_v58 = vsel %vm740_vm0, %v744_v48, %v745_v49  ;;  %v490_v59 = vrot.slane %v488_v50, 1  ;;  %v474_v60 = vor.u32 %v473_v51, %v469_v41  ;;  %v567_v61 = vshll.u32 %v3311_v18, 16  ;;  %v3356_v13 = vld [vmem:[%s3279_s14 + $0x74] ss:$0 sps:$4 sm:$0x11]  }
  0x1f   : > { %791 = vrot.lane.b32.xlu0 %v746_v58, %s3243_s16  ;;  %v486_v0 = vor.u32 %v485_v53, %v481_v45  ;;  %v581_v3 = vrot.slane %v579_v55, 1  ;;  %v586_v6 = vrot.slane %v584_v56, 1  ;;  %v572_v7 = vshll.u32 %v3300_v8, 16  ;;  %v3361_v20 = vld [vmem:[%s3279_s14 + $0x14] ss:$0 sps:$4 sm:$0x11]  }
  0x20   : > { %v479_v9 = vsel %vm467_vm1, %v474_v60, %v478_v54  ;;  %v569_v10 = vrot.slane %v567_v61, 1  ;;  %v2832_v12 = vcombine.low %v2665_v52, %v3343_v57  ;;  %v2824_v19 = vcombine.low %v2649_v62, %v3349_v63  ;;  %v3368_v24 = vld [vmem:[%s3279_s14 + $0x80] ss:$0 sps:$4 sm:$0x11]   ;;  %v2703_v35 = vld [vmem:[%s3279_s14 + $0x6c] sm:$0xe] }
  0x21   : > { %v491_v14 = vsel %vm467_vm1, %v486_v0, %v490_v59  ;;  %v582_v15 = vor.u32 %v581_v3, %v577_v47  ;;  %v574_v16 = vrot.slane %v572_v7, 1  ;;  %v1078_v21 = vshrl.u32 %v3286_v2, 16  ;;  %v2695_v43 = vld [vmem:[%s3279_s14 + $0xc] sm:$0xe]  ;;  %v2704_v45 = vld [vmem:[%s3279_s14 + $0x78] sm:$0xe] }
  0x22   : > { %662 = vrot.lane.b32.xlu1 %v491_v14, %s3244_s17  ;;  %v570_v8 = vor.u32 %v569_v10, %v565_v30  ;;  %v1082_v22 = vrot.slane %v1080_v11, 1  ;;  %v1092_v26 = vshll.u32 %v2832_v12, 16  ;;  %v1085_v27 = vshll.u32 %v3356_v13, 16  ;;  %v3379_v11 = vld [vmem:[%s3279_s14 + $0x20] ss:$0 sps:$4 sm:$0x11]  }
  0x23   : > { %660 = vrot.lane.b32.xlu0 %v479_v9, %s3244_s17  ;;  %v587_v25 = vsel %vm467_vm1, %v582_v15, %v586_v6  ;;  %v982_v28 = vshrl.u32 %v3293_v5, 16  ;;  %v996_v30 = vshll.u32 %v2824_v19, 16  ;;  %v986_v32 = vrot.slane %v984_v17, 1  ;;  %v2696_v50 = vld [vmem:[%s3279_s14 + $0x18] sm:$0xe] }
  0x24   : > { %v575_v29 = vsel %vm467_vm1, %v570_v8, %v574_v16  ;;  %v989_v2 = vshll.u32 %v3361_v20, 16  ;;  %v1083_v33 = vor.u32 %v1082_v22, %v1078_v21  ;;  %v1087_v34 = vrot.slane %v1085_v27, 1  ;;  %v2727_v55 = vld [vmem:[%s3279_s14 + $0x78] sm:$0xf]  ;;  %v3399_v56 = vld [vmem:[%s3279_s14 + $0x7c] sm:$0xf] }
  0x25   : > { %v987_v36 = vor.u32 %v986_v32, %v982_v28  ;;  %v1090_v37 = vshrl.u32 %v2832_v12, 16  ;;  %v1094_v39 = vrot.slane %v1092_v26, 1  ;;  %v1097_v5 = vshll.u32 %v3368_v24, 16  ;;  %v2711_v3 = vld [vmem:[%s3279_s14 + $0x18] sm:$0xf] }
  0x26   : > { %678 = vrot.lane.b32.xlu1 %v587_v25, %s3244_s17  ;;  %v991_v17 = vrot.slane %v989_v2, 1  ;;  %v994_v40 = vshrl.u32 %v2824_v19, 16  ;;  %v998_v41 = vrot.slane %v996_v30, 1  ;;  %v1001_v42 = vshll.u32 %v3379_v11, 16  ;;  %v3410_v6 = vld [vmem:[%s3279_s14 + $0x1c] sm:$0xf] }
  0x27   : > { %676 = vrot.lane.b32.xlu0 %v575_v29, %s3244_s17  ;;  %v2863_v44 = vcombine.low %v2703_v35, %v3283_v1  ;;  %v1088_v46 = vsel %vm467_vm1, %v1083_v33, %v1087_v34  ;;  %v1095_v47 = vor.u32 %v1094_v39, %v1090_v37  ;;  %v1099_v48 = vrot.slane %v1097_v5, 1  ;;  %v2713_v16 = vld [vmem:[%s3279_s14 + $0x24] sm:$0xf]  ;;  %v3430_v21 = vld [vmem:[%s3279_s14 + $0x80] ss:$0 sps:$4 sm:$0x11]  }
  0x28   : > { %v2855_v49 = vcombine.low %v2695_v43, %v3290_v4  ;;  %v992_v51 = vsel %vm467_vm1, %v987_v36, %v991_v17  ;;  %v999_v52 = vor.u32 %v998_v41, %v994_v40  ;;  %v1003_v53 = vrot.slane %v1001_v42, 1  ;;  %v3437_v27 = vld [vmem:[%s3279_s14 + $0x20] ss:$0 sps:$4 sm:$0x11]   ;;  %v165_v37 = vld [vmem:[%s3279_s14 + $0x78] sm:$0xf] }
  0x29   : > { %v1277_v1 = vrot.slane %v2863_v44, 1  ;;  %v1278_v54 = vrot.slane %v3356_v13, 1  ;;  %v2864_v58 = vcombine.low %v2704_v45, %v3343_v57  ;;  %v2856_v4 = vcombine.low %v2696_v50, %v3349_v63  ;;  %v2729_v63 = vld [vmem:[%s3279_s14 + $0x84] sm:$0xf]  ;;  %v3419_v13 = vld [vmem:[%s3279_s14 + $0x88] sm:$0xf] }
  0x2a   : > { %919 = vrot.lane.b32.xlu1 %v2832_v12, %s3242_s15  ;;  %v1100_v59 = vsel %vm467_vm1, %v1095_v47, %v1099_v48  ;;  %v1004_v60 = vsel %vm467_vm1, %v999_v52, %v1003_v53  ;;  %v1253_v61 = vrot.slane %v2855_v49, 1  ;;  %v1254_v62 = vrot.slane %v3361_v20, 1  ;;  %v3446_v34 = vld [vmem:[%s3279_s14 + $0x2c] ss:$0 sps:$4 sm:$0x11]  }
  0x2b   : > { %903 = vrot.lane.b32.xlu0 %v2824_v19, %s3242_s15  ;;  %v2879_v0 = vcombine.low %v2727_v55, %v3399_v56  ;;  %v1279_v57 = vsel %vm740_vm0, %v1277_v1, %v1278_v54  ;;  %v1280_v7 = vrot.slane %v2864_v58, 1  ;;  %v1281_v9 = vrot.slane %v3368_v24, 1  ;;  %v3425_v19 = vld [vmem:[%s3279_s14 + $0x28] sm:$0xf]  ;;  %v3451_v39 = vld [vmem:[%s3279_s14 + $0x7c] sm:$0xf] }
  0x2c   : > { %v1256_v10 = vrot.slane %v2856_v4, 1  ;;  %v1257_v12 = vrot.slane %v3379_v11, 1  ;;  %v1255_v14 = vsel %vm740_vm0, %v1253_v61, %v1254_v62  ;;  %v2871_v15 = vcombine.low %v2711_v3, %v3410_v6  ;;  %v3442_v11 = vld [vmem:[%s3279_s14 + $0x8c] ss:$0 sps:$4 sm:$0x11]  }
  0x2d   : > { %v1592_v20 = vshll.u32 %v2879_v0, 16  ;;  %v2880_v8 = vcombine.low %v2729_v63, %v3419_v13  ;;  %v1282_v22 = vsel %vm740_vm0, %v1280_v7, %v1281_v9  ;;  %v2872_v24 = vcombine.low %v2713_v16, %v3425_v19  ;;  %v149_v17 = vld [vmem:[%s3279_s14 + $0x18] sm:$0xf]  ;;  %v3455_v40 = vld [vmem:[%s3279_s14 + $0x1c] sm:$0xf] }
  0x2e   : > { %1189 = vrot.lane.b32.xlu1 %v1088_v46, %s3245_s18  ;;  %v1258_v25 = vsel %vm740_vm0, %v1256_v10, %v1257_v12  ;;  %v1496_v26 = vshll.u32 %v2871_v15, 16  ;;  %v1590_v28 = vshrl.u32 %v2879_v0, 16  ;;  %v1597_v32 = vshll.u32 %v3430_v21, 16  ;;  %v2767_v41 = vld [vmem:[%s3279_s14 + $0x78] sm:$0xe] }
  0x2f   : > { %1173 = vrot.lane.b32.xlu0 %v992_v51, %s3245_s18  ;;  %v1594_v29 = vrot.slane %v1592_v20, 1  ;;  %v1604_v30 = vshll.u32 %v2880_v8, 16  ;;  %v1494_v2 = vshrl.u32 %v2871_v15, 16  ;;  %v1508_v33 = vshll.u32 %v2872_v24, 16  ;;  %v2759_v46 = vld [vmem:[%s3279_s14 + $0x18] sm:$0xe] }
  0x30   : > { %v1498_v35 = vrot.slane %v1496_v26, 1  ;;  %v1501_v36 = vshll.u32 %v3437_v27, 16  ;;  %v1599_v42 = vrot.slane %v1597_v32, 1  ;;  %v1602_v43 = vshrl.u32 %v2880_v8, 16  ;;  %v151_v9 = vld [vmem:[%s3279_s14 + $0x24] sm:$0xf] }
  0x31   : > { %v1595_v5 = vor.u32 %v1594_v29, %v1590_v28  ;;  %v1606_v44 = vrot.slane %v1604_v30, 1  ;;  %v1609_v45 = vshll.u32 %v3442_v11, 16  ;;  %v1506_v47 = vshrl.u32 %v2872_v24, 16  ;;  %v3473_v4 = vld [vmem:[%s3279_s14 + $0x80] ss:$0 sps:$4 sm:$0x11]  }
  0x32   : > { %1191 = vrot.lane.b32.xlu1 %v1100_v59, %s3245_s18  ;;  %v1510_v48 = vrot.slane %v1508_v33, 1  ;;  %v1513_v49 = vshll.u32 %v3446_v34, 16  ;;  %v3464_v50 = vcombine.low %v165_v37, %v3451_v39  ;;  %v1499_v51 = vor.u32 %v1498_v35, %v1494_v2  ;;  %v3490_v10 = vld [vmem:[%s3279_s14 + $0x28] sm:$0xf]  ;;  %v2768_v12 = vld [vmem:[%s3279_s14 + $0x84] sm:$0xe] }
  0x33   : > { %1175 = vrot.lane.b32.xlu0 %v1004_v60, %s3245_s18  ;;  %v1503_v52 = vrot.slane %v1501_v36, 1  ;;  %v3467_v53 = vcombine.low %v149_v17, %v3455_v40  ;;  %v2911_v1 = vcombine.low %v2767_v41, %v3399_v56  ;;  %v2903_v54 = vcombine.low %v2759_v46, %v3410_v6  ;;  %v3479_v56 = vld [vmem:[%s3279_s14 + $0x20] ss:$0 sps:$4 sm:$0x11]   ;;  %v167_v6 = vld [vmem:[%s3279_s14 + $0x84] sm:$0xf] }
  0x34   : > { %v1607_v55 = vor.u32 %v1606_v44, %v1602_v43  ;;  %v1611_v58 = vrot.slane %v1609_v45, 1  ;;  %v1600_v59 = vsel %vm467_vm1, %v1595_v5, %v1599_v42  ;;  %v1511_v60 = vor.u32 %v1510_v48, %v1506_v47  ;;  %v3515_v36 = vld [vmem:[%s3279_s14 + $0x8c] ss:$0 sps:$4 sm:$0x11]  }
  0x35   : > { %v1515_v61 = vrot.slane %v1513_v49, 1  ;;  %v591_v62 = vshll.u32 %v3464_v50, 16  ;;  %v495_v3 = vshll.u32 %v3467_v53, 16  ;;  %v1789_v63 = vrot.slane %v2911_v1, 1 }
  0x36   : > { %1317 = vrot.lane.b32.xlu1 %v1279_v57, %s3246_s19  ;;  %v3485_v57 = vld [vmem:[%s3279_s14 + $0x88] sm:$0xf]  ;;  %v1790_v7 = vrot.slane %v3430_v21, 1  ;;  %v1766_v16 = vrot.slane %v3437_v27, 1  ;;  %v596_v20 = vshll.u32 %v3473_v4, 16  ;;  %v493_v26 = vshrl.u32 %v3467_v53, 16 }
  0x37   : > { %1301 = vrot.lane.b32.xlu0 %v1255_v14, %s3246_s19  ;;  %v1612_v14 = vsel %vm467_vm1, %v1607_v55, %v1611_v58  ;;  %v1516_v21 = vsel %vm467_vm1, %v1511_v60, %v1515_v61  ;;  %v497_v28 = vrot.slane %v495_v3, 1  ;;  %v500_v27 = vshll.u32 %v3479_v56, 16 }
  0x38   : > { %v3507_v29 = vcombine.low %v151_v9, %v3490_v10  ;;  %v2912_v30 = vcombine.low %v2768_v12, %v3419_v13  ;;  %v598_v2 = vrot.slane %v596_v20, 1  ;;  %v1791_v33 = vsel %vm740_vm0, %v1789_v63, %v1790_v7  ;;  %v3520_v13 = vld [vmem:[%s3279_s14 + $0x2c] ss:$0 sps:$4 sm:$0x11]   ;;  %v196_v63 = vld [vmem:[%s3279_s14 + $0x24] sm:$0xe] }
  0x39   : > { %v498_v17 = vor.u32 %v497_v28, %v493_v26  ;;  %v502_v41 = vrot.slane %v500_v27, 1  ;;  %v1793_v43 = vrot.slane %v3442_v11, 1  ;;  %v1769_v45 = vrot.slane %v3446_v34, 1  ;;  %v195_v34 = vld [vmem:[%s3279_s14 + $0x18] sm:$0xe] }
  0x3a   : > { %1319 = vrot.lane.b32.xlu1 %v1282_v22, %s3246_s19  ;;  %v589_v22 = vshrl.u32 %v3464_v50, 16  ;;  %4576 = vst [vmem:[#allocation2_spill] sm:$0xff] %v3507_v29  ;;  %v1792_v42 = vrot.slane %v2912_v30, 1  ;;  %v608_v49 = vshll.u32 %v3515_v36, 16  ;;  %v505_v1 = vshrl.u32 %v3507_v29, 16 }
  0x3b   : > { %1303 = vrot.lane.b32.xlu0 %v1258_v25, %s3246_s19  ;;  %v3502_v25 = vcombine.low %v167_v6, %v3485_v57  ;;  %v2809_v61 = vcombine.low %v195_v34, %v3455_v40  ;;  %v772_v7 = vrot.slane %v3473_v4, 1  ;;  %v748_v9 = vrot.slane %v3479_v56, 1  ;;  %v2651_v56 = vld [vmem:[%s3279_s14 + $0x24] sm:$0xf]  ;;  %v2669_v28 = vld [vmem:[%s3279_s14 + $0x90] sm:$0xf] }
  0x3c   : > { %v1794_v55 = vsel %vm740_vm0, %v1792_v42, %v1793_v43  ;;  %v2810_v4 = vcombine.low %v196_v63, %v3490_v10  ;;  %v3567_v10 = vld [vmem:[%s3279_s14 + $0x94] sm:$0xf] }
  0x3d   : > { %v603_v37 = vshll.u32 %v3502_v25, 16  ;;  %v601_v47 = vshrl.u32 %v3502_v25, 16 }
  0x3e   : > { %1429 = vrot.lane.b32.xlu1 %v2879_v0, %s3247_s20  ;;  %v1504_v0 = vsel %vm467_vm1, %v1499_v51, %v1503_v52  ;;  %v203_v51 = vld [vmem:[%s3279_s14 + $0x78] sm:$0xe]  ;;  %v503_v52 = vsel %vm467_vm1, %v498_v17, %v502_v41  ;;  %v750_v30 = vrot.slane %v2810_v4, 1  ;;  %v3581_v41 = vld [vmem:[%s3279_s14 + $0x8c] ss:$0 sps:$4 sm:$0x11]  }
  0x3f   : > { %1413 = vrot.lane.b32.xlu0 %v2871_v15, %s3247_s20  ;;  %v1765_v15 = vrot.slane %v2903_v54, 1  ;;  %v605_v48 = vrot.slane %v603_v37, 1  ;;  %v512_v54 = vshll.u32 %v3520_v13, 16  ;;  %v2817_v60 = vcombine.low %v203_v51, %v3451_v39  ;;  %v2698_v4 = vld [vmem:[%s3279_s14 + $0x30] sm:$0xe] }
  0x41   : > { %v1767_v5 = vsel %vm740_vm0, %v1765_v15, %v1766_v16  ;;  %v606_v58 = vor.u32 %v605_v48, %v601_v47  ;;  %v514_v6 = vrot.slane %v512_v54, 1  ;;  %v771_v40 = vrot.slane %v2817_v60, 1  ;;  %v2667_v15 = vld [vmem:[%s3279_s14 + $0x84] sm:$0xf]  ;;  %v3551_v16 = vld [vmem:[%s3279_s14 + $0x88] sm:$0xf] }
  0x42   : > { %1431 = vrot.lane.b32.xlu1 %v2880_v8, %s3247_s20  ;;  %v2760_v8 = vld [vmem:[%s3279_s14 + $0x24] sm:$0xe]  ;;  %v1109_v47 = vshll.u32 %v3581_v41, 16 }
  0x43   : > { %1415 = vrot.lane.b32.xlu0 %v2872_v24, %s3247_s20  ;;  %v593_v24 = vrot.slane %v591_v62, 1  ;;  %v2904_v32 = vcombine.low %v2760_v8, %v3425_v19  ;;  %v507_v19 = vshll.u32 %v3507_v29, 16  ;;  %v204_v62 = vld [vmem:[%s3279_s14 + $0x84] sm:$0xe]  ;;  %v3557_v8 = vld [vmem:[%s3279_s14 + $0x28] sm:$0xf] }
  0x44   : > { %v2818_v12 = vcombine.low %v204_v62, %v3485_v57  ;;  %v2825_v26 = vcombine.low %v2651_v56, %v3557_v8  ;;  %v1111_v54 = vrot.slane %v1109_v47, 1  ;;  %v3183_v47 = vld [vmem:[%s4569_s1 + $0x10] ss:$0 sps:$4 sm:$0x33]   ;;  %v157_v29 = vld [vmem:[%s3279_s14 + $0x48] sm:$0xf] }
  0x45   : > { %v594_v35 = vor.u32 %v593_v24, %v589_v22  ;;  %v1768_v44 = vrot.slane %v2904_v32, 1  ;;  %v509_v11 = vrot.slane %v507_v19, 1  ;;  %v2833_v22 = vcombine.low %v2667_v15, %v3551_v16  ;;  %v3585_v19 = vld [vmem:[%s3279_s14 + $0x2c] ss:$0 sps:$4 sm:$0x11]   ;;  %3068 = vmatprep.subr.msk.bf16.mxu0 %vm2162_vm2, %v3183_v47  ;;  %3069 = vmatprep.subr.msk.bf16.mxu1 %vm2162_vm2, %v3183_v47 }
  0x46   : > { %1701 = vrot.lane.b32.xlu1 %v1600_v59, %s3248_s21  ;;  %v610_v59 = vrot.slane %v608_v49, 1  ;;  %v774_v57 = vrot.slane %v2818_v12, 1  ;;  %v773_v24 = vsel %vm740_vm0, %v771_v40, %v772_v7  ;;  %v751_v32 = vrot.slane %v3520_v13, 1  ;;  %v3591_v49 = vld [vmem:[%s3279_s14 + $0x98] ss:$0 sps:$4 sm:$0x11]  }
  0x47   : > { %1685 = vrot.lane.b32.xlu0 %v1504_v0, %s3248_s21  ;;  %v599_v46 = vsel %vm467_vm1, %v594_v35, %v598_v2  ;;  %v1770_v0 = vsel %vm740_vm0, %v1768_v44, %v1769_v45  ;;  %v510_v3 = vor.u32 %v509_v11, %v505_v1  ;;  %v2653_v2 = vld [vmem:[%s3279_s14 + $0x30] sm:$0xf]  ;;  %v1104_v35 = vshll.u32 %v2833_v22, 16 }
  0x48   : > { %v611_v39 = vsel %vm467_vm1, %v606_v58, %v610_v59  ;;  %v752_v13 = vsel %vm740_vm0, %v750_v30, %v751_v32  ;;  %v1102_v43 = vshrl.u32 %v2833_v22, 16  ;;  %v1006_v45 = vshrl.u32 %v2825_v26, 16  ;;  %v2705_v59 = vld [vmem:[%s3279_s14 + $0x84] sm:$0xe]  ;;  %v2715_v30 = vld [vmem:[%s3279_s14 + $0x30] sm:$0xf] }
  0x49   : > { %v515_v20 = vsel %vm467_vm1, %v510_v3, %v514_v6  ;;  %v1106_v44 = vrot.slane %v1104_v35, 1  ;;  %v1013_v51 = vshll.u32 %v3585_v19, 16  ;;  %v1121_v58 = vshll.u32 %v3591_v49, 16  ;;  %v2697_v3 = vld [vmem:[%s3279_s14 + $0x24] sm:$0xe] }
  0x4a   : > { %1703 = vrot.lane.b32.xlu1 %v1612_v14, %s3248_s21  ;;  %v747_v14 = vrot.slane %v2809_v61, 1  ;;  %v2706_v6 = vld [vmem:[%s3279_s14 + $0x90] sm:$0xe]  ;;  %v2865_v63 = vcombine.low %v2705_v59, %v3551_v16  ;;  %v3626_v32 = vld [vmem:[%s3279_s14 + $0x34] sm:$0xf] }
  0x4b   : > { %1687 = vrot.lane.b32.xlu0 %v1516_v21, %s3248_s21  ;;  %v775_v21 = vrot.slane %v3515_v36, 1  ;;  %v2834_v36 = vcombine.low %v2669_v28, %v3567_v10  ;;  %v1107_v1 = vor.u32 %v1106_v44, %v1102_v43  ;;  %v1015_v60 = vrot.slane %v1013_v51, 1  ;;  %v2733_v35 = vld [vmem:[%s3279_s14 + $0x9c] sm:$0xf] }
  0x4c   : > { %v749_v27 = vsel %vm740_vm0, %v747_v14, %v748_v9  ;;  %v1123_v12 = vrot.slane %v1121_v58, 1  ;;  %v1283_v56 = vrot.slane %v2865_v63, 1  ;;  %v1260_v28 = vrot.slane %v3585_v19, 1  ;;  %v3656_v51 = vld [vmem:[%s3279_s14 + $0x38] ss:$0 sps:$4 sm:$0x11]  }
  0x4d   : > { %v776_v37 = vsel %vm740_vm0, %v774_v57, %v775_v21  ;;  %v1116_v42 = vshll.u32 %v2834_v36, 16  ;;  %v1114_v11 = vshrl.u32 %v2834_v36, 16  ;;  %v1112_v7 = vsel %vm467_vm1, %v1107_v1, %v1111_v54  ;;  %v2731_v57 = vld [vmem:[%s3279_s14 + $0x90] sm:$0xf]  ;;  %v3618_v21 = vld [vmem:[%s3279_s14 + $0x94] sm:$0xf] }
  0x4e   : > { %1829 = vrot.lane.b32.xlu1 %v1791_v33, %s3249_s22  ;;  %v3573_v33 = vld [vmem:[%s3279_s14 + $0x34] sm:$0xf]  ;;  %v2873_v19 = vcombine.low %v2715_v30, %v3626_v32  ;;  %v3659_v1 = vld [vmem:[%s3279_s14 + $0xa4] ss:$0 sps:$4 sm:$0x11]  }
  0x4f   : > { %1813 = vrot.lane.b32.xlu0 %v1767_v5, %s3249_s22  ;;  %v1008_v5 = vshll.u32 %v2825_v26, 16  ;;  %v2826_v17 = vcombine.low %v2653_v2, %v3573_v33  ;;  %v2881_v2 = vcombine.low %v2731_v57, %v3618_v21  ;;  %v169_v63 = vld [vmem:[%s3279_s14 + $0x90] sm:$0xf] }
  0x51   : > { %v1010_v48 = vrot.slane %v1008_v5, 1  ;;  %v1018_v61 = vshrl.u32 %v2826_v17, 16  ;;  %v3638_v5 = vld [vmem:[%s3279_s14 + $0x40] sm:$0xf]  ;;  %v1616_v43 = vshll.u32 %v2881_v2, 16 }
  0x52   : > { %680 = vrot.lane.b32.xlu1 %v599_v46, %s3244_s17  ;;  %v1020_v46 = vshll.u32 %v2826_v17, 16 }
  0x53   : > { %664 = vrot.lane.b32.xlu0 %v503_v52, %s3244_s17  ;;  %v3595_v52 = vld [vmem:[%s3279_s14 + $0x38] ss:$0 sps:$4 sm:$0x11]   ;;  %v1011_v34 = vor.u32 %v1010_v48, %v1006_v45  ;;  %v1618_v58 = vrot.slane %v1616_v43, 1 }
  0x54   : > { %v1022_v62 = vrot.slane %v1020_v46, 1  ;;  %v3649_v46 = vld [vmem:[%s3279_s14 + $0x98] ss:$0 sps:$4 sm:$0x11]  }
  0x55   : > { %v1016_v40 = vsel %vm467_vm1, %v1011_v34, %v1015_v60  ;;  %v1614_v34 = vshrl.u32 %v2881_v2, 16  ;;  %v1621_v59 = vshll.u32 %v3649_v46, 16  ;;  %v1518_v60 = vshrl.u32 %v2873_v19, 16 }
  0x56   : > { %1831 = vrot.lane.b32.xlu1 %v1794_v55, %s3249_s22  ;;  %v1118_v55 = vrot.slane %v1116_v42, 1  ;;  %v1023_v14 = vor.u32 %v1022_v62, %v1018_v61  ;;  %v2164_v61 = vsel %vm2162_vm2, %v3183_v47, 0  ;;  %v3193_v62 = vld [vmem:[%s4569_s1] sm:$0xff]  }
  0x57   : > { %1815 = vrot.lane.b32.xlu0 %v1770_v0, %s3249_s22  ;;  %v1025_v0 = vshll.u32 %v3595_v52, 16  ;;  %3025 = vmatpush3.bf16.msra.mxu0 %v2164_v61  ;;  %v3717_v47 = vld [vmem:[%s3279_s14 + $0x40] sm:$0xf] }
  0x58   : > { %v1119_v9 = vor.u32 %v1118_v55, %v1114_v11  ;;  %v3188_v11 = vld [vmem:[%s4569_s1 + $0x8] sm:$0xff]   ;;  %v3666_v55 = vld [vmem:[%s3279_s14 + $0x44] ss:$0 sps:$4 sm:$0x11]   ;;  %3065 = vmatpush3.bf16.msra.mxu1 %v2164_v61 }
  0x59   : > { %v1027_v15 = vrot.slane %v1025_v0, 1  ;;  %v2769_v0 = vld [vmem:[%s3279_s14 + $0x90] sm:$0xe]  ;;  %3026 = vmatprep.subr.bf16.mxu0 %v3188_v11  ;;  %3063 = vmatprep.subr.bf16.mxu1 %v3188_v11 }
  0x5a   : > { %682 = vrot.lane.b32.xlu1 %v611_v39, %s3244_s17  ;;  %v2857_v39 = vcombine.low %v2697_v3, %v3557_v8  ;;  %v1124_v16 = vsel %vm467_vm1, %v1119_v9, %v1123_v12  ;;  %v1284_v8 = vrot.slane %v3581_v41, 1  ;;  %v1633_v12 = vshll.u32 %v3659_v1, 16 }
  0x5b   : > { %666 = vrot.lane.b32.xlu0 %v515_v20, %s3244_s17  ;;  %v2866_v20 = vcombine.low %v2706_v6, %v3567_v10  ;;  %v1525_v6 = vshll.u32 %v3656_v51, 16  ;;  %3027 = vmatpush3.bf16.msra.mxu0 %v3188_v11 }
  0x5c   : > { %3066 = vmatpush3.bf16.msra.mxu1 %v3188_v11  ;;  %3028 = vmatprep.subr.bf16.mxu0 %v3193_v62 }
  0x5d   : > { %v1286_v10 = vrot.slane %v2866_v20, 1  ;;  %3064 = vmatprep.subr.bf16.mxu1 %v3193_v62 }
  0x5e   : > { %809 = vrot.lane.b32.xlu1 %v773_v24, %s3243_s16  ;;  %v1028_v24 = vsel %vm467_vm1, %v1023_v14, %v1027_v15 }
  0x5f   : > { %793 = vrot.lane.b32.xlu0 %v749_v27, %s3243_s16  ;;  %v1287_v27 = vrot.slane %v3591_v49, 1  ;;  %v1520_v49 = vshll.u32 %v2873_v19, 16  ;;  %3029 = vmatpush3.bf16.msra.mxu0 %v3193_v62 }
  0x60   : > { %3067 = vmatpush3.bf16.msra.mxu1 %v3193_v62 }
  0x61   : > { %v1288_v45 = vsel %vm740_vm0, %v1286_v10, %v1287_v27  ;;  %v1522_v3 = vrot.slane %v1520_v49, 1  ;;  %v1635_v10 = vrot.slane %v1633_v12, 1  ;;  %v3744_v12 = vld [vmem:[%s3279_s14 + $0xa4] ss:$0 sps:$4 sm:$0x11]  }
  0x62   : > { %811 = vrot.lane.b32.xlu1 %v776_v37, %s3243_s16  ;;  %v2717_v37 = vld [vmem:[%s3279_s14 + $0x3c] sm:$0xf] }
  0x63   : > { %795 = vrot.lane.b32.xlu0 %v752_v13, %s3243_s16  ;;  %v1263_v13 = vrot.slane %v3595_v52, 1  ;;  %v2874_v44 = vcombine.low %v2717_v37, %v3638_v5 }
  0x65   : > { %v1532_v54 = vshll.u32 %v2874_v44, 16  ;;  %v1530_v15 = vshrl.u32 %v2874_v44, 16 }
  0x66   : > { %921 = vrot.lane.b32.xlu1 %v2833_v22, %s3242_s15  ;;  %v2858_v22 = vcombine.low %v2698_v4, %v3573_v33  ;;  %v1285_v33 = vsel %vm740_vm0, %v1283_v56, %v1284_v8  ;;  %v1537_v4 = vshll.u32 %v3666_v55, 16  ;;  %v1619_v56 = vor.u32 %v1618_v58, %v1614_v34  ;;  %v2762_v58 = vld [vmem:[%s3279_s14 + $0x3c] sm:$0xe] }
  0x67   : > { %905 = vrot.lane.b32.xlu0 %v2825_v26, %s3242_s15  ;;  %v1259_v26 = vrot.slane %v2857_v39, 1  ;;  %v153_v39 = vld [vmem:[%s3279_s14 + $0x30] sm:$0xf]  ;;  %v1534_v20 = vrot.slane %v1532_v54, 1  ;;  %v1623_v8 = vrot.slane %v1621_v59, 1  ;;  %v1772_v34 = vrot.slane %v3656_v51, 1 }
  0x68   : > { %v1262_v41 = vrot.slane %v2858_v22, 1  ;;  %v1523_v22 = vor.u32 %v1522_v3, %v1518_v60 }
  0x6a   : > { %923 = vrot.lane.b32.xlu1 %v2834_v36, %s3242_s15  ;;  %v3632_v36 = vld [vmem:[%s3279_s14 + $0xa0] sm:$0xf]  ;;  %v1264_v48 = vsel %vm740_vm0, %v1262_v41, %v1263_v13 }
  0x6b   : > { %907 = vrot.lane.b32.xlu0 %v2826_v17, %s3242_s15  ;;  %v1261_v17 = vsel %vm740_vm0, %v1259_v26, %v1260_v28  ;;  %v2882_v42 = vcombine.low %v2733_v35, %v3632_v36  ;;  %v2913_v28 = vcombine.low %v2769_v0, %v3618_v21  ;;  %v1539_v35 = vrot.slane %v1537_v4, 1 }
  0x6c   : > { %v1624_v21 = vsel %vm467_vm1, %v1619_v56, %v1623_v8  ;;  %v3753_v56 = vld [vmem:[%s3279_s14 + $0x44] ss:$0 sps:$4 sm:$0x11]  }
  0x6d   : > { %v1628_v52 = vshll.u32 %v2882_v42, 16  ;;  %v1626_v9 = vshrl.u32 %v2882_v42, 16  ;;  %v1795_v43 = vrot.slane %v2913_v28, 1  ;;  %v1799_v28 = vrot.slane %v3659_v1, 1 }
  0x6e   : > { %1193 = vrot.lane.b32.xlu1 %v1112_v7, %s3245_s18  ;;  %v3677_v7 = vld [vmem:[%s3279_s14 + $0x94] sm:$0xf] }
  0x6f   : > { %1177 = vrot.lane.b32.xlu0 %v1016_v40, %s3245_s18  ;;  %v3682_v40 = vld [vmem:[%s3279_s14 + $0x34] sm:$0xf]  ;;  %v1630_v14 = vrot.slane %v1628_v52, 1  ;;  %v3689_v57 = vcombine.low %v169_v63, %v3677_v7 }
  0x70   : > { %v3692_v26 = vcombine.low %v153_v39, %v3682_v40 }
  0x71   : > { %4577 = vst [vmem:[#allocation3_spill] sm:$0xff] %v3689_v57  ;;  %v1631_v30 = vor.u32 %v1630_v14, %v1626_v9  ;;  %v615_v37 = vshll.u32 %v3689_v57, 16  ;;  %v2906_v9 = vcombine.low %v2762_v58, %v3638_v5 }
  0x72   : > { %1195 = vrot.lane.b32.xlu1 %v1124_v16, %s3245_s18  ;;  %v2761_v16 = vld [vmem:[%s3279_s14 + $0x30] sm:$0xe]  ;;  %4578 = vst [vmem:[#allocation4_spill] sm:$0xff] %v3692_v26  ;;  %v519_v13 = vshll.u32 %v3692_v26, 16  ;;  %v517_v62 = vshrl.u32 %v3692_v26, 16 }
  0x73   : > { %1179 = vrot.lane.b32.xlu0 %v1028_v24, %s3245_s18  ;;  %v1527_v24 = vrot.slane %v1525_v6, 1  ;;  %v2905_v27 = vcombine.low %v2761_v16, %v3626_v32  ;;  %v1636_v52 = vsel %vm467_vm1, %v1631_v30, %v1635_v10  ;;  %v617_v59 = vrot.slane %v615_v37, 1  ;;  %v205_v37 = vld [vmem:[%s3279_s14 + $0x90] sm:$0xe] }
  0x74   : > { %v521_v0 = vrot.slane %v519_v13, 1  ;;  %v1774_v10 = vrot.slane %v2906_v9, 1  ;;  %v632_v30 = vshll.u32 %v3744_v12, 16 }
  0x75   : > { %v1528_v32 = vsel %vm467_vm1, %v1523_v22, %v1527_v24  ;;  %v1771_v54 = vrot.slane %v2905_v27, 1  ;;  %v1775_v27 = vrot.slane %v3666_v55, 1 }
  0x76   : > { %1321 = vrot.lane.b32.xlu1 %v1285_v33, %s3246_s19  ;;  %v3698_v33 = vld [vmem:[%s3279_s14 + $0x98] ss:$0 sps:$4 sm:$0x11]   ;;  %v522_v16 = vor.u32 %v521_v0, %v517_v62  ;;  %v198_v62 = vld [vmem:[%s3279_s14 + $0x3c] sm:$0xe] }
  0x77   : > { %1305 = vrot.lane.b32.xlu0 %v1261_v17, %s3246_s19  ;;  %v3704_v17 = vld [vmem:[%s3279_s14 + $0x38] ss:$0 sps:$4 sm:$0x11]   ;;  %v620_v60 = vshll.u32 %v3698_v33, 16 }
  0x78   : > { %v524_v3 = vshll.u32 %v3704_v17, 16 }
  0x7a   : > { %1323 = vrot.lane.b32.xlu1 %v1288_v45, %s3246_s19  ;;  %v155_v45 = vld [vmem:[%s3279_s14 + $0x3c] sm:$0xf]  ;;  %v526_v5 = vrot.slane %v524_v3, 1 }
  0x7b   : > { %1307 = vrot.lane.b32.xlu0 %v1264_v48, %s3246_s19  ;;  %v2770_v48 = vld [vmem:[%s3279_s14 + $0x9c] sm:$0xe]  ;;  %v3736_v6 = vcombine.low %v155_v45, %v3717_v47 }
  0x7c   : > { %v2914_v51 = vcombine.low %v2770_v48, %v3632_v36  ;;  %v1773_v36 = vsel %vm740_vm0, %v1771_v54, %v1772_v34  ;;  %v527_v13 = vsel %vm467_vm1, %v522_v16, %v526_v5  ;;  %v1776_v34 = vsel %vm740_vm0, %v1774_v10, %v1775_v27  ;;  %v2657_v27 = vld [vmem:[%s3279_s14 + $0x48] sm:$0xf] }
  0x7d   : > { %4580 = vst [vmem:[#allocation6_spill] sm:$0xff] %v3736_v6  ;;  %v531_v8 = vshll.u32 %v3736_v6, 16  ;;  %v781_v10 = vrot.slane %v3744_v12, 1 }
  0x7e   : > { %1433 = vrot.lane.b32.xlu1 %v2881_v2, %s3247_s20  ;;  %v1535_v2 = vor.u32 %v1534_v20, %v1530_v15  ;;  %v622_v15 = vrot.slane %v620_v60, 1  ;;  %v1798_v22 = vrot.slane %v2914_v51, 1  ;;  %v2671_v51 = vld [vmem:[%s3279_s14 + $0x9c] sm:$0xf] }
  0x7f   : > { %1417 = vrot.lane.b32.xlu0 %v2873_v19, %s3247_s20  ;;  %v171_v19 = vld [vmem:[%s3279_s14 + $0x9c] sm:$0xf]  ;;  %v533_v1 = vrot.slane %v531_v8, 1  ;;  %v3808_v8 = vld [vmem:[%s3279_s14 + $0xac] sm:$0xf] }
  0x80   : > { %v1540_v11 = vsel %vm467_vm1, %v1535_v2, %v1539_v35  ;;  %v1800_v48 = vsel %vm740_vm0, %v1798_v22, %v1799_v28 }
  0x82   : > { %1435 = vrot.lane.b32.xlu1 %v2882_v42, %s3247_s20  ;;  %v3712_v42 = vld [vmem:[%s3279_s14 + $0xa0] sm:$0xf] }
  0x83   : > { %1419 = vrot.lane.b32.xlu0 %v2874_v44, %s3247_s20  ;;  %v1796_v44 = vrot.slane %v3649_v46, 1  ;;  %v613_v46 = vshrl.u32 %v3689_v57, 16  ;;  %v3731_v61 = vcombine.low %v171_v19, %v3712_v42  ;;  %v529_v19 = vshrl.u32 %v3736_v6, 16 }
  0x85   : > { %4579 = vst [vmem:[#allocation5_spill] sm:$0xff] %v3731_v61  ;;  %v1797_v39 = vsel %vm740_vm0, %v1795_v43, %v1796_v44  ;;  %v618_v14 = vor.u32 %v617_v59, %v613_v46  ;;  %v627_v20 = vshll.u32 %v3731_v61, 16  ;;  %v625_v35 = vshrl.u32 %v3731_v61, 16  ;;  %v206_v59 = vld [vmem:[%s3279_s14 + $0x9c] sm:$0xe] }
  0x86   : > { %v3707_v41 = vpop.permute.xlu1 %917  ;;  %1705 = vrot.lane.b32.xlu1 %v1624_v21, %s3248_s21  ;;  %v536_v43 = vshll.u32 %v3753_v56, 16  ;;  %v2819_v44 = vcombine.low %v205_v37, %v3677_v7  ;;  %v534_v58 = vor.u32 %v533_v1, %v529_v19  ;;  %v778_v7 = vrot.slane %v3698_v33, 1  ;;  %v2655_v33 = vld [vmem:[%s3279_s14 + $0x3c] sm:$0xf] }
  0x87   : > { %v3721_v49 = vpop.permute.xlu0 %901  ;;  %1689 = vrot.lane.b32.xlu0 %v1528_v32, %s3248_s21  ;;  %v623_v2 = vsel %vm467_vm1, %v618_v14, %v622_v15  ;;  %v629_v21 = vrot.slane %v627_v20, 1  ;;  %v197_v32 = vld [vmem:[%s3279_s14 + $0x30] sm:$0xe]  ;;  %v3792_v14 = vld [vmem:[%s3279_s14 + $0xa0] sm:$0xf]  ;;  %v2812_v20 = vcombine.low %v198_v62, %v3717_v47  ;;  %v757_v37 = vrot.slane %v3753_v56, 1 }
  0x88   : > { %v2811_v45 = vcombine.low %v197_v32, %v3682_v40  ;;  %v538_v46 = vrot.slane %v536_v43, 1  ;;  %v754_v40 = vrot.slane %v3704_v17, 1  ;;  %v777_v0 = vrot.slane %v2819_v44, 1  ;;  %v3828_v1 = vld [vmem:[%s3279_s14 + $0xa4] ss:$0 sps:$4 sm:$0x11]  }
  0x89   : > { %v2835_v5 = vcombine.low %v2671_v51, %v3792_v14  ;;  %v3844_v62 = vld [vmem:[%s3279_s14 + $0xb0] ss:$0 sps:$4 sm:$0x11]  }
  0x8a   : > { %v3739_v63 = vpop.permute.xlu1 %805  ;;  %1707 = vrot.lane.b32.xlu1 %v1636_v52, %s3248_s21  ;;  %v630_v52 = vor.u32 %v629_v21, %v625_v35  ;;  %v753_v3 = vrot.slane %v2811_v45, 1  ;;  %v539_v15 = vsel %vm467_vm1, %v534_v58, %v538_v46  ;;  %v779_v22 = vsel %vm740_vm0, %v777_v0, %v778_v7  ;;  %v3850_v51 = vld [vmem:[%s3279_s14 + $0x50] ss:$0 sps:$4 sm:$0x11]  }
  0x8b   : > { %1691 = vrot.lane.b32.xlu0 %v1540_v11, %s3248_s21  ;;  %v634_v11 = vrot.slane %v632_v30, 1  ;;  %v3816_v30 = vld [vmem:[%s3279_s14 + $0x4c] sm:$0xf]  ;;  %v756_v21 = vrot.slane %v2812_v20, 1  ;;  %v1128_v12 = vshll.u32 %v2835_v5, 16 }
  0x8c   : > { %v3749_v4 = vpop.permute.xlu0 %789  ;;  %v755_v35 = vsel %vm740_vm0, %v753_v3, %v754_v40  ;;  %v2828_v19 = vcombine.low %v2657_v27, %v3816_v30 }
  0x8d   : > { %v635_v9 = vsel %vm467_vm1, %v630_v52, %v634_v11  ;;  %v758_v56 = vsel %vm740_vm0, %v756_v21, %v757_v37  ;;  %v1130_v46 = vrot.slane %v1128_v12, 1  ;;  %v1049_v37 = vshll.u32 %v3850_v51, 16 }
  0x8e   : > { %1833 = vrot.lane.b32.xlu1 %v1797_v39, %s3249_s22  ;;  %v2820_v39 = vcombine.low %v206_v59, %v3712_v42  ;;  %v2673_v42 = vld [vmem:[%s3279_s14 + $0xa8] sm:$0xf]  ;;  %v1044_v58 = vshll.u32 %v2828_v19, 16  ;;  %v1133_v59 = vshll.u32 %v3828_v1, 16  ;;  %v1042_v21 = vshrl.u32 %v2828_v19, 16 }
  0x8f   : > { %v3757_v24 = vpop.permute.xlu1 %807  ;;  %1817 = vrot.lane.b32.xlu0 %v1773_v36, %s3249_s22  ;;  %v3800_v36 = vld [vmem:[%s3279_s14 + $0x40] sm:$0xf] }
  0x90   : > { %v780_v28 = vrot.slane %v2820_v39, 1  ;;  %v2827_v47 = vcombine.low %v2655_v33, %v3800_v36  ;;  %v1135_v20 = vrot.slane %v1133_v59, 1  ;;  %v2700_v59 = vld [vmem:[%s3279_s14 + $0x48] sm:$0xe] }
  0x91   : > { %v3770_v55 = vpop.permute.xlu0 %791 }
  0x92   : > { %684 = vrot.lane.b32.xlu1 %v623_v2, %s3244_s17  ;;  %v782_v43 = vsel %vm740_vm0, %v780_v28, %v781_v10  ;;  %v1032_v44 = vshll.u32 %v2827_v47, 16  ;;  %v1030_v7 = vshrl.u32 %v2827_v47, 16  ;;  %v1145_v28 = vshll.u32 %v3844_v62, 16  ;;  %v2699_v10 = vld [vmem:[%s3279_s14 + $0x3c] sm:$0xe] }
  0x93   : > { %668 = vrot.lane.b32.xlu0 %v527_v13, %s3244_s17  ;;  %v2836_v13 = vcombine.low %v2673_v42, %v3808_v8 }
  0x94   : > { %v3777_v54 = vpop.permute.xlu1 %662  ;;  %v1034_v40 = vrot.slane %v1032_v44, 1  ;;  %v3868_v44 = vld [vmem:[%s3279_s14 + $0xac] sm:$0xf] }
  0x95   : > { %v3781_v60 = vpop.permute.xlu0 %660  ;;  %v1140_v11 = vshll.u32 %v2836_v13, 16  ;;  %v1138_v33 = vshrl.u32 %v2836_v13, 16 }
  0x96   : > { %1835 = vrot.lane.b32.xlu1 %v1800_v48, %s3249_s22  ;;  %v3836_v48 = vld [vmem:[%s3279_s14 + $0x44] ss:$0 sps:$4 sm:$0x11]   ;;  %v1035_v42 = vor.u32 %v1034_v40, %v1030_v7  ;;  %v1051_v40 = vrot.slane %v1049_v37, 1 }
  0x97   : > { %1819 = vrot.lane.b32.xlu0 %v1776_v34, %s3249_s22  ;;  %v1126_v34 = vshrl.u32 %v2835_v5, 16  ;;  %v1037_v3 = vshll.u32 %v3836_v48, 16  ;;  %v1266_v37 = vrot.slane %v3836_v48, 1 }
  0x98   : > { %v3795_v17 = vpop.permute.xlu1 %678 }
  0x99   : > { %v3802_v16 = vpop.permute.xlu0 %676  ;;  %v1131_v39 = vor.u32 %v1130_v46, %v1126_v34  ;;  %v1147_v46 = vrot.slane %v1145_v28, 1 }
  0x9a   : > { %686 = vrot.lane.b32.xlu1 %v635_v9, %s3244_s17 }
  0x9b   : > { %670 = vrot.lane.b32.xlu0 %v539_v15, %s3244_s17  ;;  %v2707_v15 = vld [vmem:[%s3279_s14 + $0x9c] sm:$0xe]  ;;  %v1136_v34 = vsel %vm467_vm1, %v1131_v39, %v1135_v20  ;;  %v3889_v39 = vld [vmem:[%s3279_s14 + $0xb8] sm:$0xf] }
  0x9c   : > { %v3818_v2 = vpop.permute.xlu1 %919 }
  0x9d   : > { %v3822_v32 = vpop.permute.xlu0 %903 }
  0x9e   : > { %813 = vrot.lane.b32.xlu1 %v779_v22, %s3243_s16  ;;  %v1142_v22 = vrot.slane %v1140_v11, 1  ;;  %v2708_v11 = vld [vmem:[%s3279_s14 + $0xa8] sm:$0xe] }
  0x9f   : > { %797 = vrot.lane.b32.xlu0 %v755_v35, %s3243_s16  ;;  %v1039_v35 = vrot.slane %v1037_v3, 1  ;;  %v2719_v3 = vld [vmem:[%s3279_s14 + $0x48] sm:$0xf] }
  0xa0   : > { %v3832_v45 = vpop.permute.xlu1 %1189 }
  0xa1   : > { %v3838_v52 = vpop.permute.xlu0 %1173 }
  0xa2   : > { %815 = vrot.lane.b32.xlu1 %v782_v43, %s3243_s16  ;;  %v2735_v43 = vld [vmem:[%s3279_s14 + $0xa8] sm:$0xf] }
  0xa3   : > { %799 = vrot.lane.b32.xlu0 %v758_v56, %s3243_s16  ;;  %v2859_v56 = vcombine.low %v2699_v10, %v3800_v36  ;;  %v3882_v36 = vcombine.low %v2735_v43, %v3868_v44  ;;  %v3885_v10 = vld [vmem:[%s3279_s14 + $0x4c] sm:$0xf] }
  0xa4   : > { %v3846_v0 = vpop.permute.xlu1 %1191 }
  0xa5   : > { %v3852_v9 = vpop.permute.xlu0 %1175 }
  0xa6   : > { %925 = vrot.lane.b32.xlu1 %v2835_v5, %s3242_s15  ;;  %v1046_v5 = vrot.slane %v1044_v58, 1  ;;  %v1143_v58 = vor.u32 %v1142_v22, %v1138_v33  ;;  %v2868_v33 = vcombine.low %v2708_v11, %v3808_v8  ;;  %v2860_v22 = vcombine.low %v2700_v59, %v3816_v30  ;;  %v3909_v30 = vld [vmem:[%s3279_s14 + $0x58] sm:$0xf]  ;;  %v3915_v11 = vld [vmem:[%s3279_s14 + $0xb0] ss:$0 sps:$4 sm:$0x11]  }
  0xa7   : > { %909 = vrot.lane.b32.xlu0 %v2827_v47, %s3242_s15  ;;  %v2867_v47 = vcombine.low %v2707_v15, %v3792_v14  ;;  %v1040_v14 = vsel %vm467_vm1, %v1035_v42, %v1039_v35  ;;  %v1290_v42 = vrot.slane %v3828_v1, 1  ;;  %v1265_v35 = vrot.slane %v2859_v56, 1  ;;  %v2721_v1 = vld [vmem:[%s3279_s14 + $0x54] sm:$0xf] }
  0xa8   : > { %v3859_v27 = vpop.permute.xlu1 %1317  ;;  %v1148_v28 = vsel %vm467_vm1, %v1143_v58, %v1147_v46  ;;  %v3902_v8 = vcombine.low %v2719_v3, %v3885_v10  ;;  %v1640_v56 = vshll.u32 %v3882_v36, 16  ;;  %v1293_v58 = vrot.slane %v3844_v62, 1 }
  0xa9   : > { %v3862_v12 = vpop.permute.xlu0 %1301  ;;  %v1289_v20 = vrot.slane %v2867_v47, 1  ;;  %v1268_v46 = vrot.slane %v2860_v22, 1  ;;  %v1269_v59 = vrot.slane %v3850_v51, 1  ;;  %v1267_v3 = vsel %vm740_vm0, %v1265_v35, %v1266_v37  ;;  %v3941_v35 = vld [vmem:[%s3279_s14 + $0x50] ss:$0 sps:$4 sm:$0x11]  }
  0xaa   : > { %927 = vrot.lane.b32.xlu1 %v2836_v13, %s3242_s15  ;;  %v1047_v13 = vor.u32 %v1046_v5, %v1042_v21  ;;  %v1638_v51 = vshrl.u32 %v3882_v36, 16  ;;  %v1863_v22 = vsel %vm1845_vm3, %v3311_v18, %v3802_v16  ;;  %v3951_v16 = vld [vmem:[%s3279_s14 + $0xbc] ss:$0 sps:$4 sm:$0x11]  }
  0xab   : > { %911 = vrot.lane.b32.xlu0 %v2828_v19, %s3242_s15  ;;  %v2737_v19 = vld [vmem:[%s3279_s14 + $0xb4] sm:$0xf]  ;;  %v1291_v48 = vsel %vm740_vm0, %v1289_v20, %v1290_v42  ;;  %v1642_v20 = vrot.slane %v1640_v56, 1  ;;  %v1645_v42 = vshll.u32 %v3915_v11, 16 }
  0xac   : > { %v3875_v7 = vpop.permute.xlu1 %1319  ;;  %v1052_v5 = vsel %vm467_vm1, %v1047_v13, %v1051_v40  ;;  %v3905_v47 = vcombine.low %v2737_v19, %v3889_v39  ;;  %v3924_v13 = vcombine.low %v2721_v1, %v3909_v30  ;;  %v1544_v19 = vshll.u32 %v3902_v8, 16 }
  0xad   : > { %v3879_v15 = vpop.permute.xlu0 %1303  ;;  %v1270_v1 = vsel %vm740_vm0, %v1268_v46, %v1269_v59  ;;  %v3959_v46 = vld [vmem:[%s3279_s14 + $0x5c] ss:$0 sps:$4 sm:$0x11]  }
  0xae   : > { %1197 = vrot.lane.b32.xlu1 %v1136_v34, %s3245_s18  ;;  %v1292_v34 = vrot.slane %v2868_v33, 1  ;;  %v1652_v33 = vshll.u32 %v3905_v47, 16  ;;  %v1556_v18 = vshll.u32 %v3924_v13, 16  ;;  %v1650_v6 = vshrl.u32 %v3905_v47, 16 }
  0xaf   : > { %1181 = vrot.lane.b32.xlu0 %v1040_v14, %s3245_s18  ;;  %v2771_v14 = vld [vmem:[%s3279_s14 + $0xa8] sm:$0xe]  ;;  %v1561_v57 = vshll.u32 %v3959_v46, 16 }
  0xb0   : > { %v3897_v21 = vpop.permute.xlu1 %1429  ;;  %v1294_v37 = vsel %vm740_vm0, %v1292_v34, %v1293_v58  ;;  %v1654_v61 = vrot.slane %v1652_v33, 1  ;;  %v1643_v34 = vor.u32 %v1642_v20, %v1638_v51  ;;  %v1647_v58 = vrot.slane %v1645_v42, 1  ;;  %v173_v20 = vld [vmem:[%s3279_s14 + $0xa8] sm:$0xf]  ;;  %v3971_v42 = vld [vmem:[%s3279_s14 + $0xac] sm:$0xf] }
  0xb1   : > { %v3911_v43 = vpop.permute.xlu0 %1413  ;;  %v1657_v33 = vshll.u32 %v3951_v16, 16  ;;  %v1558_v51 = vrot.slane %v1556_v18, 1 }
  0xb2   : > { %1199 = vrot.lane.b32.xlu1 %v1148_v28, %s3245_s18  ;;  %v2915_v28 = vcombine.low %v2771_v14, %v3868_v44  ;;  %v1542_v44 = vshrl.u32 %v3902_v8, 16  ;;  %v1546_v14 = vrot.slane %v1544_v19, 1  ;;  %v1554_v19 = vshrl.u32 %v3924_v13, 16 }
  0xb3   : > { %1183 = vrot.lane.b32.xlu0 %v1052_v5, %s3245_s18  ;;  %v1847_v5 = vsel %vm1845_vm3, %v3316_v23, %v3781_v60  ;;  %v1896_v23 = vsel %vm1878_vm4, %v1863_v22, %v3739_v63  ;;  %v1648_v18 = vsel %vm467_vm1, %v1643_v34, %v1647_v58 }
  0xb4   : > { %v3926_v40 = vpop.permute.xlu1 %1431  ;;  %v1880_v59 = vsel %vm1878_vm4, %v1847_v5, %v3749_v4  ;;  %v1929_v4 = vsel %vm1911_vm5, %v1896_v23, %v3707_v41  ;;  %v1547_v5 = vor.u32 %v1546_v14, %v1542_v44  ;;  %v3977_v26 = vrot.slane %v2915_v28, 1  ;;  %v3989_v41 = vld [vmem:[%s3279_s14 + $0x4c] sm:$0xf] }
  0xb5   : > { %v3931_v62 = vpop.permute.xlu0 %1415  ;;  %v1559_v14 = vor.u32 %v1558_v51, %v1554_v19  ;;  %v4050_v51 = vld [vmem:[%s3279_s14 + $0xb8] sm:$0xf] }
  0xb6   : > { %1325 = vrot.lane.b32.xlu1 %v1291_v48, %s3246_s19  ;;  %v2763_v48 = vld [vmem:[%s3279_s14 + $0x48] sm:$0xe] }
  0xb7   : > { %1309 = vrot.lane.b32.xlu0 %v1267_v3, %s3246_s19  ;;  %v1549_v3 = vshll.u32 %v3941_v35, 16  ;;  %v2907_v63 = vcombine.low %v2763_v48, %v3885_v10  ;;  %v1913_v10 = vsel %vm1911_vm5, %v1880_v59, %v3721_v49  ;;  %v3998_v49 = vcombine.low %v173_v20, %v3971_v42 }
  0xb8   : > { %v1702_v56 = vpop.permute.xlu1 %1701 }
  0xb9   : > { %v1686_v60 = vpop.permute.xlu0 %1685 }
  0xba   : > { %1327 = vrot.lane.b32.xlu1 %v1294_v37, %s3246_s19  ;;  %v1655_v37 = vor.u32 %v1654_v61, %v1650_v6  ;;  %v1946_v61 = vsel %vm1944_vm6, %v1913_v10, %v3838_v52  ;;  %v1659_v52 = vrot.slane %v1657_v33, 1  ;;  %v175_v33 = vld [vmem:[%s3279_s14 + $0xb4] sm:$0xf] }
  0xbb   : > { %1311 = vrot.lane.b32.xlu0 %v1270_v1, %s3246_s19  ;;  %v1962_v1 = vsel %vm1944_vm6, %v1929_v4, %v3832_v45  ;;  %v1551_v45 = vrot.slane %v1549_v3, 1  ;;  %v1979_v28 = vsel %vm1977_vm7, %v1946_v61, %v3862_v12  ;;  %v4013_v12 = vcombine.low %v157_v29, %v3989_v41 }
  0xbc   : > { %v3975_v22 = vpop.permute.xlu1 %1703  ;;  %v1995_v6 = vsel %vm1977_vm7, %v1962_v1, %v3859_v27  ;;  %v1865_v27 = vsel %vm1845_vm3, %v3323_v31, %v3795_v17  ;;  %v1563_v31 = vrot.slane %v1561_v57, 1  ;;  %v4021_v17 = vld [vmem:[%s3279_s14 + $0xb0] ss:$0 sps:$4 sm:$0x11]   ;;  %v1802_v29 = vrot.slane %v3915_v11, 1 }
  0xbd   : > { %v3983_v48 = vpop.permute.xlu0 %1687  ;;  %v2028_v44 = vsel %vm2010_vm8, %v1995_v6, %v3897_v21  ;;  %v1849_v21 = vsel %vm1845_vm3, %v3329_v38, %v3777_v54  ;;  %v1777_v38 = vrot.slane %v2907_v63, 1  ;;  %v639_v54 = vshll.u32 %v3998_v49, 16 }
  0xbe   : > { %1437 = vrot.lane.b32.xlu1 %v3882_v36, %s3247_s20  ;;  %v2012_v36 = vsel %vm2010_vm8, %v1979_v28, %v3911_v43  ;;  %v2061_v23 = vsel %vm2043_vm9, %v2028_v44, %v1702_v56  ;;  %v1898_v56 = vsel %vm1878_vm4, %v1865_v27, %v3757_v24  ;;  %v1552_v57 = vsel %vm467_vm1, %v1547_v5, %v1551_v45  ;;  %v159_v5 = vld [vmem:[%s3279_s14 + $0x54] sm:$0xf] }
  0xbf   : > { %1421 = vrot.lane.b32.xlu0 %v3902_v8, %s3247_s20  ;;  %v2045_v8 = vsel %vm2043_vm9, %v2012_v36, %v1686_v60  ;;  %v1778_v11 = vrot.slane %v3941_v35, 1  ;;  %v4038_v60 = vld [vmem:[%s3279_s14 + $0x50] ss:$0 sps:$4 sm:$0x11]   ;;  %v1931_v3 = vsel %vm1911_vm5, %v1898_v56, %v3818_v2  ;;  %v1882_v24 = vsel %vm1878_vm4, %v1849_v21, %v3770_v55  ;;  %v2772_v45 = vld [vmem:[%s3279_s14 + $0xb4] sm:$0xe] }
  0xc0   : > { %v1830_v34 = vpop.permute.xlu1 %1829  ;;  %v543_v63 = vshll.u32 %v4013_v12, 16  ;;  %v1915_v35 = vsel %vm1911_vm5, %v1882_v24, %v3822_v32  ;;  %v1964_v2 = vsel %vm1944_vm6, %v1931_v3, %v3846_v0  ;;  %v1564_v55 = vsel %vm467_vm1, %v1559_v14, %v1563_v31  ;;  %v2764_v28 = vld [vmem:[%s3279_s14 + $0x54] sm:$0xe] }
  0xc1   : > { %v1814_v58 = vpop.permute.xlu0 %1813  ;;  %v2094_v59 = vsel %vm2076_vm10, %v2061_v23, %v1830_v34  ;;  %v644_v4 = vshll.u32 %v4021_v17, 16  ;;  %v1948_v1 = vsel %vm1944_vm6, %v1915_v35, %v3852_v9  ;;  %v1997_v10 = vsel %vm1977_vm7, %v1964_v2, %v3875_v7 }
  0xc2   : > { %1439 = vrot.lane.b32.xlu1 %v3905_v47, %s3247_s20  ;;  %v2078_v43 = vsel %vm2076_vm10, %v2045_v8, %v1814_v58  ;;  %3046 = vmatprep.mubr.msk.bf16.mxu1 %vm2129_vm11, %v2094_v59  ;;  %v1660_v47 = vsel %vm467_vm1, %v1655_v37, %v1659_v52  ;;  %v4062_v37 = vld [vmem:[%s3279_s14 + $0x58] sm:$0xf]  ;;  %v641_v32 = vrot.slane %v639_v54, 1  ;;  %v541_v0 = vshrl.u32 %v4013_v12, 16 }
  0xc3   : > { %1423 = vrot.lane.b32.xlu0 %v3924_v13, %s3247_s20  ;;  %3030 = vmatprep.mubr.msk.bf16.mxu0 %vm2129_vm11, %v2078_v43  ;;  %v637_v13 = vshrl.u32 %v3998_v49, 16  ;;  %v1981_v61 = vsel %vm1977_vm7, %v1948_v1, %v3879_v15  ;;  %v2030_v6 = vsel %vm2010_vm8, %v1997_v10, %v3926_v40  ;;  %v548_v9 = vshll.u32 %v4038_v60, 16  ;;  %v4101_v8 = vld [vmem:[%s3279_s14 + $0xbc] ss:$0 sps:$4 sm:$0x11]  }
  0xc4   : > { %v4044_v19 = vpop.permute.xlu1 %680  ;;  %v4079_v44 = vcombine.low %v175_v33, %v4050_v51  ;;  %v2014_v7 = vsel %vm2010_vm8, %v1981_v61, %v3931_v62  ;;  %v545_v15 = vrot.slane %v543_v63, 1  ;;  %v4086_v40 = vcombine.low %v159_v5, %v4062_v37  ;;  %v4108_v43 = vld [vmem:[%s3279_s14 + $0x5c] ss:$0 sps:$4 sm:$0x11]  }
  0xc5   : > { %v4056_v20 = vpop.permute.xlu0 %664  ;;  %v2047_v14 = vsel %vm2043_vm9, %v2014_v7, %v3983_v48  ;;  %v2916_v23 = vcombine.low %v2772_v45, %v3889_v39  ;;  %v2908_v62 = vcombine.low %v2764_v28, %v3909_v30  ;;  %v642_v48 = vor.u32 %v641_v32, %v637_v13  ;;  %v208_v28 = vld [vmem:[%s3279_s14 + $0xb4] sm:$0xe] }
  0xc6   : > { %1709 = vrot.lane.b32.xlu1 %v1648_v18, %s3248_s21  ;;  %v2063_v18 = vsel %vm2043_vm9, %v2030_v6, %v3975_v22  ;;  %v1803_v22 = vsel %vm740_vm0, %v3977_v26, %v1802_v29  ;;  %v646_v21 = vrot.slane %v644_v4, 1  ;;  %v651_v39 = vshll.u32 %v4079_v44, 16  ;;  %v200_v7 = vld [vmem:[%s3279_s14 + $0x54] sm:$0xe] }
  0xc7   : > { %1693 = vrot.lane.b32.xlu0 %v1552_v57, %s3248_s21  ;;  %v1779_v58 = vsel %vm740_vm0, %v1777_v38, %v1778_v11  ;;  %v546_v59 = vor.u32 %v545_v15, %v541_v0  ;;  %v550_v31 = vrot.slane %v548_v9, 1  ;;  %v555_v54 = vshll.u32 %v4086_v40, 16 }
  0xc8   : > { %v1832_v52 = vpop.permute.xlu1 %1831  ;;  %v1804_v26 = vrot.slane %v2916_v23, 1  ;;  %v1805_v29 = vrot.slane %v3951_v16, 1  ;;  %v1780_v57 = vrot.slane %v2908_v62, 1  ;;  %v647_v38 = vsel %vm467_vm1, %v642_v48, %v646_v21  ;;  %v2675_v62 = vld [vmem:[%s3279_s14 + $0xb4] sm:$0xf] }
  0xc9   : > { %v2096_v27 = vsel %vm2076_vm10, %v2063_v18, %v1832_v52  ;;  %v1816_v36 = vpop.permute.xlu0 %1815  ;;  %v649_v11 = vshrl.u32 %v4079_v44, 16  ;;  %v653_v3 = vrot.slane %v651_v39, 1  ;;  %v656_v24 = vshll.u32 %v4101_v8, 16  ;;  %v2659_v48 = vld [vmem:[%s3279_s14 + $0x54] sm:$0xf] }
  0xca   : > { %v2080_v34 = vsel %vm2076_vm10, %v2047_v14, %v1816_v36  ;;  %1711 = vrot.lane.b32.xlu1 %v1660_v47, %s3248_s21  ;;  %3047 = vmatmul.mubr.msk.bf16.vlgmr.msra.gmra.mxu1 %vm2129_vm11, %v2096_v27  ;;  %v1781_v47 = vrot.slane %v3959_v46, 1  ;;  %v551_v63 = vsel %vm467_vm1, %v546_v59, %v550_v31  ;;  %v553_v33 = vshrl.u32 %v4086_v40, 16  ;;  %v207_v46 = vld [vmem:[%s3279_s14 + $0xa8] sm:$0xe] }
  0xcb   : > { %1695 = vrot.lane.b32.xlu0 %v1564_v55, %s3248_s21  ;;  %3031 = vmatmul.mubr.msk.bf16.vlgmr.msra.gmra.mxu0 %vm2129_vm11, %v2080_v34  ;;  %v557_v35 = vrot.slane %v555_v54, 1  ;;  %v560_v16 = vshll.u32 %v4108_v43, 16  ;;  %v199_v55 = vld [vmem:[%s3279_s14 + $0x48] sm:$0xe]  ;;  %v1806_v4 = vsel %vm740_vm0, %v1804_v26, %v1805_v29  ;;  %v654_v5 = vor.u32 %v653_v3, %v649_v11  ;;  %v4153_v34 = vld [vmem:[%s3279_s14 + $0xb8] sm:$0xf] }
  0xcc   : > { %v4104_v30 = vpop.permute.xlu1 %682  ;;  %v658_v1 = vrot.slane %v656_v24, 1  ;;  %v2821_v10 = vcombine.low %v207_v46, %v3971_v42  ;;  %v1782_v0 = vsel %vm740_vm0, %v1780_v57, %v1781_v47  ;;  %v2813_v45 = vcombine.low %v199_v55, %v3989_v41  ;;  %v2677_v26 = vld [vmem:[%s3279_s14 + $0xc0] sm:$0xf]  ;;  %v4173_v29 = vld [vmem:[%s3279_s14 + $0xc4] sm:$0xf] }
  0xcd   : > { %v4111_v56 = vpop.permute.xlu0 %666  ;;  %v558_v61 = vor.u32 %v557_v35, %v553_v33  ;;  %v562_v6 = vrot.slane %v560_v16, 1  ;;  %v784_v52 = vrot.slane %v4021_v17, 1  ;;  %v2822_v15 = vcombine.low %v208_v28, %v4050_v51  ;;  %v4159_v17 = vld [vmem:[%s3279_s14 + $0x58] sm:$0xf]  ;;  %v2661_v47 = vld [vmem:[%s3279_s14 + $0x60] sm:$0xf] }
  0xce   : > { %1837 = vrot.lane.b32.xlu1 %v1803_v22, %s3249_s22  ;;  %v659_v42 = vsel %vm467_vm1, %v654_v5, %v658_v1  ;;  %v783_v18 = vrot.slane %v2821_v10, 1  ;;  %v759_v27 = vrot.slane %v2813_v45, 1  ;;  %v760_v36 = vrot.slane %v4038_v60, 1  ;;  %v4189_v24 = vld [vmem:[%s3279_s14 + $0x5c] ss:$0 sps:$4 sm:$0x11]  }
  0xcf   : > { %1821 = vrot.lane.b32.xlu0 %v1779_v58, %s3249_s22  ;;  %v563_v41 = vsel %vm467_vm1, %v558_v61, %v562_v6  ;;  %v2814_v23 = vcombine.low %v200_v7, %v4062_v37  ;;  %v786_v51 = vrot.slane %v2822_v15, 1  ;;  %v787_v37 = vrot.slane %v4101_v8, 1  ;;  %v4183_v8 = vld [vmem:[%s3279_s14 + $0xbc] ss:$0 sps:$4 sm:$0x11]  }
  0xd0   : > { %v4120_v13 = vpop.permute.xlu1 %809  ;;  %v785_v60 = vsel %vm740_vm0, %v783_v18, %v784_v52  ;;  %v2837_v21 = vcombine.low %v2675_v62, %v4153_v34  ;;  %v761_v58 = vsel %vm740_vm0, %v759_v27, %v760_v36  ;;  %v763_v31 = vrot.slane %v4108_v43, 1  ;;  %v4202_v10 = vld [vmem:[%s3279_s14 + $0xc8] ss:$0 sps:$4 sm:$0x11]  }
  0xd1   : > { %v4126_v2 = vpop.permute.xlu0 %793  ;;  %v762_v59 = vrot.slane %v2814_v23, 1  ;;  %v2829_v54 = vcombine.low %v2659_v48, %v4159_v17  ;;  %v788_v11 = vsel %vm740_vm0, %v786_v51, %v787_v37  ;;  %v2838_v43 = vcombine.low %v2677_v26, %v4173_v29  ;;  %v4207_v28 = vld [vmem:[%s3279_s14 + $0x68] ss:$0 sps:$4 sm:$0x11]   ;;  %v2709_v37 = vld [vmem:[%s3279_s14 + $0xb4] sm:$0xe] }
  0xd2   : > { %688 = vrot.lane.b32.xlu1 %v647_v38, %s3244_s17  ;;  %v4179_v38 = vld [vmem:[%s3279_s14 + $0x64] sm:$0xf]  ;;  %v1152_v3 = vshll.u32 %v2837_v21, 16  ;;  %v1150_v55 = vshrl.u32 %v2837_v21, 16  ;;  %v1061_v1 = vshll.u32 %v4189_v24, 16  ;;  %v1169_v36 = vshll.u32 %v4202_v10, 16 }
  0xd3   : > { %672 = vrot.lane.b32.xlu0 %v551_v63, %s3244_s17  ;;  %v764_v33 = vsel %vm740_vm0, %v762_v59, %v763_v31  ;;  %v2830_v35 = vcombine.low %v2661_v47, %v4179_v38  ;;  %v1056_v16 = vshll.u32 %v2829_v54, 16  ;;  %v1054_v6 = vshrl.u32 %v2829_v54, 16 }
  0xd4   : > { %v4133_v32 = vpop.permute.xlu1 %811  ;;  %v1154_v5 = vrot.slane %v1152_v3, 1  ;;  %v1162_v52 = vshrl.u32 %v2838_v43, 16  ;;  %v1073_v51 = vshll.u32 %v4207_v28, 16  ;;  %v2869_v26 = vcombine.low %v2709_v37, %v4153_v34 }
  0xd5   : > { %v4138_v9 = vpop.permute.xlu0 %795  ;;  %v1058_v45 = vrot.slane %v1056_v16, 1  ;;  %v1068_v7 = vshll.u32 %v2830_v35, 16  ;;  %v1066_v48 = vshrl.u32 %v2830_v35, 16 }
  0xd6   : > { %1839 = vrot.lane.b32.xlu1 %v1806_v4, %s3249_s22  ;;  %v1157_v4 = vshll.u32 %v4183_v8, 16  ;;  %v1155_v15 = vor.u32 %v1154_v5, %v1150_v55  ;;  %v2710_v55 = vld [vmem:[%s3279_s14 + $0xc0] sm:$0xe]  ;;  %v1296_v5 = vrot.slane %v4183_v8, 1 }
  0xd7   : > { %1823 = vrot.lane.b32.xlu0 %v1782_v0, %s3249_s22  ;;  %v1164_v0 = vshll.u32 %v2838_v43, 16  ;;  %v1059_v62 = vor.u32 %v1058_v45, %v1054_v6 }
  0xd8   : > { %v4146_v14 = vpop.permute.xlu1 %921  ;;  %v1159_v18 = vrot.slane %v1157_v4, 1  ;;  %v1295_v4 = vrot.slane %v2869_v26, 1 }
  0xd9   : > { %v4155_v22 = vpop.permute.xlu0 %905  ;;  %v1166_v27 = vrot.slane %v1164_v0, 1  ;;  %v4240_v0 = vld [vmem:[%s3279_s14 + $0xc4] sm:$0xf] }
  0xda   : > { %690 = vrot.lane.b32.xlu1 %v659_v42, %s3244_s17  ;;  %v1160_v59 = vsel %vm467_vm1, %v1155_v15, %v1159_v18  ;;  %v1272_v18 = vrot.slane %v4189_v24, 1  ;;  %v2723_v15 = vld [vmem:[%s3279_s14 + $0x60] sm:$0xf]  ;;  %v1297_v24 = vsel %vm740_vm0, %v1295_v4, %v1296_v5  ;;  %v4291_v4 = vld [vmem:[%s3279_s14 + $0xd4] ss:$0 sps:$4 sm:$0x11]  }
  0xdb   : > { %674 = vrot.lane.b32.xlu0 %v563_v41, %s3244_s17  ;;  %v1063_v41 = vrot.slane %v1061_v1, 1  ;;  %v1167_v31 = vor.u32 %v1166_v27, %v1162_v52  ;;  %v2870_v1 = vcombine.low %v2710_v55, %v4173_v29  ;;  %v2741_v27 = vld [vmem:[%s3279_s14 + $0xcc] sm:$0xf] }
  0xdc   : > { %v4166_v39 = vpop.permute.xlu1 %923 }
  0xdd   : > { %v4175_v57 = vpop.permute.xlu0 %907 }
  0xde   : > { %817 = vrot.lane.b32.xlu1 %v785_v60, %s3243_s16  ;;  %v1070_v60 = vrot.slane %v1068_v7, 1 }
  0xdf   : > { %801 = vrot.lane.b32.xlu0 %v761_v58, %s3243_s16  ;;  %v2701_v58 = vld [vmem:[%s3279_s14 + $0x54] sm:$0xe] }
  0xe0   : > { %v4191_v63 = vpop.permute.xlu1 %1193  ;;  %v1071_v3 = vor.u32 %v1070_v60, %v1066_v48  ;;  %v2861_v16 = vcombine.low %v2701_v58, %v4159_v17  ;;  %v2739_v17 = vld [vmem:[%s3279_s14 + $0xc0] sm:$0xf]  ;;  %v4264_v60 = vld [vmem:[%s3279_s14 + $0xc8] ss:$0 sps:$4 sm:$0x11]  }
  0xe1   : > { %v4195_v46 = vpop.permute.xlu0 %1177  ;;  %v2885_v29 = vcombine.low %v2739_v17, %v4240_v0 }
  0xe2   : > { %819 = vrot.lane.b32.xlu1 %v788_v11, %s3243_s16  ;;  %v1064_v11 = vsel %vm467_vm1, %v1059_v62, %v1063_v41  ;;  %v1271_v7 = vrot.slane %v2861_v16, 1  ;;  %v4249_v41 = vld [vmem:[%s3279_s14 + $0x64] sm:$0xf]  ;;  %v1299_v62 = vrot.slane %v4202_v10, 1  ;;  %v1669_v16 = vshll.u32 %v4264_v60, 16 }
  0xe3   : > { %803 = vrot.lane.b32.xlu0 %v764_v33, %s3243_s16  ;;  %v1075_v33 = vrot.slane %v1073_v51, 1  ;;  %v2877_v48 = vcombine.low %v2723_v15, %v4249_v41  ;;  %v4280_v10 = vld [vmem:[%s3279_s14 + $0x68] ss:$0 sps:$4 sm:$0x11]  }
  0xe4   : > { %v4204_v61 = vpop.permute.xlu1 %1195  ;;  %v1273_v37 = vsel %vm740_vm0, %v1271_v7, %v1272_v18  ;;  %v1573_v17 = vshll.u32 %v4280_v10, 16  ;;  %v1867_v7 = vsel %vm1845_vm3, %v3464_v50, %v4044_v19 }
  0xe5   : > { %v4209_v42 = vpop.permute.xlu0 %1179  ;;  %v1076_v45 = vsel %vm467_vm1, %v1071_v3, %v1075_v33  ;;  %v1664_v3 = vshll.u32 %v2885_v29, 16 }
  0xe6   : > { %929 = vrot.lane.b32.xlu1 %v2837_v21, %s3242_s15 }
  0xe7   : > { %913 = vrot.lane.b32.xlu0 %v2829_v54, %s3242_s15  ;;  %v1171_v54 = vrot.slane %v1169_v36, 1  ;;  %v4257_v36 = vld [vmem:[%s3279_s14 + $0xd0] sm:$0xf]  ;;  %v1666_v18 = vrot.slane %v1664_v3, 1  ;;  %v1575_v3 = vrot.slane %v1573_v17, 1 }
  0xe8   : > { %v4214_v23 = vpop.permute.xlu1 %1321  ;;  %v4274_v26 = vcombine.low %v2741_v27, %v4257_v36  ;;  %v1851_v27 = vsel %vm1845_vm3, %v3467_v53, %v4056_v20  ;;  %v1681_v53 = vshll.u32 %v4291_v4, 16 }
  0xe9   : > { %v4218_v21 = vpop.permute.xlu0 %1305  ;;  %v1172_v34 = vsel %vm467_vm1, %v1167_v31, %v1171_v54  ;;  %v2725_v31 = vld [vmem:[%s3279_s14 + $0x6c] sm:$0xf]  ;;  %v1884_v50 = vsel %vm1878_vm4, %v1851_v27, %v4126_v2 }
  0xea   : > { %931 = vrot.lane.b32.xlu1 %v2838_v43, %s3242_s15  ;;  %v1674_v15 = vshrl.u32 %v4274_v26, 16 }
  0xeb   : > { %915 = vrot.lane.b32.xlu0 %v2830_v35, %s3242_s15  ;;  %v2702_v35 = vld [vmem:[%s3279_s14 + $0x60] sm:$0xe] }
  0xec   : > { %v4225_v47 = vpop.permute.xlu1 %1323  ;;  %v2862_v52 = vcombine.low %v2702_v35, %v4179_v38  ;;  %v1298_v38 = vrot.slane %v2870_v1, 1  ;;  %v1662_v1 = vshrl.u32 %v2885_v29, 16 }
  0xed   : > { %v4230_v43 = vpop.permute.xlu0 %1307 }
  0xee   : > { %1201 = vrot.lane.b32.xlu1 %v1160_v59, %s3245_s18  ;;  %v1274_v58 = vrot.slane %v2862_v52, 1  ;;  %v1275_v59 = vrot.slane %v4207_v28, 1  ;;  %v1300_v33 = vsel %vm740_vm0, %v1298_v38, %v1299_v62  ;;  %v1568_v28 = vshll.u32 %v2877_v48, 16 }
  0xef   : > { %1185 = vrot.lane.b32.xlu0 %v1064_v11, %s3245_s18  ;;  %v4277_v11 = vld [vmem:[%s3279_s14 + $0x70] sm:$0xf]  ;;  %v1566_v52 = vshrl.u32 %v2877_v48, 16  ;;  %v1671_v38 = vrot.slane %v1669_v16, 1  ;;  %v1667_v16 = vor.u32 %v1666_v18, %v1662_v1 }
  0xf0   : > { %v4242_v6 = vpop.permute.xlu1 %1433  ;;  %v1276_v35 = vsel %vm740_vm0, %v1274_v58, %v1275_v59  ;;  %v1570_v62 = vrot.slane %v1568_v28, 1 }
  0xf1   : > { %v4251_v8 = vpop.permute.xlu0 %1417 }
  0xf2   : > { %1203 = vrot.lane.b32.xlu1 %v1172_v34, %s3245_s18  ;;  %v4288_v34 = vcombine.low %v2725_v31, %v4277_v11  ;;  %v1571_v17 = vor.u32 %v1570_v62, %v1566_v52  ;;  %v1869_v52 = vsel %vm1845_vm3, %v3502_v25, %v4104_v30 }
  0xf3   : > { %1187 = vrot.lane.b32.xlu0 %v1076_v45, %s3245_s18  ;;  %v1676_v45 = vshll.u32 %v4274_v26, 16 }
  0xf4   : > { %v4266_v51 = vpop.permute.xlu1 %1435  ;;  %v1580_v20 = vshll.u32 %v4288_v34, 16  ;;  %v1578_v28 = vshrl.u32 %v4288_v34, 16  ;;  %v1576_v25 = vsel %vm467_vm1, %v1571_v17, %v1575_v3 }
  0xf5   : > { %v4271_v54 = vpop.permute.xlu0 %1419 }
  0xf6   : > { %1329 = vrot.lane.b32.xlu1 %v1297_v24, %s3246_s19  ;;  %v1900_v24 = vsel %vm1878_vm4, %v1867_v7, %v4120_v13  ;;  %v1917_v13 = vsel %vm1911_vm5, %v1884_v50, %v4155_v22  ;;  %v1582_v7 = vrot.slane %v1580_v20, 1 }
  0xf7   : > { %1313 = vrot.lane.b32.xlu0 %v1273_v37, %s3246_s19  ;;  %v4307_v37 = vld [vmem:[%s3279_s14 + $0x74] ss:$0 sps:$4 sm:$0x11]   ;;  %v1933_v19 = vsel %vm1911_vm5, %v1900_v24, %v4146_v14  ;;  %v1950_v2 = vsel %vm1944_vm6, %v1917_v13, %v4195_v46 }
  0xf8   : > { %v1706_v55 = vpop.permute.xlu1 %1705  ;;  %v1966_v59 = vsel %vm1944_vm6, %v1933_v19, %v4191_v63  ;;  %v1983_v22 = vsel %vm1977_vm7, %v1950_v2, %v4218_v21  ;;  %v1585_v46 = vshll.u32 %v4307_v37, 16  ;;  %v2766_v19 = vld [vmem:[%s3279_s14 + $0x6c] sm:$0xe] }
  0xf9   : > { %v1690_v5 = vpop.permute.xlu0 %1689  ;;  %v1999_v14 = vsel %vm1977_vm7, %v1966_v59, %v4214_v23  ;;  %v2016_v23 = vsel %vm2010_vm8, %v1983_v22, %v4251_v8  ;;  %v1787_v22 = vrot.slane %v4307_v37, 1 }
  0xfa   : > { %1331 = vrot.lane.b32.xlu1 %v1300_v33, %s3246_s19  ;;  %v1678_v33 = vrot.slane %v1676_v45, 1  ;;  %v2032_v63 = vsel %vm2010_vm8, %v1999_v14, %v4242_v6  ;;  %v1683_v45 = vrot.slane %v1681_v53, 1  ;;  %v2049_v18 = vsel %vm2043_vm9, %v2016_v23, %v1690_v5  ;;  %v4581_v5 = vld [vmem:[#allocation2_spill] sm:$0xff] }
  0xfb   : > { %1315 = vrot.lane.b32.xlu0 %v1276_v35, %s3246_s19  ;;  %v2773_v35 = vld [vmem:[%s3279_s14 + $0xc0] sm:$0xe]  ;;  %v1587_v30 = vrot.slane %v1585_v46, 1 }
  0xfc   : > { %v4313_v58 = vpop.permute.xlu1 %1707  ;;  %v1679_v24 = vor.u32 %v1678_v33, %v1674_v15  ;;  %v2917_v6 = vcombine.low %v2773_v35, %v4240_v0  ;;  %v1853_v0 = vsel %vm1845_vm3, %v4581_v5, %v4111_v56  ;;  %v1902_v15 = vsel %vm1878_vm4, %v1869_v52, %v4133_v32  ;;  %v2774_v32 = vld [vmem:[%s3279_s14 + $0xcc] sm:$0xe] }
  0xfd   : > { %v4321_v31 = vpop.permute.xlu0 %1691  ;;  %v1583_v56 = vor.u32 %v1582_v7, %v1578_v28  ;;  %v2918_v33 = vcombine.low %v2774_v32, %v4257_v36 }
  0xfe   : > { %1441 = vrot.lane.b32.xlu1 %v2885_v29, %s3247_s20  ;;  %v2065_v29 = vsel %vm2043_vm9, %v2032_v63, %v1706_v55  ;;  %v1672_v55 = vsel %vm467_vm1, %v1667_v16, %v1671_v38  ;;  %v1935_v38 = vsel %vm1911_vm5, %v1902_v15, %v4166_v39  ;;  %v1807_v13 = vrot.slane %v2917_v6, 1 }
  0xff   : > { %1425 = vrot.lane.b32.xlu0 %v2877_v48, %s3247_s20  ;;  %v2765_v48 = vld [vmem:[%s3279_s14 + $0x60] sm:$0xe]  ;;  %v1968_v53 = vsel %vm1944_vm6, %v1935_v38, %v4204_v61  ;;  %v4582_v38 = vld [vmem:[#allocation3_spill] sm:$0xff] }
 0x100   : > { %v1834_v1 = vpop.permute.xlu1 %1833  ;;  %v2909_v50 = vcombine.low %v2765_v48, %v4249_v41  ;;  %v2001_v59 = vsel %vm1977_vm7, %v1968_v53, %v4225_v47  ;;  %v1808_v41 = vrot.slane %v4264_v60, 1 }
 0x101   : > { %v2098_v21 = vsel %vm2076_vm10, %v2065_v29, %v1834_v1  ;;  %v1818_v27 = vpop.permute.xlu0 %1817  ;;  %v2034_v3 = vsel %vm2010_vm8, %v2001_v59, %v4266_v51 }
 0x102   : > { %v2082_v8 = vsel %vm2076_vm10, %v2049_v18, %v1818_v27  ;;  %1443 = vrot.lane.b32.xlu1 %v4274_v26, %s3247_s20  ;;  %3050 = vmatprep.mubr.msk.bf16.mxu1 %vm2129_vm11, %v2098_v21  ;;  %v1886_v26 = vsel %vm1878_vm4, %v1853_v0, %v4138_v9  ;;  %v1684_v9 = vsel %vm467_vm1, %v1679_v24, %v1683_v45  ;;  %v1783_v14 = vrot.slane %v2909_v50, 1  ;;  %v4583_v50 = vld [vmem:[#allocation4_spill] sm:$0xff] }
 0x103   : > { %1427 = vrot.lane.b32.xlu0 %v4288_v34, %s3247_s20  ;;  %3034 = vmatprep.mubr.msk.bf16.mxu0 %vm2129_vm11, %v2082_v8  ;;  %v1919_v34 = vsel %vm1911_vm5, %v1886_v26, %v4175_v57  ;;  %v1784_v57 = vrot.slane %v4280_v10, 1  ;;  %v2067_v60 = vsel %vm2043_vm9, %v2034_v3, %v4313_v58  ;;  %v1588_v10 = vsel %vm467_vm1, %v1583_v56, %v1587_v30 }
 0x104   : > { %v4364_v62 = vpop.permute.xlu1 %684  ;;  %v1952_v39 = vsel %vm1944_vm6, %v1919_v34, %v4209_v42  ;;  %v2910_v42 = vcombine.low %v2766_v19, %v4277_v11  ;;  %v1810_v11 = vrot.slane %v2918_v33, 1  ;;  %v1811_v58 = vrot.slane %v4291_v4, 1 }
 0x105   : > { %v4373_v20 = vpop.permute.xlu0 %668  ;;  %v1985_v61 = vsel %vm1977_vm7, %v1952_v39, %v4230_v43  ;;  %v1871_v56 = vsel %vm1845_vm3, %v4582_v38, %v4364_v62 }
 0x106   : > { %1713 = vrot.lane.b32.xlu1 %v1672_v55, %s3248_s21  ;;  %v2018_v47 = vsel %vm2010_vm8, %v1985_v61, %v4271_v54  ;;  %v1809_v54 = vsel %vm740_vm0, %v1807_v13, %v1808_v41  ;;  %v1786_v35 = vrot.slane %v2910_v42, 1  ;;  %v1812_v17 = vsel %vm740_vm0, %v1810_v11, %v1811_v58 }
 0x107   : > { %1697 = vrot.lane.b32.xlu0 %v1576_v25, %s3248_s21  ;;  %v2051_v43 = vsel %vm2043_vm9, %v2018_v47, %v4321_v31  ;;  %v1785_v31 = vsel %vm740_vm0, %v1783_v14, %v1784_v57  ;;  %v1855_v32 = vsel %vm1845_vm3, %v4583_v50, %v4373_v20 }
 0x108   : > { %v1836_v2 = vpop.permute.xlu1 %1835  ;;  %v1788_v23 = vsel %vm740_vm0, %v1786_v35, %v1787_v22 }
 0x109   : > { %v2100_v51 = vsel %vm2076_vm10, %v2067_v60, %v1836_v2  ;;  %v1820_v16 = vpop.permute.xlu0 %1819  ;;  %v4584_v2 = vld [vmem:[#allocation5_spill] sm:$0xff] }
 0x10a   : > { %v2084_v36 = vsel %vm2076_vm10, %v2051_v43, %v1820_v16  ;;  %1715 = vrot.lane.b32.xlu1 %v1684_v9, %s3248_s21  ;;  %3051 = vmatmul.mubr.msk.bf16.gmra.mxu1 %vm2129_vm11, %v2100_v51  ;;  %v4585_v43 = vld [vmem:[#allocation6_spill] sm:$0xff] }
 0x10b   : > { %1699 = vrot.lane.b32.xlu0 %v1588_v10, %s3248_s21  ;;  %3035 = vmatmul.mubr.msk.bf16.gmra.mxu0 %vm2129_vm11, %v2084_v36 }
 0x10c   : > { %v687_v28 = vpop.permute.xlu1 %686 }
 0x10d   : > { %v671_v63 = vpop.permute.xlu0 %670  ;;  %v1873_v10 = vsel %vm1845_vm3, %v4584_v2, %v687_v28 }
 0x10e   : > { %1841 = vrot.lane.b32.xlu1 %v1809_v54, %s3249_s22  ;;  %v1857_v51 = vsel %vm1845_vm3, %v4585_v43, %v671_v63 }
 0x10f   : > { %1825 = vrot.lane.b32.xlu0 %v1785_v31, %s3249_s22 }
 0x110   : > { %v814_v46 = vpop.permute.xlu1 %813 }
 0x111   : > { %v798_v29 = vpop.permute.xlu0 %797  ;;  %v1904_v19 = vsel %vm1878_vm4, %v1871_v56, %v814_v46 }
 0x112   : > { %1843 = vrot.lane.b32.xlu1 %v1812_v17, %s3249_s22  ;;  %v1888_v34 = vsel %vm1878_vm4, %v1855_v32, %v798_v29 }
 0x113   : > { %1827 = vrot.lane.b32.xlu0 %v1788_v23, %s3249_s22 }
 0x114   : > { %v816_v4 = vpop.permute.xlu1 %815 }
 0x115   : > { %v800_v1 = vpop.permute.xlu0 %799  ;;  %v1906_v16 = vsel %vm1878_vm4, %v1873_v10, %v816_v4 }
 0x116   : > { %v1890_v36 = vsel %vm1878_vm4, %v1857_v51, %v800_v1 }
 0x118   : > { %v926_v45 = vpop.permute.xlu1 %925 }
 0x119   : > { %v910_v7 = vpop.permute.xlu0 %909  ;;  %v1937_v53 = vsel %vm1911_vm5, %v1904_v19, %v926_v45 }
 0x11a   : > { %v1921_v13 = vsel %vm1911_vm5, %v1888_v34, %v910_v7 }
 0x11c   : > { %v928_v37 = vpop.permute.xlu1 %927 }
 0x11d   : > { %v912_v18 = vpop.permute.xlu0 %911  ;;  %v1939_v54 = vsel %vm1911_vm5, %v1906_v16, %v928_v37 }
 0x11e   : > { %v1923_v58 = vsel %vm1911_vm5, %v1890_v36, %v912_v18 }
 0x120   : > { %v1198_v21 = vpop.permute.xlu1 %1197 }
 0x121   : > { %v1182_v27 = vpop.permute.xlu0 %1181  ;;  %v1970_v39 = vsel %vm1944_vm6, %v1937_v53, %v1198_v21 }
 0x122   : > { %v1954_v41 = vsel %vm1944_vm6, %v1921_v13, %v1182_v27 }
 0x124   : > { %v1200_v24 = vpop.permute.xlu1 %1199 }
 0x125   : > { %v1184_v6 = vpop.permute.xlu0 %1183  ;;  %v1972_v28 = vsel %vm1944_vm6, %v1939_v54, %v1200_v24 }
 0x126   : > { %v1956_v35 = vsel %vm1944_vm6, %v1923_v58, %v1184_v6 }
 0x128   : > { %v1326_v48 = vpop.permute.xlu1 %1325 }
 0x129   : > { %v1310_v52 = vpop.permute.xlu0 %1309  ;;  %v2003_v62 = vsel %vm1977_vm7, %v1970_v39, %v1326_v48 }
 0x12a   : > { %v1987_v57 = vsel %vm1977_vm7, %v1954_v41, %v1310_v52 }
 0x12c   : > { %v1328_v8 = vpop.permute.xlu1 %1327 }
 0x12d   : > { %v1312_v55 = vpop.permute.xlu0 %1311  ;;  %v2005_v22 = vsel %vm1977_vm7, %v1972_v28, %v1328_v8 }
 0x12e   : > { %v1989_v63 = vsel %vm1977_vm7, %v1956_v35, %v1312_v55 }
 0x130   : > { %v1438_v5 = vpop.permute.xlu1 %1437 }
 0x131   : > { %v1422_v0 = vpop.permute.xlu0 %1421  ;;  %v2036_v20 = vsel %vm2010_vm8, %v2003_v62, %v1438_v5 }
 0x132   : > { %v2020_v61 = vsel %vm2010_vm8, %v1987_v57, %v1422_v0 }
 0x134   : > { %v1440_v15 = vpop.permute.xlu1 %1439 }
 0x135   : > { %v1424_v25 = vpop.permute.xlu0 %1423  ;;  %v2038_v17 = vsel %vm2010_vm8, %v2005_v22, %v1440_v15 }
 0x136   : > { %v2022_v46 = vsel %vm2010_vm8, %v1989_v63, %v1424_v25 }
 0x138   : > { %v1710_v30 = vpop.permute.xlu1 %1709 }
 0x139   : > { %v1694_v26 = vpop.permute.xlu0 %1693  ;;  %v2069_v3 = vsel %vm2043_vm9, %v2036_v20, %v1710_v30 }
 0x13a   : > { %v2053_v42 = vsel %vm2043_vm9, %v2020_v61, %v1694_v26 }
 0x13c   : > { %v1712_v9 = vpop.permute.xlu1 %1711 }
 0x13d   : > { %v1696_v59 = vpop.permute.xlu0 %1695  ;;  %v2071_v23 = vsel %vm2043_vm9, %v2038_v17, %v1712_v9 }
 0x13e   : > { %v2055_v4 = vsel %vm2043_vm9, %v2022_v46, %v1696_v59 }
 0x140   : > { %v1838_v33 = vpop.permute.xlu1 %1837 }
 0x141   : > { %v2102_v47 = vsel %vm2076_vm10, %v2069_v3, %v1838_v33  ;;  %v1822_v60 = vpop.permute.xlu0 %1821 }
 0x142   : > { %v2086_v14 = vsel %vm2076_vm10, %v2053_v42, %v1822_v60  ;;  %3054 = vmatprep.mubr.msk.bf16.mxu1 %vm2129_vm11, %v2102_v47 }
 0x143   : > { %3038 = vmatprep.mubr.msk.bf16.mxu0 %vm2129_vm11, %v2086_v14 }
 0x144   : > { %v689_v11 = vpop.permute.xlu1 %688 }
 0x145   : > { %v673_v31 = vpop.permute.xlu0 %672  ;;  %v1875_v13 = vsel %vm1845_vm3, %v3998_v49, %v689_v11 }
 0x146   : > { %v1859_v39 = vsel %vm1845_vm3, %v4013_v12, %v673_v31 }
 0x148   : > { %v1840_v29 = vpop.permute.xlu1 %1839 }
 0x149   : > { %v2104_v1 = vsel %vm2076_vm10, %v2071_v23, %v1840_v29  ;;  %v1824_v45 = vpop.permute.xlu0 %1823 }
 0x14a   : > { %v2088_v7 = vsel %vm2076_vm10, %v2055_v4, %v1824_v45  ;;  %3055 = vmatmul.mubr.msk.bf16.gmra.mxu1 %vm2129_vm11, %v2104_v1 }
 0x14b   : > { %3039 = vmatmul.mubr.msk.bf16.gmra.mxu0 %vm2129_vm11, %v2088_v7 }
 0x14c   : > { %v691_v37 = vpop.permute.xlu1 %690 }
 0x14d   : > { %v675_v18 = vpop.permute.xlu0 %674  ;;  %v1877_v33 = vsel %vm1845_vm3, %v4079_v44, %v691_v37 }
 0x14e   : > { %v1861_v12 = vsel %vm1845_vm3, %v4086_v40, %v675_v18 }
 0x150   : > { %v818_v21 = vpop.permute.xlu1 %817 }
 0x151   : > { %v802_v27 = vpop.permute.xlu0 %801  ;;  %v1908_v59 = vsel %vm1878_vm4, %v1875_v13, %v818_v21 }
 0x152   : > { %v1892_v41 = vsel %vm1878_vm4, %v1859_v39, %v802_v27 }
 0x154   : > { %v820_v24 = vpop.permute.xlu1 %819 }
 0x155   : > { %v804_v6 = vpop.permute.xlu0 %803  ;;  %v1910_v47 = vsel %vm1878_vm4, %v1877_v33, %v820_v24 }
 0x156   : > { %v1894_v10 = vsel %vm1878_vm4, %v1861_v12, %v804_v6 }
 0x158   : > { %v930_v48 = vpop.permute.xlu1 %929 }
 0x159   : > { %v914_v52 = vpop.permute.xlu0 %913  ;;  %v1941_v62 = vsel %vm1911_vm5, %v1908_v59, %v930_v48 }
 0x15a   : > { %v1925_v20 = vsel %vm1911_vm5, %v1892_v41, %v914_v52 }
 0x15c   : > { %v932_v8 = vpop.permute.xlu1 %931 }
 0x15d   : > { %v916_v55 = vpop.permute.xlu0 %915  ;;  %v1943_v14 = vsel %vm1911_vm5, %v1910_v47, %v932_v8 }
 0x15e   : > { %v1927_v16 = vsel %vm1911_vm5, %v1894_v10, %v916_v55 }
 0x160   : > { %v1202_v5 = vpop.permute.xlu1 %1201 }
 0x161   : > { %v1186_v0 = vpop.permute.xlu0 %1185  ;;  %v1974_v61 = vsel %vm1944_vm6, %v1941_v62, %v1202_v5 }
 0x162   : > { %v1958_v49 = vsel %vm1944_vm6, %v1925_v20, %v1186_v0 }
 0x164   : > { %v1204_v15 = vpop.permute.xlu1 %1203 }
 0x165   : > { %v1188_v25 = vpop.permute.xlu0 %1187  ;;  %v1976_v36 = vsel %vm1944_vm6, %v1943_v14, %v1204_v15 }
 0x166   : > { %v1960_v58 = vsel %vm1944_vm6, %v1927_v16, %v1188_v25 }
 0x168   : > { %v1330_v30 = vpop.permute.xlu1 %1329 }
 0x169   : > { %v1314_v26 = vpop.permute.xlu0 %1313  ;;  %v2007_v42 = vsel %vm1977_vm7, %v1974_v61, %v1330_v30 }
 0x16a   : > { %v1991_v60 = vsel %vm1977_vm7, %v1958_v49, %v1314_v26 }
 0x16c   : > { %v1332_v38 = vpop.permute.xlu1 %1331 }
 0x16d   : > { %v1316_v56 = vpop.permute.xlu0 %1315  ;;  %v2009_v28 = vsel %vm1977_vm7, %v1976_v36, %v1332_v38 }
 0x16e   : > { %v1993_v35 = vsel %vm1977_vm7, %v1960_v58, %v1316_v56 }
 0x170   : > { %v1442_v50 = vpop.permute.xlu1 %1441 }
 0x171   : > { %v1426_v32 = vpop.permute.xlu0 %1425  ;;  %v2040_v2 = vsel %vm2010_vm8, %v2007_v42, %v1442_v50 }
 0x172   : > { %v2024_v43 = vsel %vm2010_vm8, %v1991_v60, %v1426_v32 }
 0x174   : > { %v1444_v19 = vpop.permute.xlu1 %1443 }
 0x175   : > { %v1428_v34 = vpop.permute.xlu0 %1427  ;;  %v2042_v22 = vsel %vm2010_vm8, %v2009_v28, %v1444_v19 }
 0x176   : > { %v2026_v63 = vsel %vm2010_vm8, %v1993_v35, %v1428_v34 }
 0x178   : > { %v1714_v53 = vpop.permute.xlu1 %1713 }
 0x179   : > { %v1698_v9 = vpop.permute.xlu0 %1697  ;;  %v2073_v44 = vsel %vm2043_vm9, %v2040_v2, %v1714_v53 }
 0x17a   : > { %v2057_v40 = vsel %vm2043_vm9, %v2024_v43, %v1698_v9 }
 0x17c   : > { %v1716_v57 = vpop.permute.xlu1 %1715 }
 0x17d   : > { %v1700_v3 = vpop.permute.xlu0 %1699  ;;  %v2075_v17 = vsel %vm2043_vm9, %v2042_v22, %v1716_v57 }
 0x17e   : > { %v2059_v23 = vsel %vm2043_vm9, %v2026_v63, %v1700_v3 }
 0x180   : > { %v1842_v51 = vpop.permute.xlu1 %1841 }
 0x181   : > { %v2106_v54 = vsel %vm2076_vm10, %v2073_v44, %v1842_v51  ;;  %v1826_v11 = vpop.permute.xlu0 %1825 }
 0x182   : > { %v2090_v31 = vsel %vm2076_vm10, %v2057_v40, %v1826_v11  ;;  %3058 = vmatprep.mubr.msk.bf16.mxu1 %vm2129_vm11, %v2106_v54 }
 0x183   : > { %3042 = vmatprep.mubr.msk.bf16.mxu0 %vm2129_vm11, %v2090_v31 }
 0x184   : > { %v1844_v46 = vpop.permute.xlu1 %1843 }
 0x185   : > { %v2108_v29 = vsel %vm2076_vm10, %v2075_v17, %v1844_v46  ;;  %v1828_v4 = vpop.permute.xlu0 %1827 }
 0x186   : > { %v2092_v1 = vsel %vm2076_vm10, %v2059_v23, %v1828_v4  ;;  %3059 = vmatmul.mubr.msk.bf16.gmra.mxu1 %vm2129_vm11, %v2108_v29 }
 0x187   : > { %3043 = vmatmul.mubr.msk.bf16.gmra.mxu0 %vm2129_vm11, %v2092_v1 }
 0x18a   : > { %v3048_v45 = vpop.f32.mrf.mxu1 }
 0x18b   : > { %v3032_v7 = vpop.f32.mrf.mxu0  ;;  %vm2345_vm12 = vcmp.gt.f32.partialorder %v3048_v45, 0.0  ;;  %v2377_v37 = vmul.f32 0.1, %v3048_v45 }
 0x18c   : > { %vm2329_vm13 = vcmp.gt.f32.partialorder %v3032_v7, 0.0  ;;  %v2361_v18 = vmul.f32 0.1, %v3032_v7  ;;  %v2264_v21 = vpop.f32.mrf.mxu1 }
 0x18d   : > { %v2409_v27 = vsel %vm2345_vm12, %v3048_v45, %v2377_v37  ;;  %v2200_v24 = vpop.f32.mrf.mxu0  ;;  %vm2343_vm15 = vcmp.gt.f32.partialorder %v2264_v21, 0.0  ;;  %v2375_v6 = vmul.f32 0.1, %v2264_v21 }
 0x18e   : > { %v2393_v48 = vsel %vm2329_vm13, %v3032_v7, %v2361_v18  ;;  %v2991_v52 = vpack.c.bf16 %v2409_v27, %v2409_v27  ;;  %vm2327_vm0 = vcmp.gt.f32.partialorder %v2200_v24, 0.0  ;;  %v2359_v8 = vmul.f32 0.1, %v2200_v24  ;;  %v3049_v55 = vpop.f32.mrf.mxu1 }
 0x18f   : > { %v2975_v5 = vpack.c.bf16 %v2393_v48, %v2393_v48  ;;  %v2407_v0 = vsel %vm2343_vm15, %v2264_v21, %v2375_v6  ;;  %v3033_v15 = vpop.f32.mrf.mxu0  ;;  %vm2346_vm1 = vcmp.gt.f32.partialorder %v3049_v55, 0.0  ;;  %v2378_v25 = vmul.f32 0.1, %v3049_v55 }
 0x190   : > { %2570 = vst.msk [vmem:[%s4499_s4 + $0x48] sm:$0xf] %vm2551_vm14, %v2991_v52  ;;  %v2391_v30 = vsel %vm2327_vm0, %v2200_v24, %v2359_v8  ;;  %v2989_v26 = vpack.c.bf16 %v2407_v0, %v2407_v0  ;;  %vm2330_vm2 = vcmp.gt.f32.partialorder %v3033_v15, 0.0  ;;  %v2362_v38 = vmul.f32 0.1, %v3033_v15  ;;  %v2267_v56 = vpop.f32.mrf.mxu1 }
 0x191   : > { %2554 = vst.msk [vmem:[%s4499_s4 + $0x8] sm:$0xf] %vm2551_vm14, %v2975_v5  ;;  %v2973_v50 = vpack.c.bf16 %v2391_v30, %v2391_v30  ;;  %v2410_v32 = vsel %vm2346_vm1, %v3049_v55, %v2378_v25  ;;  %v2203_v19 = vpop.f32.mrf.mxu0  ;;  %vm2344_vm3 = vcmp.gt.f32.partialorder %v2267_v56, 0.0  ;;  %v2376_v34 = vmul.f32 0.1, %v2267_v56 }
 0x192   : > { %2568 = vst.msk [vmem:[%s4499_s4 + $0x40] sm:$0xf] %vm2551_vm14, %v2989_v26  ;;  %v2394_v53 = vsel %vm2330_vm2, %v3033_v15, %v2362_v38  ;;  %v2992_v9 = vpack.c.bf16 %v2410_v32, %v2410_v32  ;;  %vm2328_vm4 = vcmp.gt.f32.partialorder %v2203_v19, 0.0  ;;  %v2360_v13 = vmul.f32 0.1, %v2203_v19 }
 0x193   : > { %2552 = vst.msk [vmem:[%s4499_s4] sm:$0xf] %vm2551_vm14, %v2973_v50  ;;  %v2976_v39 = vpack.c.bf16 %v2394_v53, %v2394_v53  ;;  %v2408_v59 = vsel %vm2344_vm3, %v2267_v56, %v2376_v34 }
 0x194   : > { %2571 = vst.msk [vmem:[%s4499_s4 + $0x4c] sm:$0xf] %vm2551_vm14, %v2992_v9  ;;  %v2392_v41 = vsel %vm2328_vm4, %v2203_v19, %v2360_v13  ;;  %v2990_v62 = vpack.c.bf16 %v2408_v59, %v2408_v59 }
 0x195   : > { %2555 = vst.msk [vmem:[%s4499_s4 + $0xc] sm:$0xf] %vm2551_vm14, %v2976_v39  ;;  %v2974_v57 = vpack.c.bf16 %v2392_v41, %v2392_v41 }
 0x196   : > { %2569 = vst.msk [vmem:[%s4499_s4 + $0x44] sm:$0xf] %vm2551_vm14, %v2990_v62 }
 0x197   : > { %2553 = vst.msk [vmem:[%s4499_s4 + $0x4] sm:$0xf] %vm2551_vm14, %v2974_v57 }
 0x1ca   : > { %v3052_v20 = vpop.f32.mrf.mxu1 }
 0x1cb   : > { %v3036_v61 = vpop.f32.mrf.mxu0  ;;  %vm2349_vm5 = vcmp.gt.f32.partialorder %v3052_v20, 0.0  ;;  %v2381_v3 = vmul.f32 0.1, %v3052_v20 }
 0x1cc   : > { %vm2333_vm6 = vcmp.gt.f32.partialorder %v3036_v61, 0.0  ;;  %v2365_v33 = vmul.f32 0.1, %v3036_v61  ;;  %v2280_v49 = vpop.f32.mrf.mxu1 }
 0x1cd   : > { %v2413_v42 = vsel %vm2349_vm5, %v3052_v20, %v2381_v3  ;;  %v2216_v12 = vpop.f32.mrf.mxu0  ;;  %vm2347_vm7 = vcmp.gt.f32.partialorder %v2280_v49, 0.0  ;;  %v2379_v47 = vmul.f32 0.1, %v2280_v49 }
 0x1ce   : > { %v2397_v60 = vsel %vm2333_vm6, %v3036_v61, %v2365_v33  ;;  %v2995_v2 = vpack.c.bf16 %v2413_v42, %v2413_v42  ;;  %vm2331_vm8 = vcmp.gt.f32.partialorder %v2216_v12, 0.0  ;;  %v2363_v10 = vmul.f32 0.1, %v2216_v12  ;;  %v3053_v14 = vpop.f32.mrf.mxu1 }
 0x1cf   : > { %v2979_v43 = vpack.c.bf16 %v2397_v60, %v2397_v60  ;;  %v2411_v44 = vsel %vm2347_vm7, %v2280_v49, %v2379_v47  ;;  %v3037_v51 = vpop.f32.mrf.mxu0  ;;  %vm2350_vm9 = vcmp.gt.f32.partialorder %v3053_v14, 0.0  ;;  %v2382_v16 = vmul.f32 0.1, %v3053_v14 }
 0x1d0   : > { %2574 = vst.msk [vmem:[%s4499_s4 + $0x58] sm:$0xf] %vm2551_vm14, %v2995_v2  ;;  %v2395_v36 = vsel %vm2331_vm8, %v2216_v12, %v2363_v10  ;;  %v2993_v40 = vpack.c.bf16 %v2411_v44, %v2411_v44  ;;  %vm2334_vm10 = vcmp.gt.f32.partialorder %v3037_v51, 0.0  ;;  %v2366_v54 = vmul.f32 0.1, %v3037_v51  ;;  %v2283_v11 = vpop.f32.mrf.mxu1 }
 0x1d1   : > { %2558 = vst.msk [vmem:[%s4499_s4 + $0x18] sm:$0xf] %vm2551_vm14, %v2979_v43  ;;  %v2977_v58 = vpack.c.bf16 %v2395_v36, %v2395_v36  ;;  %v2414_v28 = vsel %vm2350_vm9, %v3053_v14, %v2382_v16  ;;  %v2219_v31 = vpop.f32.mrf.mxu0  ;;  %vm2348_vm11 = vcmp.gt.f32.partialorder %v2283_v11, 0.0  ;;  %v2380_v35 = vmul.f32 0.1, %v2283_v11 }
 0x1d2   : > { %2572 = vst.msk [vmem:[%s4499_s4 + $0x50] sm:$0xf] %vm2551_vm14, %v2993_v40  ;;  %v2398_v22 = vsel %vm2334_vm10, %v3037_v51, %v2366_v54  ;;  %v2996_v63 = vpack.c.bf16 %v2414_v28, %v2414_v28  ;;  %vm2332_vm12 = vcmp.gt.f32.partialorder %v2219_v31, 0.0  ;;  %v2364_v17 = vmul.f32 0.1, %v2219_v31 }
 0x1d3   : > { %2556 = vst.msk [vmem:[%s4499_s4 + $0x10] sm:$0xf] %vm2551_vm14, %v2977_v58  ;;  %v2980_v46 = vpack.c.bf16 %v2398_v22, %v2398_v22  ;;  %v2412_v23 = vsel %vm2348_vm11, %v2283_v11, %v2380_v35 }
 0x1d4   : > { %2575 = vst.msk [vmem:[%s4499_s4 + $0x5c] sm:$0xf] %vm2551_vm14, %v2996_v63  ;;  %v2396_v29 = vsel %vm2332_vm12, %v2219_v31, %v2364_v17  ;;  %v2994_v4 = vpack.c.bf16 %v2412_v23, %v2412_v23 }
 0x1d5   : > { %2559 = vst.msk [vmem:[%s4499_s4 + $0x1c] sm:$0xf] %vm2551_vm14, %v2980_v46  ;;  %v2978_v1 = vpack.c.bf16 %v2396_v29, %v2396_v29 }
 0x1d6   : > { %2573 = vst.msk [vmem:[%s4499_s4 + $0x54] sm:$0xf] %vm2551_vm14, %v2994_v4 }
 0x1d7   : > { %2557 = vst.msk [vmem:[%s4499_s4 + $0x14] sm:$0xf] %vm2551_vm14, %v2978_v1 }
 0x20a   : > { %v3056_v45 = vpop.f32.mrf.mxu1 }
 0x20b   : > { %v3040_v7 = vpop.f32.mrf.mxu0  ;;  %vm2353_vm13 = vcmp.gt.f32.partialorder %v3056_v45, 0.0  ;;  %v2385_v37 = vmul.f32 0.1, %v3056_v45 }
 0x20c   : > { %vm2337_vm15 = vcmp.gt.f32.partialorder %v3040_v7, 0.0  ;;  %v2369_v18 = vmul.f32 0.1, %v3040_v7  ;;  %v2296_v21 = vpop.f32.mrf.mxu1 }
 0x20d   : > { %v2417_v27 = vsel %vm2353_vm13, %v3056_v45, %v2385_v37  ;;  %v2232_v24 = vpop.f32.mrf.mxu0  ;;  %vm2351_vm0 = vcmp.gt.f32.partialorder %v2296_v21, 0.0  ;;  %v2383_v6 = vmul.f32 0.1, %v2296_v21 }
 0x20e   : > { %v2401_v48 = vsel %vm2337_vm15, %v3040_v7, %v2369_v18  ;;  %v2999_v52 = vpack.c.bf16 %v2417_v27, %v2417_v27  ;;  %vm2335_vm1 = vcmp.gt.f32.partialorder %v2232_v24, 0.0  ;;  %v2367_v8 = vmul.f32 0.1, %v2232_v24  ;;  %v3057_v55 = vpop.f32.mrf.mxu1 }
 0x20f   : > { %v2983_v5 = vpack.c.bf16 %v2401_v48, %v2401_v48  ;;  %v2415_v0 = vsel %vm2351_vm0, %v2296_v21, %v2383_v6  ;;  %v3041_v15 = vpop.f32.mrf.mxu0  ;;  %vm2354_vm2 = vcmp.gt.f32.partialorder %v3057_v55, 0.0  ;;  %v2386_v25 = vmul.f32 0.1, %v3057_v55 }
 0x210   : > { %2578 = vst.msk [vmem:[%s4499_s4 + $0x68] sm:$0xf] %vm2551_vm14, %v2999_v52  ;;  %v2399_v30 = vsel %vm2335_vm1, %v2232_v24, %v2367_v8  ;;  %v2997_v26 = vpack.c.bf16 %v2415_v0, %v2415_v0  ;;  %vm2338_vm3 = vcmp.gt.f32.partialorder %v3041_v15, 0.0  ;;  %v2370_v38 = vmul.f32 0.1, %v3041_v15  ;;  %v2299_v56 = vpop.f32.mrf.mxu1 }
 0x211   : > { %2562 = vst.msk [vmem:[%s4499_s4 + $0x28] sm:$0xf] %vm2551_vm14, %v2983_v5  ;;  %v2981_v50 = vpack.c.bf16 %v2399_v30, %v2399_v30  ;;  %v2418_v32 = vsel %vm2354_vm2, %v3057_v55, %v2386_v25  ;;  %v2235_v19 = vpop.f32.mrf.mxu0  ;;  %vm2352_vm4 = vcmp.gt.f32.partialorder %v2299_v56, 0.0  ;;  %v2384_v34 = vmul.f32 0.1, %v2299_v56 }
 0x212   : > { %2576 = vst.msk [vmem:[%s4499_s4 + $0x60] sm:$0xf] %vm2551_vm14, %v2997_v26  ;;  %v2402_v53 = vsel %vm2338_vm3, %v3041_v15, %v2370_v38  ;;  %v3000_v9 = vpack.c.bf16 %v2418_v32, %v2418_v32  ;;  %vm2336_vm5 = vcmp.gt.f32.partialorder %v2235_v19, 0.0  ;;  %v2368_v13 = vmul.f32 0.1, %v2235_v19 }
 0x213   : > { %2560 = vst.msk [vmem:[%s4499_s4 + $0x20] sm:$0xf] %vm2551_vm14, %v2981_v50  ;;  %v2984_v39 = vpack.c.bf16 %v2402_v53, %v2402_v53  ;;  %v2416_v59 = vsel %vm2352_vm4, %v2299_v56, %v2384_v34 }
 0x214   : > { %2579 = vst.msk [vmem:[%s4499_s4 + $0x6c] sm:$0xf] %vm2551_vm14, %v3000_v9  ;;  %v2400_v41 = vsel %vm2336_vm5, %v2235_v19, %v2368_v13  ;;  %v2998_v62 = vpack.c.bf16 %v2416_v59, %v2416_v59 }
 0x215   : > { %2563 = vst.msk [vmem:[%s4499_s4 + $0x2c] sm:$0xf] %vm2551_vm14, %v2984_v39  ;;  %v2982_v57 = vpack.c.bf16 %v2400_v41, %v2400_v41 }
 0x216   : > { %2577 = vst.msk [vmem:[%s4499_s4 + $0x64] sm:$0xf] %vm2551_vm14, %v2998_v62 }
 0x217   : > { %2561 = vst.msk [vmem:[%s4499_s4 + $0x24] sm:$0xf] %vm2551_vm14, %v2982_v57 }
 0x246   : > { %v3060_v20 = vpop.f32.mrf.mxu1 }
 0x247   : > { %v3044_v61 = vpop.f32.mrf.mxu0  ;;  %vm2357_vm6 = vcmp.gt.f32.partialorder %v3060_v20, 0.0  ;;  %v2389_v3 = vmul.f32 0.1, %v3060_v20 }
 0x248   : > { %vm2341_vm7 = vcmp.gt.f32.partialorder %v3044_v61, 0.0  ;;  %v2373_v33 = vmul.f32 0.1, %v3044_v61  ;;  %v2312_v49 = vpop.f32.mrf.mxu1 }
 0x249   : > { %v2421_v42 = vsel %vm2357_vm6, %v3060_v20, %v2389_v3  ;;  %v2248_v12 = vpop.f32.mrf.mxu0  ;;  %vm2355_vm8 = vcmp.gt.f32.partialorder %v2312_v49, 0.0  ;;  %v2387_v47 = vmul.f32 0.1, %v2312_v49 }
 0x24a   : > { %v2405_v60 = vsel %vm2341_vm7, %v3044_v61, %v2373_v33  ;;  %v3003_v2 = vpack.c.bf16 %v2421_v42, %v2421_v42  ;;  %vm2339_vm9 = vcmp.gt.f32.partialorder %v2248_v12, 0.0  ;;  %v2371_v10 = vmul.f32 0.1, %v2248_v12  ;;  %v3061_v14 = vpop.f32.mrf.mxu1 }
 0x24b   : > { %v2987_v43 = vpack.c.bf16 %v2405_v60, %v2405_v60  ;;  %v2419_v44 = vsel %vm2355_vm8, %v2312_v49, %v2387_v47  ;;  %v3045_v51 = vpop.f32.mrf.mxu0  ;;  %vm2358_vm10 = vcmp.gt.f32.partialorder %v3061_v14, 0.0  ;;  %v2390_v16 = vmul.f32 0.1, %v3061_v14 }
 0x24c   : > { %2582 = vst.msk [vmem:[%s4499_s4 + $0x78] sm:$0xf] %vm2551_vm14, %v3003_v2  ;;  %v2403_v36 = vsel %vm2339_vm9, %v2248_v12, %v2371_v10  ;;  %v3001_v40 = vpack.c.bf16 %v2419_v44, %v2419_v44  ;;  %vm2342_vm11 = vcmp.gt.f32.partialorder %v3045_v51, 0.0  ;;  %v2374_v54 = vmul.f32 0.1, %v3045_v51  ;;  %v2315_v11 = vpop.f32.mrf.mxu1 }
 0x24d   : > { %2566 = vst.msk [vmem:[%s4499_s4 + $0x38] sm:$0xf] %vm2551_vm14, %v2987_v43  ;;  %v2985_v58 = vpack.c.bf16 %v2403_v36, %v2403_v36  ;;  %v2422_v28 = vsel %vm2358_vm10, %v3061_v14, %v2390_v16  ;;  %v2251_v31 = vpop.f32.mrf.mxu0  ;;  %vm2356_vm12 = vcmp.gt.f32.partialorder %v2315_v11, 0.0  ;;  %v2388_v35 = vmul.f32 0.1, %v2315_v11 }
 0x24e   : > { %2580 = vst.msk [vmem:[%s4499_s4 + $0x70] sm:$0xf] %vm2551_vm14, %v3001_v40  ;;  %v2406_v22 = vsel %vm2342_vm11, %v3045_v51, %v2374_v54  ;;  %v3004_v63 = vpack.c.bf16 %v2422_v28, %v2422_v28  ;;  %vm2340_vm13 = vcmp.gt.f32.partialorder %v2251_v31, 0.0  ;;  %v2372_v17 = vmul.f32 0.1, %v2251_v31 }
 0x24f   : > { %2564 = vst.msk [vmem:[%s4499_s4 + $0x30] sm:$0xf] %vm2551_vm14, %v2985_v58  ;;  %v2988_v46 = vpack.c.bf16 %v2406_v22, %v2406_v22  ;;  %v2420_v23 = vsel %vm2356_vm12, %v2315_v11, %v2388_v35 }
 0x250   : > { %2583 = vst.msk [vmem:[%s4499_s4 + $0x7c] sm:$0xf] %vm2551_vm14, %v3004_v63  ;;  %v2404_v29 = vsel %vm2340_vm13, %v2251_v31, %v2372_v17  ;;  %v3002_v4 = vpack.c.bf16 %v2420_v23, %v2420_v23 }
 0x251   : > { %2567 = vst.msk [vmem:[%s4499_s4 + $0x3c] sm:$0xf] %vm2551_vm14, %v2988_v46  ;;  %v2986_v1 = vpack.c.bf16 %v2404_v29, %v2404_v29 }
 0x252   : > { %2581 = vst.msk [vmem:[%s4499_s4 + $0x74] sm:$0xf] %vm2551_vm14, %v3002_v4 }
 0x253   : > { %2565 = vst.msk [vmem:[%s4499_s4 + $0x34] sm:$0xf] %vm2551_vm14, %v2986_v1 }
 0x254 PF: > { %s12_s9 = sadd.s32 1, %s3240_s9  }
 0x255   : > { %p9_p4 = scmp.ge.s32.totalorder %s12_s9, 4  }
 0x257   :  { %11 = sbr.rel (!%p9_p4) target bundleno = 1 (0x1), region = 60 }

// kernel: vgg_block_forward.3
= control target key start
LH: loop header
LB: loop body
LE: loop exit
PB: predicated region body
PF: predicated region fallthrough
CT: control target
= control target key end

     0   :  { %s3295_s9 = smov 0   ;;  %s4622_s0 = inlined_call_operand.vmem [shape: bf16[2,18,18,8], index: 0, kind: input, shape index: {}]   ;;  %s4623_s1 = inlined_call_operand.vmem [shape: bf16[72,8], index: 1, kind: input, shape index: {}]   ;;  %s4624_s2 = inlined_call_operand.vmem [shape: bf16[2,16,16,8], index: 2, kind: output, shape index: {}]  }
   0x1 LB: > { %s2655_s10 = sadd.s32 4294967295, %s3270_s9   ;;  %p2659_p0 = scmp.ge.s32.totalorder %s3270_s9, 1  ;;  %s3270_s9 = sphi %s3295_s9, %s12_s9  }
   0x2   : > { %p112_p1 = scmp.lt.s32.totalorder %s3270_s9, 3 }
   0x4   : > { %p113_p2 = pnand %p2659_p0, %p112_p1 }
   0x6   : > { %116 = sbr.rel (%p113_p2) target bundleno = 596 (0x254), region = 28 }
   0xb   : > { %p134_p3 = scmp.lt.s32.totalorder %s2655_s10, 1  ;;  %s3272_s15 = smov 24   ;;  %vm740_vm0 = vcmask 1046528   ;;  %vm467_vm1 = vsmask.f32 7424  ;;  %vm2178_vm2 = vcmask 1043456  }
   0xc   : > { %s3273_s16 = smov 16   ;;  %s3274_s17 = smov 8   ;;  %vm1845_vm3 = vcmask 64512   ;;  %vm1878_vm4 = vcmask 130048   ;;  %vm1911_vm5 = vcmask 195584   ;;  %vm1944_vm6 = vcmask 261120  }
   0xd   : > { %s4644_s10 = smov (!%p134_p3, %s2655_s10), 1  ;;  %s3275_s18 = smov 32   ;;  %vm1977_vm7 = vcmask 326656   ;;  %vm2010_vm8 = vcmask 392192   ;;  %vm2043_vm9 = vcmask 457728   ;;  %vm2076_vm10 = vcmask 523264  }
   0xe   : > { %s3098_s11 = smul.u32 216, %s4644_s10  ;;  %s3276_s19 = smov 40   ;;  %vm2145_vm11 = vcmask 588800   ;;  %vm2567_vm14 = vcmask 60416  }
   0xf   : > { %s3277_s20 = smov 48   ;;  %s3278_s21 = smov 56  }
  0x10   : > { %s3309_s14 = scalar_lea.vmem %s4622_s0, %s3098_s11  ;;  %s3279_s22 = smov 64  }
  0x11   : > { %v2679_v0 = vld [vmem:[%s3309_s14 + $0x6c] sm:$0xf]  ;;  %v3313_v1 = vld [vmem:[%s3309_s14 + $0x70] sm:$0xf]  ;;  %v162_v6 = vld [vmem:[%s3309_s14 + $0x64] sm:$0xf] }
  0x12   : > { %v3316_v2 = vcombine.low %v2679_v0, %v3313_v1  ;;  %v2663_v3 = vld [vmem:[%s3309_s14 + $0xc] sm:$0xf]  ;;  %v3320_v4 = vld [vmem:[%s3309_s14 + $0x10] sm:$0xf]  ;;  %v201_v7 = vld [vmem:[%s3309_s14 + $0x60] sm:$0xe] }
  0x13   : > { %v3323_v5 = vcombine.low %v2663_v3, %v3320_v4  ;;  %v3330_v8 = vld [vmem:[%s3309_s14 + $0x68] ss:$0 sps:$4 sm:$0x11]   ;;  %v2831_v9 = vcombine.low %v201_v7, %v162_v6  ;;  %v161_v10 = vld [vmem:[%s3309_s14 + $0x60] sm:$0xf]  ;;  %s2990_s5 = sshll.u32 %s4644_s10, 7 }
  0x14   : > { %917 = vrot.lane.b32.xlu1 %v3316_v2, %s3272_s15  ;;  %v1080_v11 = vshll.u32 %v3316_v2, 16  ;;  %v146_v12 = vld [vmem:[%s3309_s14 + $0x4] sm:$0xf]  ;;  %v766_v14 = vrot.slane %v3330_v8, 1  ;;  %v193_v15 = vld [vmem:[%s3309_s14] sm:$0xe]  ;;  %v3341_v18 = vcombine.low %v161_v10, %v162_v6  ;;  %s4553_s8 = scalar_lea.vmem %s4624_s2, %s2990_s5 }
  0x15   : > { %901 = vrot.lane.b32.xlu0 %v3323_v5, %s3272_s15  ;;  %v765_v13 = vrot.slane %v2831_v9, 1  ;;  %v145_v16 = vld [vmem:[%s3309_s14] sm:$0xf]  ;;  %v984_v17 = vshll.u32 %v3323_v5, 16  ;;  %v2823_v20 = vcombine.low %v193_v15, %v146_v12  ;;  %v163_v21 = vld [vmem:[%s3309_s14 + $0x6c] sm:$0xf] }
  0x16   : > { %v3122_v19 = vld [vmem:[%s3309_s14 + $0x8] ss:$0 sps:$4 sm:$0x11]   ;;  %v3346_v23 = vcombine.low %v145_v16, %v146_v12  ;;  %v164_v24 = vld [vmem:[%s3309_s14 + $0x70] sm:$0xf]  ;;  %v565_v30 = vshrl.u32 %v3341_v18, 16 }
  0x17   : > { %v767_v22 = vsel %vm740_vm0, %v765_v13, %v766_v14  ;;  %v202_v25 = vld [vmem:[%s3309_s14 + $0x6c] sm:$0xe]  ;;  %v741_v26 = vrot.slane %v2823_v20, 1  ;;  %v742_v27 = vrot.slane %v3122_v19, 1  ;;  %v3353_v31 = vcombine.low %v163_v21, %v164_v24  ;;  %v148_v33 = vld [vmem:[%s3309_s14 + $0x10] sm:$0xf] }
  0x18   : > { %805 = vrot.lane.b32.xlu1 %v767_v22, %s3273_s16  ;;  %v3126_v28 = vld [vmem:[%s3309_s14 + $0x74] ss:$0 sps:$4 sm:$0x11]   ;;  %v2832_v29 = vcombine.low %v202_v25, %v164_v24  ;;  %v147_v32 = vld [vmem:[%s3309_s14 + $0xc] sm:$0xf]  ;;  %v469_v41 = vshrl.u32 %v3346_v23, 16 }
  0x19   : > { %v743_v34 = vsel %vm740_vm0, %v741_v26, %v742_v27  ;;  %v769_v36 = vrot.slane %v3126_v28, 1  ;;  %v194_v37 = vld [vmem:[%s3309_s14 + $0xc] sm:$0xe]  ;;  %v3359_v38 = vcombine.low %v147_v32, %v148_v33  ;;  %v3129_v39 = vld [vmem:[%s3309_s14 + $0x14] ss:$0 sps:$4 sm:$0x11]  }
  0x1a   : > { %v768_v35 = vrot.slane %v2832_v29, 1  ;;  %789 = vrot.lane.b32.xlu0 %v743_v34, %s3273_s16  ;;  %v2824_v40 = vcombine.low %v194_v37, %v148_v33  ;;  %v471_v42 = vshll.u32 %v3346_v23, 16  ;;  %v476_v43 = vshll.u32 %v3122_v19, 16  ;;  %v2681_v52 = vld [vmem:[%s3309_s14 + $0x78] sm:$0xf] }
  0x1b   : > { %v481_v45 = vshrl.u32 %v3359_v38, 16  ;;  %v483_v46 = vshll.u32 %v3359_v38, 16  ;;  %v577_v47 = vshrl.u32 %v3353_v31, 16  ;;  %v745_v49 = vrot.slane %v3129_v39, 1  ;;  %v3373_v57 = vld [vmem:[%s3309_s14 + $0x7c] sm:$0xf] }
  0x1c   : > { %v770_v44 = vsel %vm740_vm0, %v768_v35, %v769_v36  ;;  %v744_v48 = vrot.slane %v2824_v40, 1  ;;  %v488_v50 = vshll.u32 %v3129_v39, 16  ;;  %v473_v51 = vrot.slane %v471_v42, 1  ;;  %v2665_v62 = vld [vmem:[%s3309_s14 + $0x18] sm:$0xf] }
  0x1d   : > { %807 = vrot.lane.b32.xlu1 %v770_v44, %s3273_s16  ;;  %v485_v53 = vrot.slane %v483_v46, 1  ;;  %v478_v54 = vrot.slane %v476_v43, 1  ;;  %v579_v55 = vshll.u32 %v3353_v31, 16  ;;  %v584_v56 = vshll.u32 %v3126_v28, 16  ;;  %v3379_v63 = vld [vmem:[%s3309_s14 + $0x1c] sm:$0xf] }
  0x1e   : > { %v746_v58 = vsel %vm740_vm0, %v744_v48, %v745_v49  ;;  %v490_v59 = vrot.slane %v488_v50, 1  ;;  %v474_v60 = vor.u32 %v473_v51, %v469_v41  ;;  %v567_v61 = vshll.u32 %v3341_v18, 16  ;;  %v3386_v13 = vld [vmem:[%s3309_s14 + $0x74] ss:$0 sps:$4 sm:$0x11]  }
  0x1f   : > { %791 = vrot.lane.b32.xlu0 %v746_v58, %s3273_s16  ;;  %v486_v0 = vor.u32 %v485_v53, %v481_v45  ;;  %v581_v3 = vrot.slane %v579_v55, 1  ;;  %v586_v6 = vrot.slane %v584_v56, 1  ;;  %v572_v7 = vshll.u32 %v3330_v8, 16  ;;  %v3391_v20 = vld [vmem:[%s3309_s14 + $0x14] ss:$0 sps:$4 sm:$0x11]  }
  0x20   : > { %v479_v9 = vsel %vm467_vm1, %v474_v60, %v478_v54  ;;  %v569_v10 = vrot.slane %v567_v61, 1  ;;  %v2848_v12 = vcombine.low %v2681_v52, %v3373_v57  ;;  %v2840_v19 = vcombine.low %v2665_v62, %v3379_v63  ;;  %v3398_v24 = vld [vmem:[%s3309_s14 + $0x80] ss:$0 sps:$4 sm:$0x11]   ;;  %v2719_v35 = vld [vmem:[%s3309_s14 + $0x6c] sm:$0xe] }
  0x21   : > { %v491_v14 = vsel %vm467_vm1, %v486_v0, %v490_v59  ;;  %v582_v15 = vor.u32 %v581_v3, %v577_v47  ;;  %v574_v16 = vrot.slane %v572_v7, 1  ;;  %v1078_v21 = vshrl.u32 %v3316_v2, 16  ;;  %v2711_v43 = vld [vmem:[%s3309_s14 + $0xc] sm:$0xe]  ;;  %v2720_v45 = vld [vmem:[%s3309_s14 + $0x78] sm:$0xe] }
  0x22   : > { %662 = vrot.lane.b32.xlu1 %v491_v14, %s3274_s17  ;;  %v570_v8 = vor.u32 %v569_v10, %v565_v30  ;;  %v1082_v22 = vrot.slane %v1080_v11, 1  ;;  %v1092_v26 = vshll.u32 %v2848_v12, 16  ;;  %v1085_v27 = vshll.u32 %v3386_v13, 16  ;;  %v3409_v11 = vld [vmem:[%s3309_s14 + $0x20] ss:$0 sps:$4 sm:$0x11]  }
  0x23   : > { %660 = vrot.lane.b32.xlu0 %v479_v9, %s3274_s17  ;;  %v587_v25 = vsel %vm467_vm1, %v582_v15, %v586_v6  ;;  %v982_v28 = vshrl.u32 %v3323_v5, 16  ;;  %v996_v30 = vshll.u32 %v2840_v19, 16  ;;  %v986_v32 = vrot.slane %v984_v17, 1  ;;  %v2712_v50 = vld [vmem:[%s3309_s14 + $0x18] sm:$0xe] }
  0x24   : > { %v575_v29 = vsel %vm467_vm1, %v570_v8, %v574_v16  ;;  %v989_v2 = vshll.u32 %v3391_v20, 16  ;;  %v1083_v33 = vor.u32 %v1082_v22, %v1078_v21  ;;  %v1087_v34 = vrot.slane %v1085_v27, 1  ;;  %v2743_v55 = vld [vmem:[%s3309_s14 + $0x78] sm:$0xf]  ;;  %v3429_v56 = vld [vmem:[%s3309_s14 + $0x7c] sm:$0xf] }
  0x25   : > { %v987_v36 = vor.u32 %v986_v32, %v982_v28  ;;  %v1090_v37 = vshrl.u32 %v2848_v12, 16  ;;  %v1094_v39 = vrot.slane %v1092_v26, 1  ;;  %v1097_v5 = vshll.u32 %v3398_v24, 16  ;;  %v2727_v3 = vld [vmem:[%s3309_s14 + $0x18] sm:$0xf] }
  0x26   : > { %678 = vrot.lane.b32.xlu1 %v587_v25, %s3274_s17  ;;  %v991_v17 = vrot.slane %v989_v2, 1  ;;  %v994_v40 = vshrl.u32 %v2840_v19, 16  ;;  %v998_v41 = vrot.slane %v996_v30, 1  ;;  %v1001_v42 = vshll.u32 %v3409_v11, 16  ;;  %v3440_v6 = vld [vmem:[%s3309_s14 + $0x1c] sm:$0xf] }
  0x27   : > { %676 = vrot.lane.b32.xlu0 %v575_v29, %s3274_s17  ;;  %v2879_v44 = vcombine.low %v2719_v35, %v3313_v1  ;;  %v1088_v46 = vsel %vm467_vm1, %v1083_v33, %v1087_v34  ;;  %v1095_v47 = vor.u32 %v1094_v39, %v1090_v37  ;;  %v1099_v48 = vrot.slane %v1097_v5, 1  ;;  %v2729_v16 = vld [vmem:[%s3309_s14 + $0x24] sm:$0xf]  ;;  %v3460_v21 = vld [vmem:[%s3309_s14 + $0x80] ss:$0 sps:$4 sm:$0x11]  }
  0x28   : > { %v2871_v49 = vcombine.low %v2711_v43, %v3320_v4  ;;  %v992_v51 = vsel %vm467_vm1, %v987_v36, %v991_v17  ;;  %v999_v52 = vor.u32 %v998_v41, %v994_v40  ;;  %v1003_v53 = vrot.slane %v1001_v42, 1  ;;  %v3467_v27 = vld [vmem:[%s3309_s14 + $0x20] ss:$0 sps:$4 sm:$0x11]   ;;  %v165_v37 = vld [vmem:[%s3309_s14 + $0x78] sm:$0xf] }
  0x29   : > { %v1277_v1 = vrot.slane %v2879_v44, 1  ;;  %v1278_v54 = vrot.slane %v3386_v13, 1  ;;  %v2880_v58 = vcombine.low %v2720_v45, %v3373_v57  ;;  %v2872_v4 = vcombine.low %v2712_v50, %v3379_v63  ;;  %v2745_v63 = vld [vmem:[%s3309_s14 + $0x84] sm:$0xf]  ;;  %v3449_v13 = vld [vmem:[%s3309_s14 + $0x88] sm:$0xf] }
  0x2a   : > { %919 = vrot.lane.b32.xlu1 %v2848_v12, %s3272_s15  ;;  %v1100_v59 = vsel %vm467_vm1, %v1095_v47, %v1099_v48  ;;  %v1004_v60 = vsel %vm467_vm1, %v999_v52, %v1003_v53  ;;  %v1253_v61 = vrot.slane %v2871_v49, 1  ;;  %v1254_v62 = vrot.slane %v3391_v20, 1  ;;  %v3476_v34 = vld [vmem:[%s3309_s14 + $0x2c] ss:$0 sps:$4 sm:$0x11]  }
  0x2b   : > { %903 = vrot.lane.b32.xlu0 %v2840_v19, %s3272_s15  ;;  %v2895_v0 = vcombine.low %v2743_v55, %v3429_v56  ;;  %v1279_v57 = vsel %vm740_vm0, %v1277_v1, %v1278_v54  ;;  %v1280_v7 = vrot.slane %v2880_v58, 1  ;;  %v1281_v9 = vrot.slane %v3398_v24, 1  ;;  %v3455_v19 = vld [vmem:[%s3309_s14 + $0x28] sm:$0xf]  ;;  %v3481_v39 = vld [vmem:[%s3309_s14 + $0x7c] sm:$0xf] }
  0x2c   : > { %v1256_v10 = vrot.slane %v2872_v4, 1  ;;  %v1257_v12 = vrot.slane %v3409_v11, 1  ;;  %v1255_v14 = vsel %vm740_vm0, %v1253_v61, %v1254_v62  ;;  %v2887_v15 = vcombine.low %v2727_v3, %v3440_v6  ;;  %v3472_v11 = vld [vmem:[%s3309_s14 + $0x8c] ss:$0 sps:$4 sm:$0x11]  }
  0x2d   : > { %v1592_v20 = vshll.u32 %v2895_v0, 16  ;;  %v2896_v8 = vcombine.low %v2745_v63, %v3449_v13  ;;  %v1282_v22 = vsel %vm740_vm0, %v1280_v7, %v1281_v9  ;;  %v2888_v24 = vcombine.low %v2729_v16, %v3455_v19  ;;  %v149_v17 = vld [vmem:[%s3309_s14 + $0x18] sm:$0xf]  ;;  %v3485_v40 = vld [vmem:[%s3309_s14 + $0x1c] sm:$0xf] }
  0x2e   : > { %1189 = vrot.lane.b32.xlu1 %v1088_v46, %s3275_s18  ;;  %v1258_v25 = vsel %vm740_vm0, %v1256_v10, %v1257_v12  ;;  %v1496_v26 = vshll.u32 %v2887_v15, 16  ;;  %v1590_v28 = vshrl.u32 %v2895_v0, 16  ;;  %v1597_v32 = vshll.u32 %v3460_v21, 16  ;;  %v2783_v41 = vld [vmem:[%s3309_s14 + $0x78] sm:$0xe] }
  0x2f   : > { %1173 = vrot.lane.b32.xlu0 %v992_v51, %s3275_s18  ;;  %v1594_v29 = vrot.slane %v1592_v20, 1  ;;  %v1604_v30 = vshll.u32 %v2896_v8, 16  ;;  %v1494_v2 = vshrl.u32 %v2887_v15, 16  ;;  %v1508_v33 = vshll.u32 %v2888_v24, 16  ;;  %v2775_v46 = vld [vmem:[%s3309_s14 + $0x18] sm:$0xe] }
  0x30   : > { %v1498_v35 = vrot.slane %v1496_v26, 1  ;;  %v1501_v36 = vshll.u32 %v3467_v27, 16  ;;  %v1599_v42 = vrot.slane %v1597_v32, 1  ;;  %v1602_v43 = vshrl.u32 %v2896_v8, 16  ;;  %v151_v9 = vld [vmem:[%s3309_s14 + $0x24] sm:$0xf] }
  0x31   : > { %v1595_v5 = vor.u32 %v1594_v29, %v1590_v28  ;;  %v1606_v44 = vrot.slane %v1604_v30, 1  ;;  %v1609_v45 = vshll.u32 %v3472_v11, 16  ;;  %v1506_v47 = vshrl.u32 %v2888_v24, 16  ;;  %v3503_v4 = vld [vmem:[%s3309_s14 + $0x80] ss:$0 sps:$4 sm:$0x11]  }
  0x32   : > { %1191 = vrot.lane.b32.xlu1 %v1100_v59, %s3275_s18  ;;  %v1510_v48 = vrot.slane %v1508_v33, 1  ;;  %v1513_v49 = vshll.u32 %v3476_v34, 16  ;;  %v3494_v50 = vcombine.low %v165_v37, %v3481_v39  ;;  %v1499_v51 = vor.u32 %v1498_v35, %v1494_v2  ;;  %v3520_v10 = vld [vmem:[%s3309_s14 + $0x28] sm:$0xf]  ;;  %v2784_v12 = vld [vmem:[%s3309_s14 + $0x84] sm:$0xe] }
  0x33   : > { %1175 = vrot.lane.b32.xlu0 %v1004_v60, %s3275_s18  ;;  %v1503_v52 = vrot.slane %v1501_v36, 1  ;;  %v3497_v53 = vcombine.low %v149_v17, %v3485_v40  ;;  %v2927_v1 = vcombine.low %v2783_v41, %v3429_v56  ;;  %v2919_v54 = vcombine.low %v2775_v46, %v3440_v6  ;;  %v3509_v56 = vld [vmem:[%s3309_s14 + $0x20] ss:$0 sps:$4 sm:$0x11]   ;;  %v167_v6 = vld [vmem:[%s3309_s14 + $0x84] sm:$0xf] }
  0x34   : > { %v1607_v55 = vor.u32 %v1606_v44, %v1602_v43  ;;  %v1611_v58 = vrot.slane %v1609_v45, 1  ;;  %v1600_v59 = vsel %vm467_vm1, %v1595_v5, %v1599_v42  ;;  %v1511_v60 = vor.u32 %v1510_v48, %v1506_v47  ;;  %v3545_v36 = vld [vmem:[%s3309_s14 + $0x8c] ss:$0 sps:$4 sm:$0x11]  }
  0x35   : > { %v1515_v61 = vrot.slane %v1513_v49, 1  ;;  %v591_v62 = vshll.u32 %v3494_v50, 16  ;;  %v495_v3 = vshll.u32 %v3497_v53, 16  ;;  %v1789_v63 = vrot.slane %v2927_v1, 1 }
  0x36   : > { %1317 = vrot.lane.b32.xlu1 %v1279_v57, %s3276_s19  ;;  %v3515_v57 = vld [vmem:[%s3309_s14 + $0x88] sm:$0xf]  ;;  %v1790_v7 = vrot.slane %v3460_v21, 1  ;;  %v1766_v16 = vrot.slane %v3467_v27, 1  ;;  %v596_v20 = vshll.u32 %v3503_v4, 16  ;;  %v493_v26 = vshrl.u32 %v3497_v53, 16 }
  0x37   : > { %1301 = vrot.lane.b32.xlu0 %v1255_v14, %s3276_s19  ;;  %v1612_v14 = vsel %vm467_vm1, %v1607_v55, %v1611_v58  ;;  %v1516_v21 = vsel %vm467_vm1, %v1511_v60, %v1515_v61  ;;  %v497_v28 = vrot.slane %v495_v3, 1  ;;  %v500_v27 = vshll.u32 %v3509_v56, 16 }
  0x38   : > { %v3537_v29 = vcombine.low %v151_v9, %v3520_v10  ;;  %v2928_v30 = vcombine.low %v2784_v12, %v3449_v13  ;;  %v598_v2 = vrot.slane %v596_v20, 1  ;;  %v1791_v33 = vsel %vm740_vm0, %v1789_v63, %v1790_v7  ;;  %v3550_v13 = vld [vmem:[%s3309_s14 + $0x2c] ss:$0 sps:$4 sm:$0x11]   ;;  %v196_v63 = vld [vmem:[%s3309_s14 + $0x24] sm:$0xe] }
  0x39   : > { %v498_v17 = vor.u32 %v497_v28, %v493_v26  ;;  %v502_v41 = vrot.slane %v500_v27, 1  ;;  %v1793_v43 = vrot.slane %v3472_v11, 1  ;;  %v1769_v45 = vrot.slane %v3476_v34, 1  ;;  %v195_v34 = vld [vmem:[%s3309_s14 + $0x18] sm:$0xe] }
  0x3a   : > { %1319 = vrot.lane.b32.xlu1 %v1282_v22, %s3276_s19  ;;  %v589_v22 = vshrl.u32 %v3494_v50, 16  ;;  %4632 = vst [vmem:[#allocation3_spill] sm:$0xff] %v3537_v29  ;;  %v1792_v42 = vrot.slane %v2928_v30, 1  ;;  %v608_v49 = vshll.u32 %v3545_v36, 16  ;;  %v505_v1 = vshrl.u32 %v3537_v29, 16 }
  0x3b   : > { %1303 = vrot.lane.b32.xlu0 %v1258_v25, %s3276_s19  ;;  %v3532_v25 = vcombine.low %v167_v6, %v3515_v57  ;;  %v2825_v61 = vcombine.low %v195_v34, %v3485_v40  ;;  %v772_v7 = vrot.slane %v3503_v4, 1  ;;  %v748_v9 = vrot.slane %v3509_v56, 1  ;;  %v2667_v56 = vld [vmem:[%s3309_s14 + $0x24] sm:$0xf]  ;;  %v2685_v28 = vld [vmem:[%s3309_s14 + $0x90] sm:$0xf] }
  0x3c   : > { %v1794_v55 = vsel %vm740_vm0, %v1792_v42, %v1793_v43  ;;  %v2826_v4 = vcombine.low %v196_v63, %v3520_v10  ;;  %v3597_v10 = vld [vmem:[%s3309_s14 + $0x94] sm:$0xf] }
  0x3d   : > { %4631 = vst [vmem:[#allocation2_spill] sm:$0xff] %v3532_v25  ;;  %v603_v37 = vshll.u32 %v3532_v25, 16  ;;  %v601_v47 = vshrl.u32 %v3532_v25, 16  ;;  %v4041_v25 = vld [vmem:[%s3309_s14 + $0x4c] sm:$0xf] }
  0x3e   : > { %1429 = vrot.lane.b32.xlu1 %v2895_v0, %s3277_s20  ;;  %v1504_v0 = vsel %vm467_vm1, %v1499_v51, %v1503_v52  ;;  %v203_v51 = vld [vmem:[%s3309_s14 + $0x78] sm:$0xe]  ;;  %v503_v52 = vsel %vm467_vm1, %v498_v17, %v502_v41  ;;  %v750_v30 = vrot.slane %v2826_v4, 1  ;;  %v3611_v41 = vld [vmem:[%s3309_s14 + $0x8c] ss:$0 sps:$4 sm:$0x11]  }
  0x3f   : > { %1413 = vrot.lane.b32.xlu0 %v2887_v15, %s3277_s20  ;;  %v1765_v15 = vrot.slane %v2919_v54, 1  ;;  %v605_v48 = vrot.slane %v603_v37, 1  ;;  %v512_v54 = vshll.u32 %v3550_v13, 16  ;;  %v2833_v60 = vcombine.low %v203_v51, %v3481_v39  ;;  %v3644_v4 = vld [vmem:[%s3309_s14 + $0x94] sm:$0xf] }
  0x41   : > { %v1767_v5 = vsel %vm740_vm0, %v1765_v15, %v1766_v16  ;;  %v606_v58 = vor.u32 %v605_v48, %v601_v47  ;;  %v514_v6 = vrot.slane %v512_v54, 1  ;;  %v771_v40 = vrot.slane %v2833_v60, 1  ;;  %v2683_v15 = vld [vmem:[%s3309_s14 + $0x84] sm:$0xf]  ;;  %v3581_v16 = vld [vmem:[%s3309_s14 + $0x88] sm:$0xf] }
  0x42   : > { %1431 = vrot.lane.b32.xlu1 %v2896_v8, %s3277_s20  ;;  %v2776_v8 = vld [vmem:[%s3309_s14 + $0x24] sm:$0xe]  ;;  %v1109_v47 = vshll.u32 %v3611_v41, 16 }
  0x43   : > { %1415 = vrot.lane.b32.xlu0 %v2888_v24, %s3277_s20  ;;  %v593_v24 = vrot.slane %v591_v62, 1  ;;  %v2920_v32 = vcombine.low %v2776_v8, %v3455_v19  ;;  %v507_v19 = vshll.u32 %v3537_v29, 16  ;;  %v204_v62 = vld [vmem:[%s3309_s14 + $0x84] sm:$0xe]  ;;  %v3587_v8 = vld [vmem:[%s3309_s14 + $0x28] sm:$0xf] }
  0x44   : > { %v2834_v12 = vcombine.low %v204_v62, %v3515_v57  ;;  %v2841_v26 = vcombine.low %v2667_v56, %v3587_v8  ;;  %v1111_v54 = vrot.slane %v1109_v47, 1  ;;  %v3212_v47 = vld [vmem:[%s4623_s1 + $0x18] sm:$0xff]   ;;  %v157_v29 = vld [vmem:[%s3309_s14 + $0x48] sm:$0xf] }
  0x45   : > { %v594_v35 = vor.u32 %v593_v24, %v589_v22  ;;  %v1768_v44 = vrot.slane %v2920_v32, 1  ;;  %v509_v11 = vrot.slane %v507_v19, 1  ;;  %v2849_v22 = vcombine.low %v2683_v15, %v3581_v16  ;;  %v3615_v19 = vld [vmem:[%s3309_s14 + $0x2c] ss:$0 sps:$4 sm:$0x11]  }
  0x46   : > { %1701 = vrot.lane.b32.xlu1 %v1600_v59, %s3278_s21  ;;  %v610_v59 = vrot.slane %v608_v49, 1  ;;  %v774_v57 = vrot.slane %v2834_v12, 1  ;;  %v773_v24 = vsel %vm740_vm0, %v771_v40, %v772_v7  ;;  %v751_v32 = vrot.slane %v3550_v13, 1  ;;  %v3621_v49 = vld [vmem:[%s3309_s14 + $0x98] ss:$0 sps:$4 sm:$0x11]  }
  0x47   : > { %1685 = vrot.lane.b32.xlu0 %v1504_v0, %s3278_s21  ;;  %v599_v46 = vsel %vm467_vm1, %v594_v35, %v598_v2  ;;  %v1770_v0 = vsel %vm740_vm0, %v1768_v44, %v1769_v45  ;;  %v510_v3 = vor.u32 %v509_v11, %v505_v1  ;;  %v2669_v2 = vld [vmem:[%s3309_s14 + $0x30] sm:$0xf]  ;;  %v1104_v35 = vshll.u32 %v2849_v22, 16 }
  0x48   : > { %v611_v39 = vsel %vm467_vm1, %v606_v58, %v610_v59  ;;  %v752_v13 = vsel %vm740_vm0, %v750_v30, %v751_v32  ;;  %v1102_v43 = vshrl.u32 %v2849_v22, 16  ;;  %v1006_v45 = vshrl.u32 %v2841_v26, 16  ;;  %v2721_v59 = vld [vmem:[%s3309_s14 + $0x84] sm:$0xe]  ;;  %v2749_v32 = vld [vmem:[%s3309_s14 + $0x9c] sm:$0xf] }
  0x49   : > { %v515_v20 = vsel %vm467_vm1, %v510_v3, %v514_v6  ;;  %v1106_v44 = vrot.slane %v1104_v35, 1  ;;  %v1013_v51 = vshll.u32 %v3615_v19, 16  ;;  %v1121_v58 = vshll.u32 %v3621_v49, 16  ;;  %v2713_v3 = vld [vmem:[%s3309_s14 + $0x24] sm:$0xe] }
  0x4a   : > { %1703 = vrot.lane.b32.xlu1 %v1612_v14, %s3278_s21  ;;  %v747_v14 = vrot.slane %v2825_v61, 1  ;;  %v2881_v6 = vcombine.low %v2721_v59, %v3581_v16  ;;  %v2873_v12 = vcombine.low %v2713_v3, %v3587_v8  ;;  %v2747_v16 = vld [vmem:[%s3309_s14 + $0x90] sm:$0xf]  ;;  %v1260_v30 = vrot.slane %v3615_v19, 1 }
  0x4b   : > { %1687 = vrot.lane.b32.xlu0 %v1516_v21, %s3278_s21  ;;  %v775_v21 = vrot.slane %v3545_v36, 1  ;;  %v2850_v36 = vcombine.low %v2685_v28, %v3597_v10  ;;  %v1107_v1 = vor.u32 %v1106_v44, %v1102_v43  ;;  %v1015_v60 = vrot.slane %v1013_v51, 1  ;;  %v3695_v51 = vld [vmem:[%s3309_s14 + $0x38] ss:$0 sps:$4 sm:$0x11]  }
  0x4c   : > { %v749_v27 = vsel %vm740_vm0, %v747_v14, %v748_v9  ;;  %v1123_v9 = vrot.slane %v1121_v58, 1  ;;  %v3213_v58 = vld [vmem:[%s4623_s1 + $0x10] sm:$0xff]   ;;  %v3705_v59 = vld [vmem:[%s3309_s14 + $0xa4] ss:$0 sps:$4 sm:$0x11]   ;;  %v1525_v3 = vshll.u32 %v3695_v51, 16 }
  0x4d   : > { %v776_v37 = vsel %vm740_vm0, %v774_v57, %v775_v21  ;;  %v1116_v42 = vshll.u32 %v2850_v36, 16  ;;  %v1114_v11 = vshrl.u32 %v2850_v36, 16  ;;  %v1112_v63 = vsel %vm467_vm1, %v1107_v1, %v1111_v54 }
  0x4e   : > { %1829 = vrot.lane.b32.xlu1 %v1791_v33, %s3279_s22  ;;  %v3603_v33 = vld [vmem:[%s3309_s14 + $0x34] sm:$0xf]  ;;  %v1283_v57 = vrot.slane %v2881_v6, 1  ;;  %v1284_v21 = vrot.slane %v3611_v41, 1  ;;  %v2785_v6 = vld [vmem:[%s3309_s14 + $0x90] sm:$0xe] }
  0x4f   : > { %1813 = vrot.lane.b32.xlu0 %v1767_v5, %s3279_s22  ;;  %v1008_v5 = vshll.u32 %v2841_v26, 16  ;;  %v2842_v17 = vcombine.low %v2669_v2, %v3603_v33  ;;  %v3660_v2 = vld [vmem:[%s3309_s14 + $0xa0] sm:$0xf] }
  0x50   : > { %v3676_v43 = vcombine.low %v2749_v32, %v3660_v2 }
  0x51   : > { %v1010_v48 = vrot.slane %v1008_v5, 1  ;;  %v1018_v61 = vshrl.u32 %v2842_v17, 16 }
  0x52   : > { %680 = vrot.lane.b32.xlu1 %v599_v46, %s3274_s17  ;;  %v1020_v46 = vshll.u32 %v2842_v17, 16 }
  0x53   : > { %664 = vrot.lane.b32.xlu0 %v503_v52, %s3274_s17  ;;  %v3625_v52 = vld [vmem:[%s3309_s14 + $0x38] ss:$0 sps:$4 sm:$0x11]   ;;  %v1011_v34 = vor.u32 %v1010_v48, %v1006_v45  ;;  %v3211_v45 = vld [vmem:[%s4623_s1 + $0x20] ss:$0 sps:$4 sm:$0xff]  }
  0x54   : > { %v1022_v62 = vrot.slane %v1020_v46, 1  ;;  %v1263_v19 = vrot.slane %v3625_v52, 1  ;;  %3096 = vmatprep.subr.msk.bf16.mxu0 %vm2178_vm2, %v3211_v45  ;;  %3097 = vmatprep.subr.msk.bf16.mxu1 %vm2178_vm2, %v3211_v45  ;;  %v2180_v1 = vsel %vm2178_vm2, %v3211_v45, 0  ;;  %v3763_v45 = vld [vmem:[%s3309_s14 + $0xa0] sm:$0xf] }
  0x55   : > { %v1016_v40 = vsel %vm467_vm1, %v1011_v34, %v1015_v60  ;;  %3045 = vmatpush3.bf16.msra.mxu0 %v2180_v1  ;;  %3091 = vmatpush3.bf16.msra.mxu1 %v2180_v1  ;;  %v3708_v60 = vld [vmem:[%s3309_s14 + $0x44] ss:$0 sps:$4 sm:$0x11]  }
  0x56   : > { %1831 = vrot.lane.b32.xlu1 %v1794_v55, %s3279_s22  ;;  %v1118_v55 = vrot.slane %v1116_v42, 1  ;;  %v1023_v14 = vor.u32 %v1022_v62, %v1018_v61  ;;  %3046 = vmatprep.subr.bf16.mxu0 %v3212_v47 }
  0x57   : > { %1815 = vrot.lane.b32.xlu0 %v1770_v0, %s3279_s22  ;;  %v1025_v0 = vshll.u32 %v3625_v52, 16  ;;  %3087 = vmatprep.subr.bf16.mxu1 %v3212_v47 }
  0x58   : > { %v1119_v7 = vor.u32 %v1118_v55, %v1114_v11  ;;  %v1628_v11 = vshll.u32 %v3676_v43, 16 }
  0x59   : > { %v1027_v15 = vrot.slane %v1025_v0, 1  ;;  %3047 = vmatpush3.bf16.msra.mxu0 %v3212_v47  ;;  %3092 = vmatpush3.bf16.msra.mxu1 %v3212_v47  ;;  %v155_v47 = vld [vmem:[%s3309_s14 + $0x3c] sm:$0xf] }
  0x5a   : > { %682 = vrot.lane.b32.xlu1 %v611_v39, %s3274_s17  ;;  %v2722_v39 = vld [vmem:[%s3309_s14 + $0x90] sm:$0xe]  ;;  %v1124_v8 = vsel %vm467_vm1, %v1119_v7, %v1123_v9  ;;  %v3717_v7 = vld [vmem:[%s3309_s14 + $0x94] sm:$0xf]  ;;  %v3218_v9 = vld [vmem:[%s4623_s1 + $0x8] sm:$0xff]   ;;  %3048 = vmatprep.subr.bf16.mxu0 %v3213_v58 }
  0x5b   : > { %666 = vrot.lane.b32.xlu0 %v515_v20, %s3274_s17  ;;  %v2714_v20 = vld [vmem:[%s3309_s14 + $0x30] sm:$0xe]  ;;  %v2882_v56 = vcombine.low %v2722_v39, %v3597_v10  ;;  %v1028_v28 = vsel %vm467_vm1, %v1023_v14, %v1027_v15  ;;  %v2897_v10 = vcombine.low %v2747_v16, %v3644_v4  ;;  %v1626_v14 = vshrl.u32 %v3676_v43, 16  ;;  %3088 = vmatprep.subr.bf16.mxu1 %v3213_v58 }
  0x5c   : > { %v153_v39 = vld [vmem:[%s3309_s14 + $0x30] sm:$0xf]  ;;  %v1630_v15 = vrot.slane %v1628_v11, 1  ;;  %v1537_v16 = vshll.u32 %v3708_v60, 16 }
  0x5d   : > { %v1286_v5 = vrot.slane %v2882_v56, 1  ;;  %v1616_v42 = vshll.u32 %v2897_v10, 16  ;;  %v1614_v34 = vshrl.u32 %v2897_v10, 16  ;;  %v2777_v56 = vld [vmem:[%s3309_s14 + $0x30] sm:$0xe]  ;;  %3049 = vmatpush3.bf16.msra.mxu0 %v3213_v58  ;;  %3093 = vmatpush3.bf16.msra.mxu1 %v3213_v58 }
  0x5e   : > { %809 = vrot.lane.b32.xlu1 %v773_v24, %s3273_s16  ;;  %v3652_v24 = vld [vmem:[%s3309_s14 + $0x34] sm:$0xf]  ;;  %v1631_v32 = vor.u32 %v1630_v15, %v1626_v14  ;;  %3050 = vmatprep.subr.bf16.mxu0 %v3218_v9  ;;  %v2778_v58 = vld [vmem:[%s3309_s14 + $0x3c] sm:$0xe] }
  0x5f   : > { %793 = vrot.lane.b32.xlu0 %v749_v27, %s3273_s16  ;;  %v1259_v27 = vrot.slane %v2873_v12, 1  ;;  %v1618_v55 = vrot.slane %v1616_v42, 1  ;;  %3089 = vmatprep.subr.bf16.mxu1 %v3218_v9 }
  0x61   : > { %v1261_v41 = vsel %vm740_vm0, %v1259_v27, %v1260_v30  ;;  %v1619_v12 = vor.u32 %v1618_v55, %v1614_v34  ;;  %v2929_v30 = vcombine.low %v2785_v6, %v3644_v4  ;;  %v3223_v4 = vld [vmem:[%s4623_s1] sm:$0xff]   ;;  %3051 = vmatpush3.bf16.msra.mxu0 %v3218_v9  ;;  %3094 = vmatpush3.bf16.msra.mxu1 %v3218_v9  ;;  %v1772_v34 = vrot.slane %v3695_v51, 1 }
  0x62   : > { %811 = vrot.lane.b32.xlu1 %v776_v37, %s3273_s16  ;;  %v3668_v37 = vld [vmem:[%s3309_s14 + $0x40] sm:$0xf]  ;;  %3052 = vmatprep.subr.bf16.mxu0 %v3223_v4 }
  0x63   : > { %795 = vrot.lane.b32.xlu0 %v752_v13, %s3273_s16  ;;  %3090 = vmatprep.subr.bf16.mxu1 %v3223_v4 }
  0x65   : > { %3053 = vmatpush3.bf16.msra.mxu0 %v3223_v4  ;;  %3095 = vmatpush3.bf16.msra.mxu1 %v3223_v4 }
  0x66   : > { %921 = vrot.lane.b32.xlu1 %v2849_v22, %s3272_s15  ;;  %v2731_v22 = vld [vmem:[%s3309_s14 + $0x30] sm:$0xf] }
  0x67   : > { %905 = vrot.lane.b32.xlu0 %v2841_v26, %s3272_s15  ;;  %v2874_v26 = vcombine.low %v2714_v20, %v3603_v33  ;;  %v3664_v35 = vcombine.low %v2731_v22, %v3652_v24  ;;  %v1285_v33 = vsel %vm740_vm0, %v1283_v57, %v1284_v21  ;;  %v1633_v20 = vshll.u32 %v3705_v59, 16 }
  0x69   : > { %v1262_v13 = vrot.slane %v2874_v26, 1  ;;  %v1520_v46 = vshll.u32 %v3664_v35, 16  ;;  %v1518_v62 = vshrl.u32 %v3664_v35, 16 }
  0x6a   : > { %923 = vrot.lane.b32.xlu1 %v2850_v36, %s3272_s15  ;;  %v2733_v36 = vld [vmem:[%s3309_s14 + $0x3c] sm:$0xf] }
  0x6b   : > { %907 = vrot.lane.b32.xlu0 %v2842_v17, %s3272_s15  ;;  %v1287_v17 = vrot.slane %v3621_v49, 1  ;;  %v3679_v44 = vcombine.low %v2733_v36, %v3668_v37  ;;  %v3692_v49 = vld [vmem:[%s3309_s14 + $0x98] ss:$0 sps:$4 sm:$0x11]   ;;  %v1264_v52 = vsel %vm740_vm0, %v1262_v13, %v1263_v19  ;;  %v1522_v0 = vrot.slane %v1520_v46, 1 }
  0x6c   : > { %v1621_v61 = vshll.u32 %v3692_v49, 16  ;;  %v1539_v36 = vrot.slane %v1537_v16, 1  ;;  %v171_v13 = vld [vmem:[%s3309_s14 + $0x9c] sm:$0xf]  ;;  %v1796_v46 = vrot.slane %v3692_v49, 1 }
  0x6d   : > { %v1288_v48 = vsel %vm740_vm0, %v1286_v5, %v1287_v17  ;;  %v1532_v54 = vshll.u32 %v3679_v44, 16  ;;  %v1530_v57 = vshrl.u32 %v3679_v44, 16  ;;  %v1523_v26 = vor.u32 %v1522_v0, %v1518_v62  ;;  %v3797_v16 = vld [vmem:[%s3309_s14 + $0xa4] ss:$0 sps:$4 sm:$0x11]  }
  0x6e   : > { %1193 = vrot.lane.b32.xlu1 %v1112_v63, %s3275_s18  ;;  %v169_v63 = vld [vmem:[%s3309_s14 + $0x90] sm:$0xf]  ;;  %v3782_v0 = vcombine.low %v171_v13, %v3763_v45 }
  0x6f   : > { %1177 = vrot.lane.b32.xlu0 %v1016_v40, %s3275_s18  ;;  %v3724_v40 = vld [vmem:[%s3309_s14 + $0x34] sm:$0xf]  ;;  %v1534_v21 = vrot.slane %v1532_v54, 1  ;;  %v3735_v22 = vcombine.low %v169_v63, %v3717_v7 }
  0x70   : > { %v3738_v27 = vcombine.low %v153_v39, %v3724_v40  ;;  %4635 = vst [vmem:[#allocation6_spill] sm:$0xff] %v3782_v0  ;;  %v2922_v39 = vcombine.low %v2778_v58, %v3668_v37  ;;  %v3804_v37 = vld [vmem:[%s3309_s14 + $0x44] ss:$0 sps:$4 sm:$0x11]   ;;  %v625_v4 = vshrl.u32 %v3782_v0, 16 }
  0x71   : > { %4633 = vst [vmem:[#allocation4_spill] sm:$0xff] %v3735_v22  ;;  %v1535_v5 = vor.u32 %v1534_v21, %v1530_v57  ;;  %v615_v17 = vshll.u32 %v3735_v22, 16 }
  0x72   : > { %1195 = vrot.lane.b32.xlu1 %v1124_v8, %s3275_s18  ;;  %v1623_v8 = vrot.slane %v1621_v61, 1  ;;  %4634 = vst [vmem:[#allocation5_spill] sm:$0xff] %v3738_v27  ;;  %v613_v61 = vshrl.u32 %v3735_v22, 16 }
  0x73   : > { %1179 = vrot.lane.b32.xlu0 %v1028_v28, %s3275_s18  ;;  %v1527_v28 = vrot.slane %v1525_v3, 1  ;;  %v1540_v49 = vsel %vm467_vm1, %v1535_v5, %v1539_v36  ;;  %v617_v62 = vrot.slane %v615_v17, 1  ;;  %v517_v3 = vshrl.u32 %v3738_v27, 16  ;;  %v205_v17 = vld [vmem:[%s3309_s14 + $0x90] sm:$0xe] }
  0x74   : > { %v632_v5 = vshll.u32 %v3797_v16, 16 }
  0x75   : > { %v1528_v19 = vsel %vm467_vm1, %v1523_v26, %v1527_v28 }
  0x76   : > { %1321 = vrot.lane.b32.xlu1 %v1285_v33, %s3276_s19  ;;  %v3745_v33 = vld [vmem:[%s3309_s14 + $0x98] ss:$0 sps:$4 sm:$0x11]  }
  0x77   : > { %1305 = vrot.lane.b32.xlu0 %v1261_v41, %s3276_s19  ;;  %v3755_v41 = vld [vmem:[%s3309_s14 + $0x38] ss:$0 sps:$4 sm:$0x11]   ;;  %v620_v55 = vshll.u32 %v3745_v33, 16 }
  0x78   : > { %v524_v51 = vshll.u32 %v3755_v41, 16 }
  0x79   : > { %v622_v14 = vrot.slane %v620_v55, 1 }
  0x7a   : > { %1323 = vrot.lane.b32.xlu1 %v1288_v48, %s3276_s19  ;;  %v3768_v48 = vld [vmem:[%s3309_s14 + $0x40] sm:$0xf]  ;;  %v526_v21 = vrot.slane %v524_v51, 1  ;;  %v2687_v51 = vld [vmem:[%s3309_s14 + $0x9c] sm:$0xf] }
  0x7b   : > { %1307 = vrot.lane.b32.xlu0 %v1264_v52, %s3276_s19  ;;  %v2786_v52 = vld [vmem:[%s3309_s14 + $0x9c] sm:$0xe]  ;;  %v3787_v63 = vcombine.low %v155_v47, %v3768_v48 }
  0x7d   : > { %4636 = vst [vmem:[#allocation7_spill] sm:$0xff] %v3787_v63  ;;  %v531_v26 = vshll.u32 %v3787_v63, 16 }
  0x7e   : > { %1433 = vrot.lane.b32.xlu1 %v2897_v10, %s3277_s20  ;;  %v2921_v10 = vcombine.low %v2777_v56, %v3652_v24  ;;  %v1624_v24 = vsel %vm467_vm1, %v1619_v12, %v1623_v8  ;;  %v2930_v12 = vcombine.low %v2786_v52, %v3660_v2  ;;  %v627_v56 = vshll.u32 %v3782_v0, 16 }
  0x7f   : > { %1417 = vrot.lane.b32.xlu0 %v3664_v35, %s3277_s20  ;;  %v1635_v35 = vrot.slane %v1633_v20, 1  ;;  %v618_v20 = vor.u32 %v617_v62, %v613_v61  ;;  %v206_v61 = vld [vmem:[%s3309_s14 + $0x9c] sm:$0xe] }
  0x80   : > { %v1771_v54 = vrot.slane %v2921_v10, 1  ;;  %v1799_v10 = vrot.slane %v3705_v59, 1  ;;  %v536_v59 = vshll.u32 %v3804_v37, 16 }
  0x81   : > { %v1636_v11 = vsel %vm467_vm1, %v1631_v32, %v1635_v35  ;;  %v1774_v32 = vrot.slane %v2922_v39, 1  ;;  %v1775_v35 = vrot.slane %v3708_v60, 1  ;;  %v623_v36 = vsel %vm467_vm1, %v618_v20, %v622_v14  ;;  %v3842_v14 = vld [vmem:[%s3309_s14 + $0xa0] sm:$0xf] }
  0x82   : > { %1435 = vrot.lane.b32.xlu1 %v3676_v43, %s3277_s20  ;;  %v519_v43 = vshll.u32 %v3738_v27, 16  ;;  %v1773_v57 = vsel %vm740_vm0, %v1771_v54, %v1772_v34  ;;  %v538_v58 = vrot.slane %v536_v59, 1  ;;  %v2836_v39 = vcombine.low %v206_v61, %v3763_v45  ;;  %v4013_v27 = vld [vmem:[%s3309_s14 + $0x5c] ss:$0 sps:$4 sm:$0x11]  }
  0x83   : > { %1419 = vrot.lane.b32.xlu0 %v3679_v44, %s3277_s20  ;;  %v1795_v44 = vrot.slane %v2929_v30, 1  ;;  %v1798_v30 = vrot.slane %v2930_v12, 1  ;;  %v1776_v34 = vsel %vm740_vm0, %v1774_v32, %v1775_v35  ;;  %v2851_v45 = vcombine.low %v2687_v51, %v3842_v14  ;;  %v3863_v32 = vld [vmem:[%s3309_s14 + $0xac] sm:$0xf] }
  0x84   : > { %v521_v6 = vrot.slane %v519_v43, 1  ;;  %v533_v43 = vrot.slane %v531_v26, 1  ;;  %v1561_v22 = vshll.u32 %v4013_v27, 16 }
  0x85   : > { %v1797_v15 = vsel %vm740_vm0, %v1795_v44, %v1796_v46  ;;  %v197_v44 = vld [vmem:[%s3309_s14 + $0x30] sm:$0xe]  ;;  %v2835_v46 = vcombine.low %v205_v17, %v3717_v7  ;;  %v1800_v47 = vsel %vm740_vm0, %v1798_v30, %v1799_v10  ;;  %v198_v7 = vld [vmem:[%s3309_s14 + $0x3c] sm:$0xe]  ;;  %v780_v30 = vrot.slane %v2836_v39, 1 }
  0x86   : > { %v3759_v42 = vpop.permute.xlu1 %917  ;;  %1705 = vrot.lane.b32.xlu1 %v1624_v24, %s3278_s21  ;;  %v522_v2 = vor.u32 %v521_v6, %v517_v3  ;;  %v629_v24 = vrot.slane %v627_v56, 1  ;;  %v778_v6 = vrot.slane %v3745_v33, 1  ;;  %v754_v56 = vrot.slane %v3755_v41, 1  ;;  %v2689_v10 = vld [vmem:[%s3309_s14 + $0xa8] sm:$0xf] }
  0x87   : > { %v3772_v1 = vpop.permute.xlu0 %901  ;;  %1689 = vrot.lane.b32.xlu0 %v1528_v19, %s3278_s21  ;;  %v529_v19 = vshrl.u32 %v3787_v63, 16  ;;  %v777_v3 = vrot.slane %v2835_v46, 1  ;;  %v2828_v33 = vcombine.low %v198_v7, %v3768_v48  ;;  %v781_v41 = vrot.slane %v3797_v16, 1  ;;  %v2673_v17 = vld [vmem:[%s3309_s14 + $0x48] sm:$0xf] }
  0x88   : > { %v527_v13 = vsel %vm467_vm1, %v522_v2, %v526_v21  ;;  %v630_v52 = vor.u32 %v629_v24, %v625_v4  ;;  %v3851_v2 = vld [vmem:[%s3309_s14 + $0x40] sm:$0xf]  ;;  %v757_v24 = vrot.slane %v3804_v37, 1  ;;  %v1128_v16 = vshll.u32 %v2851_v45, 16 }
  0x89   : > { %v534_v55 = vor.u32 %v533_v43, %v529_v19  ;;  %v779_v26 = vsel %vm740_vm0, %v777_v3, %v778_v6  ;;  %v756_v4 = vrot.slane %v2828_v33, 1  ;;  %v2852_v19 = vcombine.low %v2689_v10, %v3863_v32  ;;  %v3878_v43 = vld [vmem:[%s3309_s14 + $0xa4] ss:$0 sps:$4 sm:$0x11]   ;;  %v2723_v33 = vld [vmem:[%s3309_s14 + $0x9c] sm:$0xe] }
  0x8a   : > { %v3789_v9 = vpop.permute.xlu1 %805  ;;  %1707 = vrot.lane.b32.xlu1 %v1636_v11, %s3278_s21  ;;  %v634_v11 = vrot.slane %v632_v5, 1  ;;  %v782_v59 = vsel %vm740_vm0, %v780_v30, %v781_v41  ;;  %v3883_v46 = vld [vmem:[%s3309_s14 + $0x44] ss:$0 sps:$4 sm:$0x11]   ;;  %v2715_v10 = vld [vmem:[%s3309_s14 + $0x3c] sm:$0xe] }
  0x8b   : > { %1691 = vrot.lane.b32.xlu0 %v1540_v49, %s3278_s21  ;;  %v2827_v49 = vcombine.low %v197_v44, %v3724_v40  ;;  %v3895_v3 = vld [vmem:[%s3309_s14 + $0xb0] ss:$0 sps:$4 sm:$0x11]  }
  0x8c   : > { %v3800_v8 = vpop.permute.xlu0 %789  ;;  %v635_v12 = vsel %vm467_vm1, %v630_v52, %v634_v11  ;;  %v3901_v39 = vld [vmem:[%s3309_s14 + $0x50] ss:$0 sps:$4 sm:$0x11]   ;;  %v1145_v41 = vshll.u32 %v3895_v3, 16 }
  0x8d   : > { %v753_v20 = vrot.slane %v2827_v49, 1  ;;  %v1133_v49 = vshll.u32 %v3878_v43, 16 }
  0x8e   : > { %1833 = vrot.lane.b32.xlu1 %v1797_v15, %s3279_s22  ;;  %v539_v15 = vsel %vm467_vm1, %v534_v55, %v538_v58  ;;  %v1140_v55 = vshll.u32 %v2852_v19, 16  ;;  %v1130_v58 = vrot.slane %v1128_v16, 1 }
  0x8f   : > { %v3808_v28 = vpop.permute.xlu1 %807  ;;  %1817 = vrot.lane.b32.xlu0 %v1773_v57, %s3279_s22  ;;  %v2671_v57 = vld [vmem:[%s3309_s14 + $0x3c] sm:$0xf] }
  0x90   : > { %v2843_v48 = vcombine.low %v2671_v57, %v3851_v2  ;;  %v1135_v57 = vrot.slane %v1133_v49, 1  ;;  %v1142_v30 = vrot.slane %v1140_v55, 1  ;;  %v2716_v55 = vld [vmem:[%s3309_s14 + $0x48] sm:$0xe] }
  0x91   : > { %v3820_v60 = vpop.permute.xlu0 %791 }
  0x92   : > { %684 = vrot.lane.b32.xlu1 %v623_v36, %s3274_s17  ;;  %v755_v36 = vsel %vm740_vm0, %v753_v20, %v754_v56  ;;  %v1032_v44 = vshll.u32 %v2843_v48, 16  ;;  %v1030_v61 = vshrl.u32 %v2843_v48, 16  ;;  %v1138_v56 = vshrl.u32 %v2852_v19, 16 }
  0x93   : > { %668 = vrot.lane.b32.xlu0 %v527_v13, %s3274_s17  ;;  %v3873_v13 = vld [vmem:[%s3309_s14 + $0x4c] sm:$0xf] }
  0x94   : > { %v3827_v54 = vpop.permute.xlu1 %662  ;;  %v2844_v52 = vcombine.low %v2673_v17, %v3873_v13  ;;  %v1034_v7 = vrot.slane %v1032_v44, 1  ;;  %v1049_v17 = vshll.u32 %v3901_v39, 16  ;;  %v2883_v44 = vcombine.low %v2723_v33, %v3842_v14  ;;  %v3934_v33 = vld [vmem:[%s3309_s14 + $0x4c] sm:$0xf] }
  0x95   : > { %v3832_v62 = vpop.permute.xlu0 %660  ;;  %v1143_v49 = vor.u32 %v1142_v30, %v1138_v56  ;;  %v2876_v56 = vcombine.low %v2716_v55, %v3873_v13  ;;  %v2753_v30 = vld [vmem:[%s3309_s14 + $0xb4] sm:$0xf] }
  0x96   : > { %1835 = vrot.lane.b32.xlu1 %v1800_v47, %s3279_s22  ;;  %v758_v47 = vsel %vm740_vm0, %v756_v4, %v757_v24  ;;  %v1044_v51 = vshll.u32 %v2844_v52, 16  ;;  %v1042_v24 = vshrl.u32 %v2844_v52, 16  ;;  %v1051_v14 = vrot.slane %v1049_v17, 1  ;;  %v2737_v13 = vld [vmem:[%s3309_s14 + $0x54] sm:$0xf] }
  0x97   : > { %1819 = vrot.lane.b32.xlu0 %v1776_v34, %s3279_s22  ;;  %v1126_v34 = vshrl.u32 %v2851_v45, 16 }
  0x98   : > { %v3844_v40 = vpop.permute.xlu1 %678 }
  0x99   : > { %v3853_v21 = vpop.permute.xlu0 %676  ;;  %v1131_v20 = vor.u32 %v1130_v58, %v1126_v34  ;;  %v2724_v34 = vld [vmem:[%s3309_s14 + $0xa8] sm:$0xe] }
  0x9a   : > { %686 = vrot.lane.b32.xlu1 %v635_v12, %s3274_s17  ;;  %v1037_v12 = vshll.u32 %v3883_v46, 16 }
  0x9b   : > { %670 = vrot.lane.b32.xlu0 %v539_v15, %s3274_s17  ;;  %v1136_v58 = vsel %vm467_vm1, %v1131_v20, %v1135_v57  ;;  %v2884_v20 = vcombine.low %v2724_v34, %v3863_v32  ;;  %v1289_v57 = vrot.slane %v2883_v44, 1  ;;  %v3961_v44 = vld [vmem:[%s3309_s14 + $0xb0] ss:$0 sps:$4 sm:$0x11]  }
  0x9c   : > { %v3865_v35 = vpop.permute.xlu1 %919  ;;  %v1039_v4 = vrot.slane %v1037_v12, 1 }
  0x9d   : > { %v3869_v5 = vpop.permute.xlu0 %903  ;;  %v1292_v55 = vrot.slane %v2884_v20, 1 }
  0x9e   : > { %813 = vrot.lane.b32.xlu1 %v779_v26, %s3273_s16  ;;  %v1035_v26 = vor.u32 %v1034_v7, %v1030_v61  ;;  %v1147_v61 = vrot.slane %v1145_v41, 1  ;;  %v3944_v41 = vld [vmem:[%s3309_s14 + $0xb8] sm:$0xf] }
  0x9f   : > { %797 = vrot.lane.b32.xlu0 %v755_v36, %s3273_s16 }
  0xa0   : > { %v3885_v37 = vpop.permute.xlu1 %1189 }
  0xa1   : > { %v3889_v11 = vpop.permute.xlu0 %1173 }
  0xa2   : > { %815 = vrot.lane.b32.xlu1 %v782_v59, %s3273_s16  ;;  %v2751_v59 = vld [vmem:[%s3309_s14 + $0xa8] sm:$0xf] }
  0xa3   : > { %799 = vrot.lane.b32.xlu0 %v758_v47, %s3273_s16  ;;  %v2875_v47 = vcombine.low %v2715_v10, %v3851_v2  ;;  %v2735_v2 = vld [vmem:[%s3309_s14 + $0x48] sm:$0xf]  ;;  %v1148_v10 = vsel %vm467_vm1, %v1143_v49, %v1147_v61  ;;  %v1268_v49 = vrot.slane %v2876_v56, 1  ;;  %v1269_v61 = vrot.slane %v3901_v39, 1 }
  0xa4   : > { %v3897_v6 = vpop.permute.xlu1 %1191  ;;  %v3950_v32 = vcombine.low %v2735_v2, %v3934_v33 }
  0xa5   : > { %v3903_v15 = vpop.permute.xlu0 %1175 }
  0xa6   : > { %925 = vrot.lane.b32.xlu1 %v2851_v45, %s3272_s15  ;;  %v1046_v45 = vrot.slane %v1044_v51, 1  ;;  %v1040_v51 = vsel %vm467_vm1, %v1035_v26, %v1039_v4  ;;  %v1290_v26 = vrot.slane %v3878_v43, 1  ;;  %v1265_v4 = vrot.slane %v2875_v47, 1 }
  0xa7   : > { %909 = vrot.lane.b32.xlu0 %v2843_v48, %s3272_s15  ;;  %v3917_v48 = vld [vmem:[%s3309_s14 + $0xac] sm:$0xf] }
  0xa8   : > { %v3910_v36 = vpop.permute.xlu1 %1317  ;;  %v1047_v12 = vor.u32 %v1046_v45, %v1042_v24  ;;  %v1266_v24 = vrot.slane %v3883_v46, 1  ;;  %v3966_v46 = vcombine.low %v2753_v30, %v3944_v41  ;;  %v1291_v47 = vsel %vm740_vm0, %v1289_v57, %v1290_v26  ;;  %v3983_v26 = vld [vmem:[%s3309_s14 + $0x50] ss:$0 sps:$4 sm:$0x11]  }
  0xa9   : > { %v3913_v16 = vpop.permute.xlu0 %1301  ;;  %v1863_v30 = vsel %vm1845_vm3, %v3341_v18, %v3853_v21  ;;  %v1542_v18 = vshrl.u32 %v3950_v32, 16  ;;  %v1549_v0 = vshll.u32 %v3983_v26, 16 }
  0xaa   : > { %927 = vrot.lane.b32.xlu1 %v2852_v19, %s3272_s15  ;;  %v3930_v19 = vcombine.low %v2751_v59, %v3917_v48  ;;  %v1052_v17 = vsel %vm467_vm1, %v1047_v12, %v1051_v14  ;;  %v3958_v59 = vld [vmem:[%s3309_s14 + $0x58] sm:$0xf]  ;;  %v1267_v2 = vsel %vm740_vm0, %v1265_v4, %v1266_v24  ;;  %v1652_v56 = vshll.u32 %v3966_v46, 16  ;;  %v2787_v4 = vld [vmem:[%s3309_s14 + $0xa8] sm:$0xe] }
  0xab   : > { %911 = vrot.lane.b32.xlu0 %v2844_v52, %s3272_s15  ;;  %v3975_v12 = vcombine.low %v2737_v13, %v3958_v59  ;;  %v3995_v24 = vld [vmem:[%s3309_s14 + $0xbc] ss:$0 sps:$4 sm:$0x11]   ;;  %v1847_v13 = vsel %vm1845_vm3, %v3346_v23, %v3832_v62  ;;  %v1896_v23 = vsel %vm1878_vm4, %v1863_v30, %v3789_v9 }
  0xac   : > { %v3926_v7 = vpop.permute.xlu1 %1319  ;;  %v1640_v43 = vshll.u32 %v3930_v19, 16  ;;  %v1638_v20 = vshrl.u32 %v3930_v19, 16 }
  0xad   : > { %v3936_v52 = vpop.permute.xlu0 %1303 }
  0xae   : > { %1197 = vrot.lane.b32.xlu1 %v1136_v58, %s3275_s18  ;;  %v1293_v58 = vrot.slane %v3895_v3, 1  ;;  %v1642_v57 = vrot.slane %v1640_v43, 1  ;;  %v1645_v3 = vshll.u32 %v3961_v44, 16  ;;  %v1556_v43 = vshll.u32 %v3975_v12, 16 }
  0xaf   : > { %1181 = vrot.lane.b32.xlu0 %v1040_v51, %s3275_s18  ;;  %v1544_v51 = vshll.u32 %v3950_v32, 16 }
  0xb0   : > { %v3953_v45 = vpop.permute.xlu1 %1429 }
  0xb1   : > { %v3963_v34 = vpop.permute.xlu0 %1413  ;;  %v1546_v63 = vrot.slane %v1544_v51, 1  ;;  %v1657_v51 = vshll.u32 %v3995_v24, 16 }
  0xb2   : > { %1199 = vrot.lane.b32.xlu1 %v1148_v10, %s3275_s18  ;;  %v1294_v10 = vsel %vm740_vm0, %v1292_v55, %v1293_v58  ;;  %v1643_v55 = vor.u32 %v1642_v57, %v1638_v20  ;;  %v1647_v58 = vrot.slane %v1645_v3, 1  ;;  %v1880_v20 = vsel %vm1878_vm4, %v1847_v13, %v3800_v8  ;;  %v173_v3 = vld [vmem:[%s3309_s14 + $0xa8] sm:$0xf] }
  0xb3   : > { %1183 = vrot.lane.b32.xlu0 %v1052_v17, %s3275_s18  ;;  %v1270_v17 = vsel %vm740_vm0, %v1268_v49, %v1269_v61  ;;  %v2931_v49 = vcombine.low %v2787_v4, %v3917_v48  ;;  %v1650_v61 = vshrl.u32 %v3966_v46, 16  ;;  %v1554_v48 = vshrl.u32 %v3975_v12, 16 }
  0xb4   : > { %v3977_v14 = vpop.permute.xlu1 %1431  ;;  %v1558_v57 = vrot.slane %v1556_v43, 1  ;;  %v1929_v8 = vsel %vm1911_vm5, %v1896_v23, %v3759_v42  ;;  %v1547_v4 = vor.u32 %v1546_v63, %v1542_v18  ;;  %v1551_v13 = vrot.slane %v1549_v0, 1 }
  0xb5   : > { %v3985_v39 = vpop.permute.xlu0 %1415  ;;  %v4049_v63 = vrot.slane %v2931_v49, 1 }
  0xb6   : > { %1325 = vrot.lane.b32.xlu1 %v1291_v47, %s3276_s19  ;;  %v4005_v47 = vld [vmem:[%s3309_s14 + $0x48] sm:$0xe] }
  0xb7   : > { %1309 = vrot.lane.b32.xlu0 %v1267_v2, %s3276_s19  ;;  %v1654_v2 = vrot.slane %v1652_v56, 1  ;;  %v2923_v9 = vcombine.low %v4005_v47, %v3934_v33  ;;  %v4025_v56 = vld [vmem:[%s3309_s14 + $0xac] sm:$0xf]  ;;  %v1913_v33 = vsel %vm1911_vm5, %v1880_v20, %v3772_v1 }
  0xb8   : > { %v1702_v21 = vpop.permute.xlu1 %1701  ;;  %v1946_v42 = vsel %vm1944_vm6, %v1913_v33, %v3889_v11  ;;  %v4052_v1 = vcombine.low %v173_v3, %v4025_v56  ;;  %v1659_v11 = vrot.slane %v1657_v51, 1 }
  0xb9   : > { %v1686_v62 = vpop.permute.xlu0 %1685  ;;  %v1655_v43 = vor.u32 %v1654_v2, %v1650_v61  ;;  %v4092_v2 = vld [vmem:[%s3309_s14 + $0x50] ss:$0 sps:$4 sm:$0x11]  }
  0xba   : > { %1327 = vrot.lane.b32.xlu1 %v1294_v10, %s3276_s19  ;;  %v1648_v10 = vsel %vm467_vm1, %v1643_v55, %v1647_v58 }
  0xbb   : > { %1311 = vrot.lane.b32.xlu0 %v1270_v17, %s3276_s19  ;;  %v1962_v17 = vsel %vm1944_vm6, %v1929_v8, %v3885_v37  ;;  %v1979_v37 = vsel %vm1977_vm7, %v1946_v42, %v3913_v16  ;;  %v4067_v16 = vcombine.low %v157_v29, %v4041_v25  ;;  %v1552_v29 = vsel %vm467_vm1, %v1547_v4, %v1551_v13  ;;  %v159_v8 = vld [vmem:[%s3309_s14 + $0x54] sm:$0xf]  ;;  %v4116_v4 = vld [vmem:[%s3309_s14 + $0x58] sm:$0xf] }
  0xbc   : > { %v4029_v30 = vpop.permute.xlu1 %1703  ;;  %v1995_v0 = vsel %vm1977_vm7, %v1962_v17, %v3910_v36  ;;  %v1559_v36 = vor.u32 %v1558_v57, %v1554_v48  ;;  %v2012_v55 = vsel %vm2010_vm8, %v1979_v37, %v3963_v34  ;;  %v175_v48 = vld [vmem:[%s3309_s14 + $0xb4] sm:$0xf] }
  0xbd   : > { %v4036_v47 = vpop.permute.xlu0 %1687  ;;  %v2028_v18 = vsel %vm2010_vm8, %v1995_v0, %v3953_v45  ;;  %v1849_v45 = vsel %vm1845_vm3, %v3359_v38, %v3827_v54  ;;  %v1802_v38 = vrot.slane %v3961_v44, 1  ;;  %v639_v54 = vshll.u32 %v4052_v1, 16  ;;  %v2788_v42 = vld [vmem:[%s3309_s14 + $0xb4] sm:$0xe] }
  0xbe   : > { %1437 = vrot.lane.b32.xlu1 %v3930_v19, %s3277_s20  ;;  %v1865_v19 = vsel %vm1845_vm3, %v3353_v31, %v3844_v40  ;;  %v2061_v58 = vsel %vm2043_vm9, %v2028_v18, %v1702_v21  ;;  %v1563_v31 = vrot.slane %v1561_v22, 1  ;;  %v4075_v40 = vld [vmem:[%s3309_s14 + $0xb0] ss:$0 sps:$4 sm:$0x11]   ;;  %v1777_v21 = vrot.slane %v2923_v9, 1 }
  0xbf   : > { %1421 = vrot.lane.b32.xlu0 %v3950_v32, %s3277_s20  ;;  %v2045_v32 = vsel %vm2043_vm9, %v2012_v55, %v1686_v62  ;;  %v1898_v22 = vsel %vm1878_vm4, %v1865_v19, %v3808_v28  ;;  %v1778_v62 = vrot.slane %v3983_v26, 1  ;;  %v1882_v28 = vsel %vm1878_vm4, %v1849_v45, %v3820_v60  ;;  %v4104_v9 = vld [vmem:[%s3309_s14 + $0xb8] sm:$0xf]  ;;  %v2780_v0 = vld [vmem:[%s3309_s14 + $0x54] sm:$0xe] }
  0xc0   : > { %v1830_v23 = vpop.permute.xlu1 %1829  ;;  %v1931_v44 = vsel %vm1911_vm5, %v1898_v22, %v3865_v35  ;;  %v543_v51 = vshll.u32 %v4067_v16, 16  ;;  %v1915_v26 = vsel %vm1911_vm5, %v1882_v28, %v3869_v5  ;;  %v1564_v60 = vsel %vm467_vm1, %v1559_v36, %v1563_v31  ;;  %v4155_v45 = vld [vmem:[%s3309_s14 + $0xbc] ss:$0 sps:$4 sm:$0x11]  }
  0xc1   : > { %v1814_v49 = vpop.permute.xlu0 %1813  ;;  %v2094_v61 = vsel %vm2076_vm10, %v2061_v58, %v1830_v23  ;;  %v1964_v35 = vsel %vm1944_vm6, %v1931_v44, %v3897_v6  ;;  %v644_v3 = vshll.u32 %v4075_v40, 16  ;;  %v1948_v13 = vsel %vm1944_vm6, %v1915_v26, %v3903_v15  ;;  %v4162_v31 = vld [vmem:[%s3309_s14 + $0x5c] ss:$0 sps:$4 sm:$0x11]  }
  0xc2   : > { %1439 = vrot.lane.b32.xlu1 %v3966_v46, %s3277_s20  ;;  %v2078_v34 = vsel %vm2076_vm10, %v2045_v32, %v1814_v49  ;;  %3070 = vmatprep.mubr.msk.bf16.mxu1 %vm2145_vm11, %v2094_v61  ;;  %v1660_v46 = vsel %vm467_vm1, %v1655_v43, %v1659_v11  ;;  %v1997_v17 = vsel %vm1977_vm7, %v1964_v35, %v3926_v7  ;;  %v641_v5 = vrot.slane %v639_v54, 1  ;;  %v199_v35 = vld [vmem:[%s3309_s14 + $0x48] sm:$0xe] }
  0xc3   : > { %1423 = vrot.lane.b32.xlu0 %v3975_v12, %s3277_s20  ;;  %3054 = vmatprep.mubr.msk.bf16.mxu0 %vm2145_vm11, %v2078_v34  ;;  %v637_v12 = vshrl.u32 %v4052_v1, 16  ;;  %v541_v6 = vshrl.u32 %v4067_v16, 16  ;;  %v1981_v33 = vsel %vm1977_vm7, %v1948_v13, %v3936_v52  ;;  %v2030_v43 = vsel %vm2010_vm8, %v1997_v17, %v3977_v14 }
  0xc4   : > { %v4098_v20 = vpop.permute.xlu1 %680  ;;  %v548_v15 = vshll.u32 %v4092_v2, 16  ;;  %v4133_v37 = vcombine.low %v175_v48, %v4104_v9  ;;  %v2014_v7 = vsel %vm2010_vm8, %v1981_v33, %v3985_v39  ;;  %v545_v52 = vrot.slane %v543_v51, 1 }
  0xc5   : > { %v4110_v57 = vpop.permute.xlu0 %664  ;;  %v4140_v14 = vcombine.low %v159_v8, %v4116_v4  ;;  %v2047_v11 = vsel %vm2043_vm9, %v2014_v7, %v4036_v47  ;;  %v2932_v55 = vcombine.low %v2788_v42, %v3944_v41  ;;  %v2924_v39 = vcombine.low %v2780_v0, %v3958_v59  ;;  %v208_v42 = vld [vmem:[%s3309_s14 + $0xb4] sm:$0xe] }
  0xc6   : > { %1709 = vrot.lane.b32.xlu1 %v1648_v10, %s3278_s21  ;;  %v2063_v10 = vsel %vm2043_vm9, %v2030_v43, %v4029_v30  ;;  %v1803_v30 = vsel %vm740_vm0, %v4049_v63, %v1802_v38  ;;  %v642_v47 = vor.u32 %v641_v5, %v637_v12  ;;  %v646_v23 = vrot.slane %v644_v3, 1 }
  0xc7   : > { %1693 = vrot.lane.b32.xlu0 %v1552_v29, %s3278_s21  ;;  %v651_v41 = vshll.u32 %v4133_v37, 16  ;;  %v1779_v32 = vsel %vm740_vm0, %v1777_v21, %v1778_v62  ;;  %v546_v49 = vor.u32 %v545_v52, %v541_v6  ;;  %v550_v61 = vrot.slane %v548_v15, 1  ;;  %v200_v15 = vld [vmem:[%s3309_s14 + $0x54] sm:$0xe] }
  0xc8   : > { %v1832_v18 = vpop.permute.xlu1 %1831  ;;  %v555_v34 = vshll.u32 %v4140_v14, 16  ;;  %v1804_v63 = vrot.slane %v2932_v55, 1  ;;  %v1805_v38 = vrot.slane %v3995_v24, 1  ;;  %v1780_v54 = vrot.slane %v2924_v39, 1  ;;  %v2691_v55 = vld [vmem:[%s3309_s14 + $0xb4] sm:$0xf] }
  0xc9   : > { %v2096_v36 = vsel %vm2076_vm10, %v2063_v10, %v1832_v18  ;;  %v1816_v19 = vpop.permute.xlu0 %1815  ;;  %v1781_v22 = vrot.slane %v4013_v27, 1  ;;  %v649_v21 = vshrl.u32 %v4133_v37, 16  ;;  %v653_v62 = vrot.slane %v651_v41, 1  ;;  %v207_v27 = vld [vmem:[%s3309_s14 + $0xa8] sm:$0xe] }
  0xca   : > { %v2080_v58 = vsel %vm2076_vm10, %v2047_v11, %v1816_v19  ;;  %1711 = vrot.lane.b32.xlu1 %v1660_v46, %s3278_s21  ;;  %3071 = vmatmul.mubr.msk.bf16.vlgmr.msra.gmra.mxu1 %vm2145_vm11, %v2096_v36  ;;  %v647_v46 = vsel %vm467_vm1, %v642_v47, %v646_v23  ;;  %v656_v44 = vshll.u32 %v4155_v45, 16  ;;  %v551_v12 = vsel %vm467_vm1, %v546_v49, %v550_v61  ;;  %v4207_v39 = vld [vmem:[%s3309_s14 + $0xb8] sm:$0xf] }
  0xcb   : > { %1695 = vrot.lane.b32.xlu0 %v1564_v60, %s3278_s21  ;;  %3055 = vmatmul.mubr.msk.bf16.vlgmr.msra.gmra.mxu0 %vm2145_vm11, %v2080_v58  ;;  %v553_v51 = vshrl.u32 %v4140_v14, 16  ;;  %v557_v48 = vrot.slane %v555_v34, 1  ;;  %v560_v24 = vshll.u32 %v4162_v31, 16  ;;  %v1806_v60 = vsel %vm740_vm0, %v1804_v63, %v1805_v38  ;;  %v2693_v34 = vld [vmem:[%s3309_s14 + $0xc0] sm:$0xf] }
  0xcc   : > { %v4158_v59 = vpop.permute.xlu1 %682  ;;  %v654_v3 = vor.u32 %v653_v62, %v649_v21  ;;  %v658_v8 = vrot.slane %v656_v44, 1  ;;  %v2837_v13 = vcombine.low %v207_v27, %v4025_v56  ;;  %v1782_v5 = vsel %vm740_vm0, %v1780_v54, %v1781_v22  ;;  %v4227_v63 = vld [vmem:[%s3309_s14 + $0xc4] sm:$0xf]  ;;  %v2677_v54 = vld [vmem:[%s3309_s14 + $0x60] sm:$0xf] }
  0xcd   : > { %v4165_v29 = vpop.permute.xlu0 %666  ;;  %v558_v6 = vor.u32 %v557_v48, %v553_v51  ;;  %v562_v33 = vrot.slane %v560_v24, 1  ;;  %v2829_v43 = vcombine.low %v199_v35, %v4041_v25  ;;  %v784_v10 = vrot.slane %v4075_v40, 1  ;;  %v4213_v40 = vld [vmem:[%s3309_s14 + $0x58] sm:$0xf]  ;;  %v4233_v22 = vld [vmem:[%s3309_s14 + $0x64] sm:$0xf] }
  0xce   : > { %1837 = vrot.lane.b32.xlu1 %v1803_v30, %s3279_s22  ;;  %v659_v56 = vsel %vm467_vm1, %v654_v3, %v658_v8  ;;  %v783_v7 = vrot.slane %v2837_v13, 1  ;;  %v2838_v18 = vcombine.low %v208_v42, %v4104_v9  ;;  %v760_v36 = vrot.slane %v4092_v2, 1  ;;  %v2675_v30 = vld [vmem:[%s3309_s14 + $0x54] sm:$0xf] }
  0xcf   : > { %1821 = vrot.lane.b32.xlu0 %v1779_v32, %s3279_s22  ;;  %v563_v25 = vsel %vm467_vm1, %v558_v6, %v562_v33  ;;  %v759_v11 = vrot.slane %v2829_v43, 1  ;;  %v2830_v19 = vcombine.low %v200_v15, %v4116_v4  ;;  %v787_v4 = vrot.slane %v4155_v45, 1  ;;  %v4237_v45 = vld [vmem:[%s3309_s14 + $0xbc] ss:$0 sps:$4 sm:$0x11]  }
  0xd0   : > { %v4174_v28 = vpop.permute.xlu1 %809  ;;  %v785_v2 = vsel %vm740_vm0, %v783_v7, %v784_v10  ;;  %v786_v9 = vrot.slane %v2838_v18, 1  ;;  %v2853_v47 = vcombine.low %v2691_v55, %v4207_v39  ;;  %v763_v49 = vrot.slane %v4162_v31, 1  ;;  %v4243_v62 = vld [vmem:[%s3309_s14 + $0x5c] ss:$0 sps:$4 sm:$0x11]  }
  0xd1   : > { %v4180_v26 = vpop.permute.xlu0 %793  ;;  %v761_v41 = vsel %vm740_vm0, %v759_v11, %v760_v36  ;;  %v762_v32 = vrot.slane %v2830_v19, 1  ;;  %v2845_v61 = vcombine.low %v2675_v30, %v4213_v40  ;;  %v2854_v31 = vcombine.low %v2693_v34, %v4227_v63  ;;  %v4256_v8 = vld [vmem:[%s3309_s14 + $0xc8] ss:$0 sps:$4 sm:$0x11]  }
  0xd2   : > { %688 = vrot.lane.b32.xlu1 %v647_v46, %s3274_s17  ;;  %v788_v46 = vsel %vm740_vm0, %v786_v9, %v787_v4  ;;  %v1152_v21 = vshll.u32 %v2853_v47, 16  ;;  %v2846_v51 = vcombine.low %v2677_v54, %v4233_v22  ;;  %v1150_v27 = vshrl.u32 %v2853_v47, 16  ;;  %v4261_v43 = vld [vmem:[%s3309_s14 + $0x68] ss:$0 sps:$4 sm:$0x11]  }
  0xd3   : > { %672 = vrot.lane.b32.xlu0 %v551_v12, %s3274_s17  ;;  %v764_v12 = vsel %vm740_vm0, %v762_v32, %v763_v49  ;;  %v1056_v48 = vshll.u32 %v2845_v61, 16  ;;  %v1157_v35 = vshll.u32 %v4237_v45, 16  ;;  %v1061_v3 = vshll.u32 %v4243_v62, 16  ;;  %v2725_v9 = vld [vmem:[%s3309_s14 + $0xb4] sm:$0xe] }
  0xd4   : > { %v4187_v17 = vpop.permute.xlu1 %811  ;;  %v1164_v13 = vshll.u32 %v2854_v31, 16  ;;  %v1054_v6 = vshrl.u32 %v2845_v61, 16  ;;  %v1068_v42 = vshll.u32 %v2846_v51, 16  ;;  %v1162_v7 = vshrl.u32 %v2854_v31, 16 }
  0xd5   : > { %v4192_v0 = vpop.permute.xlu0 %795  ;;  %v1058_v33 = vrot.slane %v1056_v48, 1  ;;  %v1063_v18 = vrot.slane %v1061_v3, 1  ;;  %v1169_v11 = vshll.u32 %v4256_v8, 16  ;;  %v1066_v55 = vshrl.u32 %v2846_v51, 16  ;;  %v2726_v48 = vld [vmem:[%s3309_s14 + $0xc0] sm:$0xe] }
  0xd6   : > { %1839 = vrot.lane.b32.xlu1 %v1806_v60, %s3279_s22  ;;  %v1154_v60 = vrot.slane %v1152_v21, 1  ;;  %v1070_v30 = vrot.slane %v1068_v42, 1 }
  0xd7   : > { %1823 = vrot.lane.b32.xlu0 %v1782_v5, %s3279_s22  ;;  %v1059_v19 = vor.u32 %v1058_v33, %v1054_v6  ;;  %v1171_v49 = vrot.slane %v1169_v11, 1  ;;  %v2739_v6 = vld [vmem:[%s3309_s14 + $0x60] sm:$0xf]  ;;  %v4299_v33 = vld [vmem:[%s3309_s14 + $0x64] sm:$0xf] }
  0xd8   : > { %v4200_v52 = vpop.permute.xlu1 %921  ;;  %v1155_v10 = vor.u32 %v1154_v60, %v1150_v27  ;;  %v2755_v27 = vld [vmem:[%s3309_s14 + $0xc0] sm:$0xf]  ;;  %v4315_v11 = vld [vmem:[%s3309_s14 + $0xc8] ss:$0 sps:$4 sm:$0x11]  }
  0xd9   : > { %v4209_v58 = vpop.permute.xlu0 %905  ;;  %v1064_v54 = vsel %vm467_vm1, %v1059_v19, %v1063_v18 }
  0xda   : > { %690 = vrot.lane.b32.xlu1 %v659_v56, %s3274_s17  ;;  %v1159_v56 = vrot.slane %v1157_v35, 1  ;;  %v4289_v35 = vld [vmem:[%s3309_s14 + $0xc4] sm:$0xf] }
  0xdb   : > { %674 = vrot.lane.b32.xlu0 %v563_v25, %s3274_s17  ;;  %v1166_v25 = vrot.slane %v1164_v13, 1  ;;  %v2886_v13 = vcombine.low %v2726_v48, %v4227_v63  ;;  %v2893_v63 = vcombine.low %v2739_v6, %v4299_v33  ;;  %v1867_v6 = vsel %vm1845_vm3, %v3494_v50, %v4098_v20 }
  0xdc   : > { %v4220_v23 = vpop.permute.xlu1 %923 }
  0xdd   : > { %v4229_v38 = vpop.permute.xlu0 %907  ;;  %v1167_v32 = vor.u32 %v1166_v25, %v1162_v7  ;;  %v2757_v25 = vld [vmem:[%s3309_s14 + $0xcc] sm:$0xf]  ;;  %v1298_v19 = vrot.slane %v2886_v13, 1 }
  0xde   : > { %817 = vrot.lane.b32.xlu1 %v785_v2, %s3273_s16  ;;  %v1073_v2 = vshll.u32 %v4261_v43, 16 }
  0xdf   : > { %801 = vrot.lane.b32.xlu0 %v761_v41, %s3273_s16  ;;  %v1160_v41 = vsel %vm467_vm1, %v1155_v10, %v1159_v56  ;;  %v1172_v60 = vsel %vm467_vm1, %v1167_v32, %v1171_v49  ;;  %v2901_v10 = vcombine.low %v2755_v27, %v4289_v35 }
  0xe0   : > { %v4245_v44 = vpop.permute.xlu1 %1193  ;;  %v1075_v21 = vrot.slane %v1073_v2, 1 }
  0xe1   : > { %v4249_v24 = vpop.permute.xlu0 %1177  ;;  %v1664_v32 = vshll.u32 %v2901_v10, 16 }
  0xe2   : > { %819 = vrot.lane.b32.xlu1 %v788_v46, %s3273_s16  ;;  %v1071_v46 = vor.u32 %v1070_v30, %v1066_v55  ;;  %v1299_v55 = vrot.slane %v4256_v8, 1  ;;  %v1669_v8 = vshll.u32 %v4315_v11, 16 }
  0xe3   : > { %803 = vrot.lane.b32.xlu0 %v764_v12, %s3273_s16 }
  0xe4   : > { %v4258_v5 = vpop.permute.xlu1 %1195  ;;  %v1076_v56 = vsel %vm467_vm1, %v1071_v46, %v1075_v21  ;;  %v4334_v46 = vld [vmem:[%s3309_s14 + $0x68] ss:$0 sps:$4 sm:$0x11]   ;;  %v1568_v21 = vshll.u32 %v2893_v63, 16 }
  0xe5   : > { %v4263_v15 = vpop.permute.xlu0 %1179 }
  0xe6   : > { %929 = vrot.lane.b32.xlu1 %v2853_v47, %s3272_s15  ;;  %v2717_v47 = vld [vmem:[%s3309_s14 + $0x54] sm:$0xe] }
  0xe7   : > { %913 = vrot.lane.b32.xlu0 %v2845_v61, %s3272_s15  ;;  %v2885_v61 = vcombine.low %v2725_v9, %v4207_v39  ;;  %v2877_v12 = vcombine.low %v2717_v47, %v4213_v40  ;;  %v1296_v39 = vrot.slane %v4237_v45, 1  ;;  %v1272_v40 = vrot.slane %v4243_v62, 1  ;;  %v4312_v62 = vld [vmem:[%s3309_s14 + $0xd0] sm:$0xf] }
  0xe8   : > { %v4268_v36 = vpop.permute.xlu1 %1321  ;;  %v1275_v47 = vrot.slane %v4261_v43, 1  ;;  %v1300_v43 = vsel %vm740_vm0, %v1298_v19, %v1299_v55 }
  0xe9   : > { %v4272_v4 = vpop.permute.xlu0 %1305  ;;  %v1295_v3 = vrot.slane %v2885_v61, 1  ;;  %v1271_v7 = vrot.slane %v2877_v12, 1  ;;  %v4328_v61 = vcombine.low %v2757_v25, %v4312_v62  ;;  %v4341_v12 = vld [vmem:[%s3309_s14 + $0xd4] ss:$0 sps:$4 sm:$0x11]   ;;  %v1851_v25 = vsel %vm1845_vm3, %v3497_v53, %v4110_v57 }
  0xea   : > { %931 = vrot.lane.b32.xlu1 %v2854_v31, %s3272_s15  ;;  %v1681_v55 = vshll.u32 %v4341_v12, 16  ;;  %v1884_v50 = vsel %vm1878_vm4, %v1851_v25, %v4180_v26  ;;  %v4637_v25 = vld [vmem:[#allocation2_spill] sm:$0xff] }
  0xeb   : > { %915 = vrot.lane.b32.xlu0 %v2846_v51, %s3272_s15  ;;  %v2718_v51 = vld [vmem:[%s3309_s14 + $0x60] sm:$0xe]  ;;  %v1273_v2 = vsel %vm740_vm0, %v1271_v7, %v1272_v40  ;;  %v1573_v40 = vshll.u32 %v4334_v46, 16  ;;  %v1676_v13 = vshll.u32 %v4328_v61, 16  ;;  %v1566_v7 = vshrl.u32 %v2893_v63, 16 }
  0xec   : > { %v4279_v34 = vpop.permute.xlu1 %1323  ;;  %v2878_v45 = vcombine.low %v2718_v51, %v4233_v22  ;;  %v1297_v22 = vsel %vm740_vm0, %v1295_v3, %v1296_v39  ;;  %v1662_v39 = vshrl.u32 %v2901_v10, 16  ;;  %v1674_v19 = vshrl.u32 %v4328_v61, 16 }
  0xed   : > { %v4284_v31 = vpop.permute.xlu0 %1307 }
  0xee   : > { %1201 = vrot.lane.b32.xlu1 %v1160_v41, %s3275_s18  ;;  %v1274_v9 = vrot.slane %v2878_v45, 1  ;;  %v2741_v41 = vld [vmem:[%s3309_s14 + $0x6c] sm:$0xf]  ;;  %v1570_v45 = vrot.slane %v1568_v21, 1 }
  0xef   : > { %1185 = vrot.lane.b32.xlu0 %v1064_v54, %s3275_s18  ;;  %v4331_v54 = vld [vmem:[%s3309_s14 + $0x70] sm:$0xf] }
  0xf0   : > { %v4301_v42 = vpop.permute.xlu1 %1433  ;;  %v1276_v51 = vsel %vm740_vm0, %v1274_v9, %v1275_v47  ;;  %v4345_v27 = vcombine.low %v2741_v41, %v4331_v54  ;;  %v1571_v21 = vor.u32 %v1570_v45, %v1566_v7 }
  0xf1   : > { %v4306_v18 = vpop.permute.xlu0 %1417 }
  0xf2   : > { %1203 = vrot.lane.b32.xlu1 %v1172_v60, %s3275_s18  ;;  %v1666_v60 = vrot.slane %v1664_v32, 1  ;;  %v1580_v57 = vshll.u32 %v4345_v27, 16  ;;  %v1575_v32 = vrot.slane %v1573_v40, 1 }
  0xf3   : > { %1187 = vrot.lane.b32.xlu0 %v1076_v56, %s3275_s18  ;;  %v1671_v56 = vrot.slane %v1669_v8, 1  ;;  %v1678_v8 = vrot.slane %v1676_v13, 1 }
  0xf4   : > { %v4320_v30 = vpop.permute.xlu1 %1435  ;;  %v1667_v53 = vor.u32 %v1666_v60, %v1662_v39  ;;  %v1683_v39 = vrot.slane %v1681_v55, 1  ;;  %v1582_v13 = vrot.slane %v1580_v57, 1  ;;  %v2782_v57 = vld [vmem:[%s3309_s14 + $0x6c] sm:$0xe] }
  0xf5   : > { %v4325_v49 = vpop.permute.xlu0 %1419  ;;  %v1679_v45 = vor.u32 %v1678_v8, %v1674_v19 }
  0xf6   : > { %1329 = vrot.lane.b32.xlu1 %v1297_v22, %s3276_s19  ;;  %v1900_v22 = vsel %vm1878_vm4, %v1867_v6, %v4174_v28  ;;  %v1917_v28 = vsel %vm1911_vm5, %v1884_v50, %v4209_v58  ;;  %v2789_v58 = vld [vmem:[%s3309_s14 + $0xc0] sm:$0xe]  ;;  %v1672_v40 = vsel %vm467_vm1, %v1667_v53, %v1671_v56  ;;  %v4638_v56 = vld [vmem:[#allocation3_spill] sm:$0xff] }
  0xf7   : > { %1313 = vrot.lane.b32.xlu0 %v1273_v2, %s3276_s19  ;;  %v4362_v2 = vld [vmem:[%s3309_s14 + $0x74] ss:$0 sps:$4 sm:$0x11]   ;;  %v1933_v20 = vsel %vm1911_vm5, %v1900_v22, %v4200_v52  ;;  %v1950_v26 = vsel %vm1944_vm6, %v1917_v28, %v4249_v24  ;;  %v2781_v6 = vld [vmem:[%s3309_s14 + $0x60] sm:$0xe]  ;;  %v1853_v22 = vsel %vm1845_vm3, %v4638_v56, %v4165_v29 }
  0xf8   : > { %v1706_v48 = vpop.permute.xlu1 %1705  ;;  %v1966_v47 = vsel %vm1944_vm6, %v1933_v20, %v4245_v44  ;;  %v1983_v44 = vsel %vm1977_vm7, %v1950_v26, %v4272_v4  ;;  %v1585_v24 = vshll.u32 %v4362_v2, 16  ;;  %v2790_v20 = vld [vmem:[%s3309_s14 + $0xcc] sm:$0xe] }
  0xf9   : > { %v1690_v3 = vpop.permute.xlu0 %1689  ;;  %v1999_v52 = vsel %vm1977_vm7, %v1966_v47, %v4268_v36  ;;  %v2016_v36 = vsel %vm2010_vm8, %v1983_v44, %v4306_v18  ;;  %v1869_v18 = vsel %vm1845_vm3, %v4637_v25, %v4158_v59  ;;  %v2925_v59 = vcombine.low %v2781_v6, %v4299_v33 }
  0xfa   : > { %1331 = vrot.lane.b32.xlu1 %v1300_v43, %s3276_s19  ;;  %v1578_v43 = vshrl.u32 %v4345_v27, 16  ;;  %v2049_v4 = vsel %vm2043_vm9, %v2016_v36, %v1690_v3  ;;  %v1576_v3 = vsel %vm467_vm1, %v1571_v21, %v1575_v32  ;;  %v1587_v50 = vrot.slane %v1585_v24, 1 }
  0xfb   : > { %1315 = vrot.lane.b32.xlu0 %v1276_v51, %s3276_s19  ;;  %v2032_v51 = vsel %vm2010_vm8, %v1999_v52, %v4301_v42  ;;  %v1684_v33 = vsel %vm467_vm1, %v1679_v45, %v1683_v39  ;;  %v2934_v8 = vcombine.low %v2790_v20, %v4312_v62  ;;  %v2926_v52 = vcombine.low %v2782_v57, %v4331_v54 }
  0xfc   : > { %v4368_v9 = vpop.permute.xlu1 %1707  ;;  %v1583_v29 = vor.u32 %v1582_v13, %v1578_v43  ;;  %v1811_v54 = vrot.slane %v4341_v12, 1  ;;  %v1787_v44 = vrot.slane %v4362_v2, 1 }
  0xfd   : > { %v4375_v41 = vpop.permute.xlu0 %1691 }
  0xfe   : > { %1441 = vrot.lane.b32.xlu1 %v2901_v10, %s3277_s20  ;;  %v2065_v10 = vsel %vm2043_vm9, %v2032_v51, %v1706_v48 }
  0xff   : > { %1425 = vrot.lane.b32.xlu0 %v2893_v63, %s3277_s20  ;;  %v2933_v63 = vcombine.low %v2789_v58, %v4289_v35  ;;  %v1902_v35 = vsel %vm1878_vm4, %v1869_v18, %v4187_v17  ;;  %v1786_v58 = vrot.slane %v2926_v52, 1 }
 0x100   : > { %v1834_v60 = vpop.permute.xlu1 %1833  ;;  %v1935_v19 = vsel %vm1911_vm5, %v1902_v35, %v4220_v23 }
 0x101   : > { %v2098_v7 = vsel %vm2076_vm10, %v2065_v10, %v1834_v60  ;;  %v1818_v42 = vpop.permute.xlu0 %1817  ;;  %v1807_v47 = vrot.slane %v2933_v63, 1  ;;  %v1788_v36 = vsel %vm740_vm0, %v1786_v58, %v1787_v44 }
 0x102   : > { %v2082_v48 = vsel %vm2076_vm10, %v2049_v4, %v1818_v42  ;;  %1443 = vrot.lane.b32.xlu1 %v4328_v61, %s3277_s20  ;;  %3074 = vmatprep.mubr.msk.bf16.mxu1 %vm2145_vm11, %v2098_v7  ;;  %v1886_v61 = vsel %vm1878_vm4, %v1853_v22, %v4192_v0  ;;  %v1808_v0 = vrot.slane %v4315_v11, 1  ;;  %v1783_v11 = vrot.slane %v2925_v59, 1 }
 0x103   : > { %1427 = vrot.lane.b32.xlu0 %v4345_v27, %s3277_s20  ;;  %3058 = vmatprep.mubr.msk.bf16.mxu0 %vm2145_vm11, %v2082_v48  ;;  %v1919_v17 = vsel %vm1911_vm5, %v1886_v61, %v4229_v38  ;;  %v1968_v27 = vsel %vm1944_vm6, %v1935_v19, %v4258_v5  ;;  %v1784_v38 = vrot.slane %v4334_v46, 1  ;;  %v1588_v46 = vsel %vm467_vm1, %v1583_v29, %v1587_v50  ;;  %v4639_v19 = vld [vmem:[#allocation4_spill] sm:$0xff]  ;;  %v4640_v50 = vld [vmem:[#allocation5_spill] sm:$0xff] }
 0x104   : > { %v4419_v55 = vpop.permute.xlu1 %684  ;;  %v1952_v23 = vsel %vm1944_vm6, %v1919_v17, %v4263_v15  ;;  %v2001_v28 = vsel %vm1977_vm7, %v1968_v27, %v4279_v34  ;;  %v1809_v62 = vsel %vm740_vm0, %v1807_v47, %v1808_v0 }
 0x105   : > { %v4426_v53 = vpop.permute.xlu0 %668  ;;  %v1985_v5 = vsel %vm1977_vm7, %v1952_v23, %v4284_v31  ;;  %v2034_v32 = vsel %vm2010_vm8, %v2001_v28, %v4320_v30  ;;  %v1871_v29 = vsel %vm1845_vm3, %v4639_v19, %v4419_v55 }
 0x106   : > { %1713 = vrot.lane.b32.xlu1 %v1672_v40, %s3278_s21  ;;  %v2018_v15 = vsel %vm2010_vm8, %v1985_v5, %v4325_v49  ;;  %v2067_v34 = vsel %vm2043_vm9, %v2034_v32, %v4368_v9  ;;  %v1810_v49 = vrot.slane %v2934_v8, 1  ;;  %v1855_v20 = vsel %vm1845_vm3, %v4640_v50, %v4426_v53 }
 0x107   : > { %1697 = vrot.lane.b32.xlu0 %v1576_v3, %s3278_s21  ;;  %v2051_v31 = vsel %vm2043_vm9, %v2018_v15, %v4375_v41  ;;  %v1785_v41 = vsel %vm740_vm0, %v1783_v11, %v1784_v38 }
 0x108   : > { %v1836_v26 = vpop.permute.xlu1 %1835  ;;  %v1812_v39 = vsel %vm740_vm0, %v1810_v49, %v1811_v54 }
 0x109   : > { %v2100_v30 = vsel %vm2076_vm10, %v2067_v34, %v1836_v26  ;;  %v1820_v21 = vpop.permute.xlu0 %1819  ;;  %v4641_v26 = vld [vmem:[#allocation6_spill] sm:$0xff] }
 0x10a   : > { %v2084_v43 = vsel %vm2076_vm10, %v2051_v31, %v1820_v21  ;;  %1715 = vrot.lane.b32.xlu1 %v1684_v33, %s3278_s21  ;;  %3075 = vmatmul.mubr.msk.bf16.gmra.mxu1 %vm2145_vm11, %v2100_v30  ;;  %v4642_v31 = vld [vmem:[#allocation7_spill] sm:$0xff] }
 0x10b   : > { %1699 = vrot.lane.b32.xlu0 %v1588_v46, %s3278_s21  ;;  %3059 = vmatmul.mubr.msk.bf16.gmra.mxu0 %vm2145_vm11, %v2084_v43 }
 0x10c   : > { %v687_v9 = vpop.permute.xlu1 %686 }
 0x10d   : > { %v671_v51 = vpop.permute.xlu0 %670  ;;  %v1873_v46 = vsel %vm1845_vm3, %v4641_v26, %v687_v9 }
 0x10e   : > { %1841 = vrot.lane.b32.xlu1 %v1809_v62, %s3279_s22  ;;  %v1857_v30 = vsel %vm1845_vm3, %v4642_v31, %v671_v51 }
 0x10f   : > { %1825 = vrot.lane.b32.xlu0 %v1785_v41, %s3279_s22 }
 0x110   : > { %v814_v24 = vpop.permute.xlu1 %813 }
 0x111   : > { %v798_v10 = vpop.permute.xlu0 %797  ;;  %v1904_v17 = vsel %vm1878_vm4, %v1871_v29, %v814_v24 }
 0x112   : > { %1843 = vrot.lane.b32.xlu1 %v1812_v39, %s3279_s22  ;;  %v1888_v27 = vsel %vm1878_vm4, %v1855_v20, %v798_v10 }
 0x113   : > { %1827 = vrot.lane.b32.xlu0 %v1788_v36, %s3279_s22 }
 0x114   : > { %v816_v12 = vpop.permute.xlu1 %815 }
 0x115   : > { %v800_v60 = vpop.permute.xlu0 %799  ;;  %v1906_v21 = vsel %vm1878_vm4, %v1873_v46, %v816_v12 }
 0x116   : > { %v1890_v43 = vsel %vm1878_vm4, %v1857_v30, %v800_v60 }
 0x118   : > { %v926_v40 = vpop.permute.xlu1 %925 }
 0x119   : > { %v910_v13 = vpop.permute.xlu0 %909  ;;  %v1937_v33 = vsel %vm1911_vm5, %v1904_v17, %v926_v40 }
 0x11a   : > { %v1921_v57 = vsel %vm1911_vm5, %v1888_v27, %v910_v13 }
 0x11c   : > { %v928_v2 = vpop.permute.xlu1 %927 }
 0x11d   : > { %v912_v6 = vpop.permute.xlu0 %911  ;;  %v1939_v62 = vsel %vm1911_vm5, %v1906_v21, %v928_v2 }
 0x11e   : > { %v1923_v54 = vsel %vm1911_vm5, %v1890_v43, %v912_v6 }
 0x120   : > { %v1198_v4 = vpop.permute.xlu1 %1197 }
 0x121   : > { %v1182_v7 = vpop.permute.xlu0 %1181  ;;  %v1970_v23 = vsel %vm1944_vm6, %v1937_v33, %v1198_v4 }
 0x122   : > { %v1954_v47 = vsel %vm1944_vm6, %v1921_v57, %v1182_v7 }
 0x124   : > { %v1200_v42 = vpop.permute.xlu1 %1199 }
 0x125   : > { %v1184_v45 = vpop.permute.xlu0 %1183  ;;  %v1972_v9 = vsel %vm1944_vm6, %v1939_v62, %v1200_v42 }
 0x126   : > { %v1956_v58 = vsel %vm1944_vm6, %v1923_v54, %v1184_v45 }
 0x128   : > { %v1326_v63 = vpop.permute.xlu1 %1325 }
 0x129   : > { %v1310_v25 = vpop.permute.xlu0 %1309  ;;  %v2003_v55 = vsel %vm1977_vm7, %v1970_v23, %v1326_v63 }
 0x12a   : > { %v1987_v38 = vsel %vm1977_vm7, %v1954_v47, %v1310_v25 }
 0x12c   : > { %v1328_v18 = vpop.permute.xlu1 %1327 }
 0x12d   : > { %v1312_v48 = vpop.permute.xlu0 %1311  ;;  %v2005_v44 = vsel %vm1977_vm7, %v1972_v9, %v1328_v18 }
 0x12e   : > { %v1989_v51 = vsel %vm1977_vm7, %v1956_v58, %v1312_v48 }
 0x130   : > { %v1438_v3 = vpop.permute.xlu1 %1437 }
 0x131   : > { %v1422_v56 = vpop.permute.xlu0 %1421  ;;  %v2036_v53 = vsel %vm2010_vm8, %v2003_v55, %v1438_v3 }
 0x132   : > { %v2020_v5 = vsel %vm2010_vm8, %v1987_v38, %v1422_v56 }
 0x134   : > { %v1440_v22 = vpop.permute.xlu1 %1439 }
 0x135   : > { %v1424_v35 = vpop.permute.xlu0 %1423  ;;  %v2038_v39 = vsel %vm2010_vm8, %v2005_v44, %v1440_v22 }
 0x136   : > { %v2022_v24 = vsel %vm2010_vm8, %v1989_v51, %v1424_v35 }
 0x138   : > { %v1710_v59 = vpop.permute.xlu1 %1709 }
 0x139   : > { %v1694_v61 = vpop.permute.xlu0 %1693  ;;  %v2069_v32 = vsel %vm2043_vm9, %v2036_v53, %v1710_v59 }
 0x13a   : > { %v2053_v8 = vsel %vm2043_vm9, %v2020_v5, %v1694_v61 }
 0x13c   : > { %v1712_v0 = vpop.permute.xlu1 %1711 }
 0x13d   : > { %v1696_v28 = vpop.permute.xlu0 %1695  ;;  %v2071_v36 = vsel %vm2043_vm9, %v2038_v39, %v1712_v0 }
 0x13e   : > { %v2055_v12 = vsel %vm2043_vm9, %v2022_v24, %v1696_v28 }
 0x140   : > { %v1838_v11 = vpop.permute.xlu1 %1837 }
 0x141   : > { %v2102_v15 = vsel %vm2076_vm10, %v2069_v32, %v1838_v11  ;;  %v1822_v34 = vpop.permute.xlu0 %1821 }
 0x142   : > { %v2086_v52 = vsel %vm2076_vm10, %v2053_v8, %v1822_v34  ;;  %3078 = vmatprep.mubr.msk.bf16.mxu1 %vm2145_vm11, %v2102_v15 }
 0x143   : > { %3062 = vmatprep.mubr.msk.bf16.mxu0 %vm2145_vm11, %v2086_v52 }
 0x144   : > { %v689_v49 = vpop.permute.xlu1 %688 }
 0x145   : > { %v673_v41 = vpop.permute.xlu0 %672  ;;  %v1875_v57 = vsel %vm1845_vm3, %v4052_v1, %v689_v49 }
 0x146   : > { %v1859_v23 = vsel %vm1845_vm3, %v4067_v16, %v673_v41 }
 0x148   : > { %v1840_v10 = vpop.permute.xlu1 %1839 }
 0x149   : > { %v2104_v60 = vsel %vm2076_vm10, %v2071_v36, %v1840_v10  ;;  %v1824_v40 = vpop.permute.xlu0 %1823 }
 0x14a   : > { %v2088_v13 = vsel %vm2076_vm10, %v2055_v12, %v1824_v40  ;;  %3079 = vmatmul.mubr.msk.bf16.gmra.mxu1 %vm2145_vm11, %v2104_v60 }
 0x14b   : > { %3063 = vmatmul.mubr.msk.bf16.gmra.mxu0 %vm2145_vm11, %v2088_v13 }
 0x14c   : > { %v691_v2 = vpop.permute.xlu1 %690 }
 0x14d   : > { %v675_v6 = vpop.permute.xlu0 %674  ;;  %v1877_v11 = vsel %vm1845_vm3, %v4133_v37, %v691_v2 }
 0x14e   : > { %v1861_v16 = vsel %vm1845_vm3, %v4140_v14, %v675_v6 }
 0x150   : > { %v818_v4 = vpop.permute.xlu1 %817 }
 0x151   : > { %v802_v7 = vpop.permute.xlu0 %801  ;;  %v1908_v28 = vsel %vm1878_vm4, %v1875_v57, %v818_v4 }
 0x152   : > { %v1892_v47 = vsel %vm1878_vm4, %v1859_v23, %v802_v7 }
 0x154   : > { %v820_v42 = vpop.permute.xlu1 %819 }
 0x155   : > { %v804_v45 = vpop.permute.xlu0 %803  ;;  %v1910_v15 = vsel %vm1878_vm4, %v1877_v11, %v820_v42 }
 0x156   : > { %v1894_v46 = vsel %vm1878_vm4, %v1861_v16, %v804_v45 }
 0x158   : > { %v930_v63 = vpop.permute.xlu1 %929 }
 0x159   : > { %v914_v25 = vpop.permute.xlu0 %913  ;;  %v1941_v55 = vsel %vm1911_vm5, %v1908_v28, %v930_v63 }
 0x15a   : > { %v1925_v53 = vsel %vm1911_vm5, %v1892_v47, %v914_v25 }
 0x15c   : > { %v932_v18 = vpop.permute.xlu1 %931 }
 0x15d   : > { %v916_v48 = vpop.permute.xlu0 %915  ;;  %v1943_v52 = vsel %vm1911_vm5, %v1910_v15, %v932_v18 }
 0x15e   : > { %v1927_v21 = vsel %vm1911_vm5, %v1894_v46, %v916_v48 }
 0x160   : > { %v1202_v3 = vpop.permute.xlu1 %1201 }
 0x161   : > { %v1186_v56 = vpop.permute.xlu0 %1185  ;;  %v1974_v5 = vsel %vm1944_vm6, %v1941_v55, %v1202_v3 }
 0x162   : > { %v1958_v1 = vsel %vm1944_vm6, %v1925_v53, %v1186_v56 }
 0x164   : > { %v1204_v22 = vpop.permute.xlu1 %1203 }
 0x165   : > { %v1188_v35 = vpop.permute.xlu0 %1187  ;;  %v1976_v43 = vsel %vm1944_vm6, %v1943_v52, %v1204_v22 }
 0x166   : > { %v1960_v54 = vsel %vm1944_vm6, %v1927_v21, %v1188_v35 }
 0x168   : > { %v1330_v59 = vpop.permute.xlu1 %1329 }
 0x169   : > { %v1314_v61 = vpop.permute.xlu0 %1313  ;;  %v2007_v8 = vsel %vm1977_vm7, %v1974_v5, %v1330_v59 }
 0x16a   : > { %v1991_v34 = vsel %vm1977_vm7, %v1958_v1, %v1314_v61 }
 0x16c   : > { %v1332_v19 = vpop.permute.xlu1 %1331 }
 0x16d   : > { %v1316_v29 = vpop.permute.xlu0 %1315  ;;  %v2009_v9 = vsel %vm1977_vm7, %v1976_v43, %v1332_v19 }
 0x16e   : > { %v1993_v58 = vsel %vm1977_vm7, %v1960_v54, %v1316_v29 }
 0x170   : > { %v1442_v50 = vpop.permute.xlu1 %1441 }
 0x171   : > { %v1426_v20 = vpop.permute.xlu0 %1425  ;;  %v2040_v26 = vsel %vm2010_vm8, %v2007_v8, %v1442_v50 }
 0x172   : > { %v2024_v31 = vsel %vm2010_vm8, %v1991_v34, %v1426_v20 }
 0x174   : > { %v1444_v17 = vpop.permute.xlu1 %1443 }
 0x175   : > { %v1428_v27 = vpop.permute.xlu0 %1427  ;;  %v2042_v44 = vsel %vm2010_vm8, %v2009_v9, %v1444_v17 }
 0x176   : > { %v2026_v51 = vsel %vm2010_vm8, %v1993_v58, %v1428_v27 }
 0x178   : > { %v1714_v33 = vpop.permute.xlu1 %1713 }
 0x179   : > { %v1698_v0 = vpop.permute.xlu0 %1697  ;;  %v2073_v37 = vsel %vm2043_vm9, %v2040_v26, %v1714_v33 }
 0x17a   : > { %v2057_v14 = vsel %vm2043_vm9, %v2024_v31, %v1698_v0 }
 0x17c   : > { %v1716_v38 = vpop.permute.xlu1 %1715 }
 0x17d   : > { %v1700_v32 = vpop.permute.xlu0 %1699  ;;  %v2075_v39 = vsel %vm2043_vm9, %v2042_v44, %v1716_v38 }
 0x17e   : > { %v2059_v36 = vsel %vm2043_vm9, %v2026_v51, %v1700_v32 }
 0x180   : > { %v1842_v30 = vpop.permute.xlu1 %1841 }
 0x181   : > { %v2106_v62 = vsel %vm2076_vm10, %v2073_v37, %v1842_v30  ;;  %v1826_v49 = vpop.permute.xlu0 %1825 }
 0x182   : > { %v2090_v41 = vsel %vm2076_vm10, %v2057_v14, %v1826_v49  ;;  %3082 = vmatprep.mubr.msk.bf16.mxu1 %vm2145_vm11, %v2106_v62 }
 0x183   : > { %3066 = vmatprep.mubr.msk.bf16.mxu0 %vm2145_vm11, %v2090_v41 }
 0x184   : > { %v1844_v24 = vpop.permute.xlu1 %1843 }
 0x185   : > { %v2108_v10 = vsel %vm2076_vm10, %v2075_v39, %v1844_v24  ;;  %v1828_v12 = vpop.permute.xlu0 %1827 }
 0x186   : > { %v2092_v60 = vsel %vm2076_vm10, %v2059_v36, %v1828_v12  ;;  %3083 = vmatmul.mubr.msk.bf16.gmra.mxu1 %vm2145_vm11, %v2108_v10 }
 0x187   : > { %3067 = vmatmul.mubr.msk.bf16.gmra.mxu0 %vm2145_vm11, %v2092_v60 }
 0x18a   : > { %v3072_v40 = vpop.f32.mrf.mxu1 }
 0x18b   : > { %v3056_v13 = vpop.f32.mrf.mxu0  ;;  %vm2361_vm12 = vcmp.gt.f32.partialorder %v3072_v40, 0.0  ;;  %v2393_v2 = vmul.f32 0.1, %v3072_v40 }
 0x18c   : > { %vm2345_vm13 = vcmp.gt.f32.partialorder %v3056_v13, 0.0  ;;  %v2377_v6 = vmul.f32 0.1, %v3056_v13  ;;  %v2280_v4 = vpop.f32.mrf.mxu1 }
 0x18d   : > { %v2425_v7 = vsel %vm2361_vm12, %v3072_v40, %v2393_v2  ;;  %v2216_v42 = vpop.f32.mrf.mxu0  ;;  %vm2359_vm15 = vcmp.gt.f32.partialorder %v2280_v4, 0.0  ;;  %v2391_v45 = vmul.f32 0.1, %v2280_v4 }
 0x18e   : > { %v2409_v63 = vsel %vm2345_vm13, %v3056_v13, %v2377_v6  ;;  %v3009_v25 = vpack.c.bf16 %v2425_v7, %v2425_v7  ;;  %vm2343_vm0 = vcmp.gt.f32.partialorder %v2216_v42, 0.0  ;;  %v2375_v18 = vmul.f32 0.1, %v2216_v42  ;;  %v3073_v48 = vpop.f32.mrf.mxu1 }
 0x18f   : > { %v2993_v3 = vpack.c.bf16 %v2409_v63, %v2409_v63  ;;  %v2423_v56 = vsel %vm2359_vm15, %v2280_v4, %v2391_v45  ;;  %v3057_v22 = vpop.f32.mrf.mxu0  ;;  %vm2362_vm1 = vcmp.gt.f32.partialorder %v3073_v48, 0.0  ;;  %v2394_v35 = vmul.f32 0.1, %v3073_v48 }
 0x190   : > { %2586 = vst.msk [vmem:[%s4553_s8 + $0x48] sm:$0xf] %vm2567_vm14, %v3009_v25  ;;  %v2407_v59 = vsel %vm2343_vm0, %v2216_v42, %v2375_v18  ;;  %v3007_v61 = vpack.c.bf16 %v2423_v56, %v2423_v56  ;;  %vm2346_vm2 = vcmp.gt.f32.partialorder %v3057_v22, 0.0  ;;  %v2378_v19 = vmul.f32 0.1, %v3057_v22  ;;  %v2283_v29 = vpop.f32.mrf.mxu1 }
 0x191   : > { %2570 = vst.msk [vmem:[%s4553_s8 + $0x8] sm:$0xf] %vm2567_vm14, %v2993_v3  ;;  %v2991_v50 = vpack.c.bf16 %v2407_v59, %v2407_v59  ;;  %v2426_v20 = vsel %vm2362_vm1, %v3073_v48, %v2394_v35  ;;  %v2219_v17 = vpop.f32.mrf.mxu0  ;;  %vm2360_vm3 = vcmp.gt.f32.partialorder %v2283_v29, 0.0  ;;  %v2392_v27 = vmul.f32 0.1, %v2283_v29 }
 0x192   : > { %2584 = vst.msk [vmem:[%s4553_s8 + $0x40] sm:$0xf] %vm2567_vm14, %v3007_v61  ;;  %v2410_v33 = vsel %vm2346_vm2, %v3057_v22, %v2378_v19  ;;  %v3010_v0 = vpack.c.bf16 %v2426_v20, %v2426_v20  ;;  %vm2344_vm4 = vcmp.gt.f32.partialorder %v2219_v17, 0.0  ;;  %v2376_v57 = vmul.f32 0.1, %v2219_v17 }
 0x193   : > { %2568 = vst.msk [vmem:[%s4553_s8] sm:$0xf] %vm2567_vm14, %v2991_v50  ;;  %v2994_v23 = vpack.c.bf16 %v2410_v33, %v2410_v33  ;;  %v2424_v28 = vsel %vm2360_vm3, %v2283_v29, %v2392_v27 }
 0x194   : > { %2587 = vst.msk [vmem:[%s4553_s8 + $0x4c] sm:$0xf] %vm2567_vm14, %v3010_v0  ;;  %v2408_v47 = vsel %vm2344_vm4, %v2219_v17, %v2376_v57  ;;  %v3008_v55 = vpack.c.bf16 %v2424_v28, %v2424_v28 }
 0x195   : > { %2571 = vst.msk [vmem:[%s4553_s8 + $0xc] sm:$0xf] %vm2567_vm14, %v2994_v23  ;;  %v2992_v38 = vpack.c.bf16 %v2408_v47, %v2408_v47 }
 0x196   : > { %2585 = vst.msk [vmem:[%s4553_s8 + $0x44] sm:$0xf] %vm2567_vm14, %v3008_v55 }
 0x197   : > { %2569 = vst.msk [vmem:[%s4553_s8 + $0x4] sm:$0xf] %vm2567_vm14, %v2992_v38 }
 0x1ca   : > { %v3076_v53 = vpop.f32.mrf.mxu1 }
 0x1cb   : > { %v3060_v5 = vpop.f32.mrf.mxu0  ;;  %vm2365_vm5 = vcmp.gt.f32.partialorder %v3076_v53, 0.0  ;;  %v2397_v32 = vmul.f32 0.1, %v3076_v53 }
 0x1cc   : > { %vm2349_vm6 = vcmp.gt.f32.partialorder %v3060_v5, 0.0  ;;  %v2381_v11 = vmul.f32 0.1, %v3060_v5  ;;  %v2296_v1 = vpop.f32.mrf.mxu1 }
 0x1cd   : > { %v2429_v8 = vsel %vm2365_vm5, %v3076_v53, %v2397_v32  ;;  %v2232_v16 = vpop.f32.mrf.mxu0  ;;  %vm2363_vm7 = vcmp.gt.f32.partialorder %v2296_v1, 0.0  ;;  %v2395_v15 = vmul.f32 0.1, %v2296_v1 }
 0x1ce   : > { %v2413_v34 = vsel %vm2349_vm6, %v3060_v5, %v2381_v11  ;;  %v3013_v26 = vpack.c.bf16 %v2429_v8, %v2429_v8  ;;  %vm2347_vm8 = vcmp.gt.f32.partialorder %v2232_v16, 0.0  ;;  %v2379_v46 = vmul.f32 0.1, %v2232_v16  ;;  %v3077_v52 = vpop.f32.mrf.mxu1 }
 0x1cf   : > { %v2997_v31 = vpack.c.bf16 %v2413_v34, %v2413_v34  ;;  %v2427_v37 = vsel %vm2363_vm7, %v2296_v1, %v2395_v15  ;;  %v3061_v30 = vpop.f32.mrf.mxu0  ;;  %vm2366_vm9 = vcmp.gt.f32.partialorder %v3077_v52, 0.0  ;;  %v2398_v21 = vmul.f32 0.1, %v3077_v52 }
 0x1d0   : > { %2590 = vst.msk [vmem:[%s4553_s8 + $0x58] sm:$0xf] %vm2567_vm14, %v3013_v26  ;;  %v2411_v43 = vsel %vm2347_vm8, %v2232_v16, %v2379_v46  ;;  %v3011_v14 = vpack.c.bf16 %v2427_v37, %v2427_v37  ;;  %vm2350_vm10 = vcmp.gt.f32.partialorder %v3061_v30, 0.0  ;;  %v2382_v62 = vmul.f32 0.1, %v3061_v30  ;;  %v2299_v49 = vpop.f32.mrf.mxu1 }
 0x1d1   : > { %2574 = vst.msk [vmem:[%s4553_s8 + $0x18] sm:$0xf] %vm2567_vm14, %v2997_v31  ;;  %v2995_v54 = vpack.c.bf16 %v2411_v43, %v2411_v43  ;;  %v2430_v9 = vsel %vm2366_vm9, %v3077_v52, %v2398_v21  ;;  %v2235_v41 = vpop.f32.mrf.mxu0  ;;  %vm2364_vm11 = vcmp.gt.f32.partialorder %v2299_v49, 0.0  ;;  %v2396_v58 = vmul.f32 0.1, %v2299_v49 }
 0x1d2   : > { %2588 = vst.msk [vmem:[%s4553_s8 + $0x50] sm:$0xf] %vm2567_vm14, %v3011_v14  ;;  %v2414_v44 = vsel %vm2350_vm10, %v3061_v30, %v2382_v62  ;;  %v3014_v51 = vpack.c.bf16 %v2430_v9, %v2430_v9  ;;  %vm2348_vm12 = vcmp.gt.f32.partialorder %v2235_v41, 0.0  ;;  %v2380_v39 = vmul.f32 0.1, %v2235_v41 }
 0x1d3   : > { %2572 = vst.msk [vmem:[%s4553_s8 + $0x10] sm:$0xf] %vm2567_vm14, %v2995_v54  ;;  %v2998_v24 = vpack.c.bf16 %v2414_v44, %v2414_v44  ;;  %v2428_v36 = vsel %vm2364_vm11, %v2299_v49, %v2396_v58 }
 0x1d4   : > { %2591 = vst.msk [vmem:[%s4553_s8 + $0x5c] sm:$0xf] %vm2567_vm14, %v3014_v51  ;;  %v2412_v10 = vsel %vm2348_vm12, %v2235_v41, %v2380_v39  ;;  %v3012_v12 = vpack.c.bf16 %v2428_v36, %v2428_v36 }
 0x1d5   : > { %2575 = vst.msk [vmem:[%s4553_s8 + $0x1c] sm:$0xf] %vm2567_vm14, %v2998_v24  ;;  %v2996_v60 = vpack.c.bf16 %v2412_v10, %v2412_v10 }
 0x1d6   : > { %2589 = vst.msk [vmem:[%s4553_s8 + $0x54] sm:$0xf] %vm2567_vm14, %v3012_v12 }
 0x1d7   : > { %2573 = vst.msk [vmem:[%s4553_s8 + $0x14] sm:$0xf] %vm2567_vm14, %v2996_v60 }
 0x20a   : > { %v3080_v40 = vpop.f32.mrf.mxu1 }
 0x20b   : > { %v3064_v13 = vpop.f32.mrf.mxu0  ;;  %vm2369_vm13 = vcmp.gt.f32.partialorder %v3080_v40, 0.0  ;;  %v2401_v2 = vmul.f32 0.1, %v3080_v40 }
 0x20c   : > { %vm2353_vm15 = vcmp.gt.f32.partialorder %v3064_v13, 0.0  ;;  %v2385_v6 = vmul.f32 0.1, %v3064_v13  ;;  %v2312_v4 = vpop.f32.mrf.mxu1 }
 0x20d   : > { %v2433_v7 = vsel %vm2369_vm13, %v3080_v40, %v2401_v2  ;;  %v2248_v42 = vpop.f32.mrf.mxu0  ;;  %vm2367_vm0 = vcmp.gt.f32.partialorder %v2312_v4, 0.0  ;;  %v2399_v45 = vmul.f32 0.1, %v2312_v4 }
 0x20e   : > { %v2417_v63 = vsel %vm2353_vm15, %v3064_v13, %v2385_v6  ;;  %v3017_v25 = vpack.c.bf16 %v2433_v7, %v2433_v7  ;;  %vm2351_vm1 = vcmp.gt.f32.partialorder %v2248_v42, 0.0  ;;  %v2383_v18 = vmul.f32 0.1, %v2248_v42  ;;  %v3081_v48 = vpop.f32.mrf.mxu1 }
 0x20f   : > { %v3001_v3 = vpack.c.bf16 %v2417_v63, %v2417_v63  ;;  %v2431_v56 = vsel %vm2367_vm0, %v2312_v4, %v2399_v45  ;;  %v3065_v22 = vpop.f32.mrf.mxu0  ;;  %vm2370_vm2 = vcmp.gt.f32.partialorder %v3081_v48, 0.0  ;;  %v2402_v35 = vmul.f32 0.1, %v3081_v48 }
 0x210   : > { %2594 = vst.msk [vmem:[%s4553_s8 + $0x68] sm:$0xf] %vm2567_vm14, %v3017_v25  ;;  %v2415_v59 = vsel %vm2351_vm1, %v2248_v42, %v2383_v18  ;;  %v3015_v61 = vpack.c.bf16 %v2431_v56, %v2431_v56  ;;  %vm2354_vm3 = vcmp.gt.f32.partialorder %v3065_v22, 0.0  ;;  %v2386_v19 = vmul.f32 0.1, %v3065_v22  ;;  %v2315_v29 = vpop.f32.mrf.mxu1 }
 0x211   : > { %2578 = vst.msk [vmem:[%s4553_s8 + $0x28] sm:$0xf] %vm2567_vm14, %v3001_v3  ;;  %v2999_v50 = vpack.c.bf16 %v2415_v59, %v2415_v59  ;;  %v2434_v20 = vsel %vm2370_vm2, %v3081_v48, %v2402_v35  ;;  %v2251_v17 = vpop.f32.mrf.mxu0  ;;  %vm2368_vm4 = vcmp.gt.f32.partialorder %v2315_v29, 0.0  ;;  %v2400_v27 = vmul.f32 0.1, %v2315_v29 }
 0x212   : > { %2592 = vst.msk [vmem:[%s4553_s8 + $0x60] sm:$0xf] %vm2567_vm14, %v3015_v61  ;;  %v2418_v33 = vsel %vm2354_vm3, %v3065_v22, %v2386_v19  ;;  %v3018_v0 = vpack.c.bf16 %v2434_v20, %v2434_v20  ;;  %vm2352_vm5 = vcmp.gt.f32.partialorder %v2251_v17, 0.0  ;;  %v2384_v57 = vmul.f32 0.1, %v2251_v17 }
 0x213   : > { %2576 = vst.msk [vmem:[%s4553_s8 + $0x20] sm:$0xf] %vm2567_vm14, %v2999_v50  ;;  %v3002_v23 = vpack.c.bf16 %v2418_v33, %v2418_v33  ;;  %v2432_v28 = vsel %vm2368_vm4, %v2315_v29, %v2400_v27 }
 0x214   : > { %2595 = vst.msk [vmem:[%s4553_s8 + $0x6c] sm:$0xf] %vm2567_vm14, %v3018_v0  ;;  %v2416_v47 = vsel %vm2352_vm5, %v2251_v17, %v2384_v57  ;;  %v3016_v55 = vpack.c.bf16 %v2432_v28, %v2432_v28 }
 0x215   : > { %2579 = vst.msk [vmem:[%s4553_s8 + $0x2c] sm:$0xf] %vm2567_vm14, %v3002_v23  ;;  %v3000_v38 = vpack.c.bf16 %v2416_v47, %v2416_v47 }
 0x216   : > { %2593 = vst.msk [vmem:[%s4553_s8 + $0x64] sm:$0xf] %vm2567_vm14, %v3016_v55 }
 0x217   : > { %2577 = vst.msk [vmem:[%s4553_s8 + $0x24] sm:$0xf] %vm2567_vm14, %v3000_v38 }
 0x246   : > { %v3084_v53 = vpop.f32.mrf.mxu1 }
 0x247   : > { %v3068_v5 = vpop.f32.mrf.mxu0  ;;  %vm2373_vm6 = vcmp.gt.f32.partialorder %v3084_v53, 0.0  ;;  %v2405_v32 = vmul.f32 0.1, %v3084_v53 }
 0x248   : > { %vm2357_vm7 = vcmp.gt.f32.partialorder %v3068_v5, 0.0  ;;  %v2389_v11 = vmul.f32 0.1, %v3068_v5  ;;  %v2328_v1 = vpop.f32.mrf.mxu1 }
 0x249   : > { %v2437_v8 = vsel %vm2373_vm6, %v3084_v53, %v2405_v32  ;;  %v2264_v16 = vpop.f32.mrf.mxu0  ;;  %vm2371_vm8 = vcmp.gt.f32.partialorder %v2328_v1, 0.0  ;;  %v2403_v15 = vmul.f32 0.1, %v2328_v1 }
 0x24a   : > { %v2421_v34 = vsel %vm2357_vm7, %v3068_v5, %v2389_v11  ;;  %v3021_v26 = vpack.c.bf16 %v2437_v8, %v2437_v8  ;;  %vm2355_vm9 = vcmp.gt.f32.partialorder %v2264_v16, 0.0  ;;  %v2387_v46 = vmul.f32 0.1, %v2264_v16  ;;  %v3085_v52 = vpop.f32.mrf.mxu1 }
 0x24b   : > { %v3005_v31 = vpack.c.bf16 %v2421_v34, %v2421_v34  ;;  %v2435_v37 = vsel %vm2371_vm8, %v2328_v1, %v2403_v15  ;;  %v3069_v30 = vpop.f32.mrf.mxu0  ;;  %vm2374_vm10 = vcmp.gt.f32.partialorder %v3085_v52, 0.0  ;;  %v2406_v21 = vmul.f32 0.1, %v3085_v52 }
 0x24c   : > { %2598 = vst.msk [vmem:[%s4553_s8 + $0x78] sm:$0xf] %vm2567_vm14, %v3021_v26  ;;  %v2419_v43 = vsel %vm2355_vm9, %v2264_v16, %v2387_v46  ;;  %v3019_v14 = vpack.c.bf16 %v2435_v37, %v2435_v37  ;;  %vm2358_vm11 = vcmp.gt.f32.partialorder %v3069_v30, 0.0  ;;  %v2390_v62 = vmul.f32 0.1, %v3069_v30  ;;  %v2331_v49 = vpop.f32.mrf.mxu1 }
 0x24d   : > { %2582 = vst.msk [vmem:[%s4553_s8 + $0x38] sm:$0xf] %vm2567_vm14, %v3005_v31  ;;  %v3003_v54 = vpack.c.bf16 %v2419_v43, %v2419_v43  ;;  %v2438_v9 = vsel %vm2374_vm10, %v3085_v52, %v2406_v21  ;;  %v2267_v41 = vpop.f32.mrf.mxu0  ;;  %vm2372_vm12 = vcmp.gt.f32.partialorder %v2331_v49, 0.0  ;;  %v2404_v58 = vmul.f32 0.1, %v2331_v49 }
 0x24e   : > { %2596 = vst.msk [vmem:[%s4553_s8 + $0x70] sm:$0xf] %vm2567_vm14, %v3019_v14  ;;  %v2422_v44 = vsel %vm2358_vm11, %v3069_v30, %v2390_v62  ;;  %v3022_v51 = vpack.c.bf16 %v2438_v9, %v2438_v9  ;;  %vm2356_vm13 = vcmp.gt.f32.partialorder %v2267_v41, 0.0  ;;  %v2388_v39 = vmul.f32 0.1, %v2267_v41 }
 0x24f   : > { %2580 = vst.msk [vmem:[%s4553_s8 + $0x30] sm:$0xf] %vm2567_vm14, %v3003_v54  ;;  %v3006_v24 = vpack.c.bf16 %v2422_v44, %v2422_v44  ;;  %v2436_v36 = vsel %vm2372_vm12, %v2331_v49, %v2404_v58 }
 0x250   : > { %2599 = vst.msk [vmem:[%s4553_s8 + $0x7c] sm:$0xf] %vm2567_vm14, %v3022_v51  ;;  %v2420_v10 = vsel %vm2356_vm13, %v2267_v41, %v2388_v39  ;;  %v3020_v12 = vpack.c.bf16 %v2436_v36, %v2436_v36 }
 0x251   : > { %2583 = vst.msk [vmem:[%s4553_s8 + $0x3c] sm:$0xf] %vm2567_vm14, %v3006_v24  ;;  %v3004_v60 = vpack.c.bf16 %v2420_v10, %v2420_v10 }
 0x252   : > { %2597 = vst.msk [vmem:[%s4553_s8 + $0x74] sm:$0xf] %vm2567_vm14, %v3020_v12 }
 0x253   : > { %2581 = vst.msk [vmem:[%s4553_s8 + $0x34] sm:$0xf] %vm2567_vm14, %v3004_v60 }
 0x254 PF: > { %s12_s9 = sadd.s32 1, %s3270_s9  }
 0x255   : > { %p9_p4 = scmp.ge.s32.totalorder %s12_s9, 4  }
 0x257   :  { %11 = sbr.rel (!%p9_p4) target bundleno = 1 (0x1), region = 60 }

</bundles_post_ra>
